<compile_context>
chip_gen: v6e
topology: v6e:2x2x1
jax: 0.10.0
libtpu: 0.0.40
codegen_flags: <defaults>
</compile_context>

<pallas_src>
import functools

import jax
import jax.numpy as jnp
from jax.experimental import pallas as pl
from jax.experimental.pallas import tpu as pltpu

RDB_DLIST = (1, 2, 1)          # static structure (kept OUT of the param pytree)
SAM_DLIST = (1, 2, 3, 2, 1)


def _round_up(v, m):
    return ((v + m - 1) // m) * m


# ----------------------------------------------------------------------------
# Pallas kernel: single-shot (Cout,K) @ (K,M) + bias (+ ReLU), whole operands
# resident in VMEM, bf16 MXU inputs, f32 accumulate, bf16 lane-dense store.
# ----------------------------------------------------------------------------
def _conv_matmul_kernel(w_ref, p_ref, b_ref, o_ref, *, relu):
    acc = jnp.dot(w_ref[...], p_ref[...], preferred_element_type=jnp.float32)
    acc = acc + b_ref[...]                       # (Cp, 1) lane-broadcast bias
    if relu:
        acc = jnp.maximum(acc, 0.0)
    o_ref[...] = acc.astype(o_ref.dtype)


@functools.lru_cache(maxsize=None)
def _build_conv_matmul(cp, kp, mp, relu):
    """One pallas_call per (Cout_pad, K_pad, M_pad, relu) signature."""
    kernel = functools.partial(_conv_matmul_kernel, relu=relu)
    vmem = pl.BlockSpec(memory_space=pltpu.MemorySpace.VMEM)
    return pl.pallas_call(
        kernel,
        out_shape=jax.ShapeDtypeStruct((cp, mp), jnp.bfloat16),
        in_specs=[vmem, vmem, vmem],
        out_specs=vmem,
    )


def pallas_conv_matmul(w_mat, p_mat, bias, relu=False):
    """(Cout,K) @ (K,M) + bias[Cout], optional ReLU -> (Cout, M) bf16."""
    Cout, K = w_mat.shape
    K2, M = p_mat.shape
    assert K == K2
    cp = _round_up(Cout, 8)
    kp = _round_up(K, 16)      # bf16 sublane tile only — no 128-padding of K
    mp = _round_up(M, 128)     # lane-dense output stores

    wp = jnp.pad(w_mat.astype(jnp.bfloat16), ((0, cp - Cout), (0, kp - K)))
    pp = jnp.pad(p_mat.astype(jnp.bfloat16), ((0, kp - K), (0, mp - M)))
    bp = jnp.pad(bias.astype(jnp.float32), (0, cp - Cout)).reshape(cp, 1)

    out = _build_conv_matmul(cp, kp, mp, relu)(wp, pp, bp)
    return out[:Cout, :M]


# ----------------------------------------------------------------------------
# Conv2d on CBHW activations: x (Cin, B, H, W), w (Cout, Cin, kh, kw).
# im2col in this layout needs no transpose at all.
# ----------------------------------------------------------------------------
def conv2d(x, w, b, stride=1, padding=0, dilation=1, relu=False):
    Cin, B, H, W = x.shape
    Cout, _, kh, kw = w.shape
    if padding:
        x = jnp.pad(x, ((0, 0), (0, 0), (padding, padding), (padding, padding)))
    Hp, Wp = x.shape[2], x.shape[3]
    out_h = (Hp - dilation * (kh - 1) - 1) // stride + 1
    out_w = (Wp - dilation * (kw - 1) - 1) // stride + 1

    if kh == 1 and kw == 1 and stride == 1:
        p = x.reshape(Cin, B * Hp * Wp)                      # 1x1: pure reshape
    else:
        # TODO(synk): im2col is XLA glue (fully fused under the whole-forward
        # jit); DMA-ing shifted windows from the kernel would remove the
        # kh*kw-x activation read amplification.
        cols = []
        for i in range(kh):
            for j in range(kw):
                hs, ws = i * dilation, j * dilation
                sl = x[:, :,
                       hs:hs + (out_h - 1) * stride + 1:stride,
                       ws:ws + (out_w - 1) * stride + 1:stride]
                cols.append(sl.reshape(Cin, B * out_h * out_w))
        # rows ordered cin-major, tap-minor to match w.reshape(Cout, Cin*kh*kw)
        p = jnp.stack(cols, axis=1).reshape(Cin * kh * kw, B * out_h * out_w)

    wm = w.reshape(Cout, Cin * kh * kw)
    o = pallas_conv_matmul(wm, p, b, relu)                   # (Cout, B*oh*ow)
    return o.reshape(Cout, B, out_h, out_w)                  # stays CBHW


# ----------------------------------------------------------------------------
# Plain-JAX glue ops
# ----------------------------------------------------------------------------
def pixel_unshuffle(x, r):
    # NCHW, matches F.pixel_unshuffle.
    B, C, H, W = x.shape
    x = x.reshape(B, C, H // r, r, W // r, r)
    x = x.transpose(0, 1, 3, 5, 2, 4)
    return x.reshape(B, C * r * r, H // r, W // r)


def frequency_processing(x, enhancement_factor=0.5):
    # TODO(synk): FFT has no Pallas TPU primitive; computed in plain JAX (XLA).
    # fftshift/ifftshift over ALL axes (matches torch); the extra shifts on the
    # leading (C, B) axes cancel because the mask is spatial-only.
    orig_dtype = x.dtype
    xf = jnp.fft.fft2(x.astype(jnp.float32))
    xf = jnp.fft.fftshift(xf)
    H, W = x.shape[-2], x.shape[-1]
    cy, cx = H // 2, W // 2
    Y, X = jnp.meshgrid(jnp.arange(H), jnp.arange(W), indexing="ij")
    dist = jnp.sqrt(((X - cx) ** 2 + (Y - cy) ** 2).astype(jnp.float32))
    mask = 1.0 + enhancement_factor * dist / dist.max()
    xf = xf * mask
    xf = jnp.fft.ifftshift(xf)
    return jnp.real(jnp.fft.ifft2(xf)).astype(orig_dtype)


def bilinear_resize(x, out_h, out_w):
    # Matches F.interpolate(mode='bilinear', align_corners=False). Works on any
    # (..., H, W) layout; used here on CBHW tensors.
    H, W = x.shape[-2], x.shape[-1]
    if out_h == H and out_w == W:
        return x

    def coords(out_size, in_size):
        scale = in_size / out_size
        c = (jnp.arange(out_size, dtype=jnp.float32) + 0.5) * scale - 0.5
        c = jnp.maximum(c, 0.0)
        i0 = jnp.minimum(jnp.floor(c).astype(jnp.int32), in_size - 1)
        i1 = jnp.minimum(i0 + 1, in_size - 1)
        return i0, i1, c - i0.astype(jnp.float32)

    y0, y1, fy = coords(out_h, H)
    x0, x1, fx = coords(out_w, W)
    fy = fy.reshape(1, 1, out_h, 1)
    fx = fx.reshape(1, 1, 1, out_w)
    top, bot = x[:, :, y0, :], x[:, :, y1, :]
    tl, tr = top[:, :, :, x0], top[:, :, :, x1]
    bl, br = bot[:, :, :, x0], bot[:, :, :, x1]
    t = tl * (1.0 - fx) + tr * fx
    b_ = bl * (1.0 - fx) + br * fx
    return (t * (1.0 - fy) + b_ * fy).astype(x.dtype)


# ----------------------------------------------------------------------------
# Deterministic parameter init (arrays only — static structure stays Python)
# ----------------------------------------------------------------------------
class KeyGen:
    def __init__(self, seed):
        self.key = jax.random.PRNGKey(seed)

    def __call__(self):
        self.key, sub = jax.random.split(self.key)
        return sub


def init_conv_params(kg, cin, cout, k):
    return {"w": jax.random.normal(kg(), (cout, cin, k, k), jnp.float32) * 0.05,
            "b": jax.random.normal(kg(), (cout,), jnp.float32) * 0.05}


def init_db(kg, in_channel, d_list, inter_num):
    layers, c = [], in_channel
    for _ in d_list:
        layers.append(init_conv_params(kg, c, inter_num, 3))
        c += inter_num
    return {"layers": layers, "post": init_conv_params(kg, c, in_channel, 1)}


def init_csaf(kg, in_chnls, ratio=4):
    mid = in_chnls // ratio
    return {"c1": init_conv_params(kg, in_chnls, mid, 1),
            "c2": init_conv_params(kg, mid, mid, 1),
            "ex": init_conv_params(kg, mid, in_chnls, 1)}


def init_sam(kg, in_channel, d_list, inter_num):
    return {"b0": init_db(kg, in_channel, d_list, inter_num),
            "b2": init_db(kg, in_channel, d_list, inter_num),
            "b4": init_db(kg, in_channel, d_list, inter_num),
            "fusion": init_csaf(kg, 3 * in_channel)}


def init_encoder_level(kg, feature_num, inter_num, level, sam_number):
    p = {"rdb": init_db(kg, feature_num, RDB_DLIST, inter_num),
         "sams": [init_sam(kg, feature_num, SAM_DLIST, inter_num)
                  for _ in range(sam_number)]}
    if level < 3:
        p["down"] = init_conv_params(kg, feature_num, 2 * feature_num, 3)
    return p


def init_encoder(kg, feature_num, inter_num, sam_number):
    return {"conv_first": init_conv_params(kg, 12, feature_num, 5),
            "e1": init_encoder_level(kg, feature_num, inter_num, 1, sam_number),
            "e2": init_encoder_level(kg, 2 * feature_num, inter_num, 2, sam_number),
            "e3": init_encoder_level(kg, 4 * feature_num, inter_num, 3, sam_number)}


# ----------------------------------------------------------------------------
# Functional forward passes (all on CBHW activations, bf16 between convs)
# ----------------------------------------------------------------------------
def db_forward(p, x, d_list):
    # TODO(synk): fuse the whole dense block (convs + concat + 1x1 post) into a
    # single pallas_call with the concatenated activation kept in VMEM scratch.
    t = x
    for d, lp in zip(d_list, p["layers"]):
        _t = conv2d(t, lp["w"], lp["b"], padding=d, dilation=d, relu=True)
        t = jnp.concatenate([_t, t], axis=0)       # channel axis = 0 in CBHW
    return conv2d(t, p["post"]["w"], p["post"]["b"])


def rdb_forward(p, x):
    return db_forward(p, x, RDB_DLIST) + x


def csaf_forward(p, x0, x2, x4):
    # Pooled tensors are (C, B) with B tiny -> these 1x1 convs run as plain
    # jnp.dot (a Pallas tile with M=B would be ~99% padding).
    out0 = jnp.mean(x0.astype(jnp.float32), axis=(2, 3))     # (C, B)
    out2 = jnp.mean(x2.astype(jnp.float32), axis=(2, 3))
    out4 = jnp.mean(x4.astype(jnp.float32), axis=(2, 3))
    out = jnp.concatenate([out0, out2, out4], axis=0)        # (3C, B)

    def dense(v, cp_):
        w = cp_["w"].reshape(cp_["w"].shape[0], cp_["w"].shape[1])
        return w @ v + cp_["b"][:, None]

    out = jax.nn.relu(dense(out, p["c1"]))
    out = jax.nn.relu(dense(out, p["c2"]))
    out = jax.nn.sigmoid(dense(out, p["ex"]))
    w0, w2, w4 = jnp.split(out, 3, axis=0)                   # each (C, B)
    w0 = w0.astype(x0.dtype)[:, :, None, None]
    w2 = w2.astype(x0.dtype)[:, :, None, None]
    w4 = w4.astype(x0.dtype)[:, :, None, None]
    return x0 * w0 + x2 * w2 + x4 * w4


def sam_forward(p, x):
    C, B, H, W = x.shape
    x2 = bilinear_resize(x, H // 2, W // 2)
    x4 = bilinear_resize(x, H // 4, W // 4)
    y0 = db_forward(p["b0"], x, SAM_DLIST)
    y2 = db_forward(p["b2"], x2, SAM_DLIST)
    y4 = db_forward(p["b4"], x4, SAM_DLIST)
    y2 = bilinear_resize(y2, H, W)
    y4 = bilinear_resize(y4, H, W)
    y = csaf_forward(p["fusion"], y0, y2, y4)
    return x + y


def encoder_level_forward(p, x, level):
    out = rdb_forward(p["rdb"], x)
    out = frequency_processing(out)
    # TODO(synk): use_transformer=False path only (CSWinBlock not instantiated).
    for sp in p["sams"]:
        out = sam_forward(sp, out)
    if level < 3:
        down = conv2d(out, p["down"]["w"], p["down"]["b"], stride=2, padding=1,
                      relu=True)
        return out, down
    return out


@jax.jit
def encoder_forward(params, x):
    x = pixel_unshuffle(x, 2)                                # NCHW
    x = x.transpose(1, 0, 2, 3).astype(jnp.bfloat16)         # -> CBHW, bf16
    x = conv2d(x, params["conv_first"]["w"], params["conv_first"]["b"],
               padding=2, relu=True)
    o1, d1 = encoder_level_forward(params["e1"], x, 1)
    o2, d2 = encoder_level_forward(params["e2"], d1, 2)
    o3 = encoder_level_forward(params["e3"], d2, 3)

    def to_nchw(t):
        return t.transpose(1, 0, 2, 3).astype(jnp.float32)

    return to_nchw(o1), to_nchw(o2), to_nchw(o3)


# ----------------------------------------------------------------------------
if __name__ == "__main__":
    feature_num, inter_num, sam_number = 8, 8, 1

    params = init_encoder(KeyGen(42), feature_num, inter_num, sam_number)

    x = jax.random.normal(jax.random.PRNGKey(0), (2, 3, 32, 32), jnp.float32)

    o1, o2, o3 = encoder_forward(params, x)
    jax.block_until_ready((o1, o2, o3))

    assert o1.shape == (2, feature_num, 16, 16)
    assert o2.shape == (2, 2 * feature_num, 8, 8)
    assert o3.shape == (2, 4 * feature_num, 4, 4)
    assert all(jnp.isfinite(o).all() for o in (o1, o2, o3))

    print("KERNEL_OK")
</pallas_src>

<mosaic_0001>
module attributes {stable_mosaic.version = 11 : i64} {
  func.func @_conv_matmul_kernel(%arg0: memref<8x304xbf16, #tpu.memory_space<vmem>>, %arg1: memref<304x512xbf16, #tpu.memory_space<vmem>>, %arg2: memref<8x1xf32, #tpu.memory_space<vmem>>, %arg3: memref<8x512xbf16, #tpu.memory_space<vmem>>) attributes {dimension_semantics = [], scalar_prefetch = 0 : i64, scratch_operands = 0 : i64, tpu.core_type = #tpu.core_type<tc>} {
    %c0 = arith.constant 0 : index
    %c0_0 = arith.constant 0 : index
    %0 = vector.load %arg0[%c0, %c0_0] : memref<8x304xbf16, #tpu.memory_space<vmem>>, vector<8x304xbf16>
    %c0_1 = arith.constant 0 : index
    %c0_2 = arith.constant 0 : index
    %1 = vector.load %arg1[%c0_1, %c0_2] : memref<304x512xbf16, #tpu.memory_space<vmem>>, vector<304x512xbf16>
    %cst = arith.constant dense<0.000000e+00> : vector<8x512xf32>
    %2 = tpu.matmul %0, %1, %cst {dimension_numbers = #tpu.dot_dimension_numbers<[1], [0], [0], [1], [0, 0, 1, 1], [], []>} : vector<8x304xbf16>, vector<304x512xbf16>, vector<8x512xf32> -> vector<8x512xf32>
    %c0_3 = arith.constant 0 : index
    %c0_4 = arith.constant 0 : index
    %3 = vector.load %arg2[%c0_3, %c0_4] : memref<8x1xf32, #tpu.memory_space<vmem>>, vector<8x1xf32>
    %4 = vector.broadcast %3 : vector<8x1xf32> to vector<8x512xf32>
    %5 = arith.addf %2, %4 : vector<8x512xf32>
    %cst_5 = arith.constant 0.000000e+00 : f32
    %6 = vector.broadcast %cst_5 : f32 to vector<8x512xf32>
    %7 = arith.maximumf %5, %6 : vector<8x512xf32>
    %8 = arith.truncf %7 : vector<8x512xf32> to vector<8x512xbf16>
    %c0_6 = arith.constant 0 : index
    %c0_7 = arith.constant 0 : index
    %9 = vector.load %arg3[%c0_6, %c0_7] : memref<8x512xbf16, #tpu.memory_space<vmem>>, vector<8x512xbf16>
    tpu.vector_store %arg3[%c0_6, %c0_7], %8 {strides = array<i32>} : memref<8x512xbf16, #tpu.memory_space<vmem>>, vector<8x512xbf16>,
    return
  }
}

module attributes {stable_mosaic.version = 11 : i64} {
  func.func @_conv_matmul_kernel(%arg0: memref<8x80xbf16, #tpu.memory_space<vmem>>, %arg1: memref<80x512xbf16, #tpu.memory_space<vmem>>, %arg2: memref<8x1xf32, #tpu.memory_space<vmem>>, %arg3: memref<8x512xbf16, #tpu.memory_space<vmem>>) attributes {dimension_semantics = [], scalar_prefetch = 0 : i64, scratch_operands = 0 : i64, tpu.core_type = #tpu.core_type<tc>} {
    %c0 = arith.constant 0 : index
    %c0_0 = arith.constant 0 : index
    %0 = vector.load %arg0[%c0, %c0_0] : memref<8x80xbf16, #tpu.memory_space<vmem>>, vector<8x80xbf16>
    %c0_1 = arith.constant 0 : index
    %c0_2 = arith.constant 0 : index
    %1 = vector.load %arg1[%c0_1, %c0_2] : memref<80x512xbf16, #tpu.memory_space<vmem>>, vector<80x512xbf16>
    %cst = arith.constant dense<0.000000e+00> : vector<8x512xf32>
    %2 = tpu.matmul %0, %1, %cst {dimension_numbers = #tpu.dot_dimension_numbers<[1], [0], [0], [1], [0, 0, 1, 1], [], []>} : vector<8x80xbf16>, vector<80x512xbf16>, vector<8x512xf32> -> vector<8x512xf32>
    %c0_3 = arith.constant 0 : index
    %c0_4 = arith.constant 0 : index
    %3 = vector.load %arg2[%c0_3, %c0_4] : memref<8x1xf32, #tpu.memory_space<vmem>>, vector<8x1xf32>
    %4 = vector.broadcast %3 : vector<8x1xf32> to vector<8x512xf32>
    %5 = arith.addf %2, %4 : vector<8x512xf32>
    %cst_5 = arith.constant 0.000000e+00 : f32
    %6 = vector.broadcast %cst_5 : f32 to vector<8x512xf32>
    %7 = arith.maximumf %5, %6 : vector<8x512xf32>
    %8 = arith.truncf %7 : vector<8x512xf32> to vector<8x512xbf16>
    %c0_6 = arith.constant 0 : index
    %c0_7 = arith.constant 0 : index
    %9 = vector.load %arg3[%c0_6, %c0_7] : memref<8x512xbf16, #tpu.memory_space<vmem>>, vector<8x512xbf16>
    tpu.vector_store %arg3[%c0_6, %c0_7], %8 {strides = array<i32>} : memref<8x512xbf16, #tpu.memory_space<vmem>>, vector<8x512xbf16>,
    return
  }
}

module attributes {stable_mosaic.version = 11 : i64} {
  func.func @_conv_matmul_kernel(%arg0: memref<8x144xbf16, #tpu.memory_space<vmem>>, %arg1: memref<144x512xbf16, #tpu.memory_space<vmem>>, %arg2: memref<8x1xf32, #tpu.memory_space<vmem>>, %arg3: memref<8x512xbf16, #tpu.memory_space<vmem>>) attributes {dimension_semantics = [], scalar_prefetch = 0 : i64, scratch_operands = 0 : i64, tpu.core_type = #tpu.core_type<tc>} {
    %c0 = arith.constant 0 : index
    %c0_0 = arith.constant 0 : index
    %0 = vector.load %arg0[%c0, %c0_0] : memref<8x144xbf16, #tpu.memory_space<vmem>>, vector<8x144xbf16>
    %c0_1 = arith.constant 0 : index
    %c0_2 = arith.constant 0 : index
    %1 = vector.load %arg1[%c0_1, %c0_2] : memref<144x512xbf16, #tpu.memory_space<vmem>>, vector<144x512xbf16>
    %cst = arith.constant dense<0.000000e+00> : vector<8x512xf32>
    %2 = tpu.matmul %0, %1, %cst {dimension_numbers = #tpu.dot_dimension_numbers<[1], [0], [0], [1], [0, 0, 1, 1], [], []>} : vector<8x144xbf16>, vector<144x512xbf16>, vector<8x512xf32> -> vector<8x512xf32>
    %c0_3 = arith.constant 0 : index
    %c0_4 = arith.constant 0 : index
    %3 = vector.load %arg2[%c0_3, %c0_4] : memref<8x1xf32, #tpu.memory_space<vmem>>, vector<8x1xf32>
    %4 = vector.broadcast %3 : vector<8x1xf32> to vector<8x512xf32>
    %5 = arith.addf %2, %4 : vector<8x512xf32>
    %cst_5 = arith.constant 0.000000e+00 : f32
    %6 = vector.broadcast %cst_5 : f32 to vector<8x512xf32>
    %7 = arith.maximumf %5, %6 : vector<8x512xf32>
    %8 = arith.truncf %7 : vector<8x512xf32> to vector<8x512xbf16>
    %c0_6 = arith.constant 0 : index
    %c0_7 = arith.constant 0 : index
    %9 = vector.load %arg3[%c0_6, %c0_7] : memref<8x512xbf16, #tpu.memory_space<vmem>>, vector<8x512xbf16>
    tpu.vector_store %arg3[%c0_6, %c0_7], %8 {strides = array<i32>} : memref<8x512xbf16, #tpu.memory_space<vmem>>, vector<8x512xbf16>,
    return
  }
}

module attributes {stable_mosaic.version = 11 : i64} {
  func.func @_conv_matmul_kernel(%arg0: memref<8x224xbf16, #tpu.memory_space<vmem>>, %arg1: memref<224x512xbf16, #tpu.memory_space<vmem>>, %arg2: memref<8x1xf32, #tpu.memory_space<vmem>>, %arg3: memref<8x512xbf16, #tpu.memory_space<vmem>>) attributes {dimension_semantics = [], scalar_prefetch = 0 : i64, scratch_operands = 0 : i64, tpu.core_type = #tpu.core_type<tc>} {
    %c0 = arith.constant 0 : index
    %c0_0 = arith.constant 0 : index
    %0 = vector.load %arg0[%c0, %c0_0] : memref<8x224xbf16, #tpu.memory_space<vmem>>, vector<8x224xbf16>
    %c0_1 = arith.constant 0 : index
    %c0_2 = arith.constant 0 : index
    %1 = vector.load %arg1[%c0_1, %c0_2] : memref<224x512xbf16, #tpu.memory_space<vmem>>, vector<224x512xbf16>
    %cst = arith.constant dense<0.000000e+00> : vector<8x512xf32>
    %2 = tpu.matmul %0, %1, %cst {dimension_numbers = #tpu.dot_dimension_numbers<[1], [0], [0], [1], [0, 0, 1, 1], [], []>} : vector<8x224xbf16>, vector<224x512xbf16>, vector<8x512xf32> -> vector<8x512xf32>
    %c0_3 = arith.constant 0 : index
    %c0_4 = arith.constant 0 : index
    %3 = vector.load %arg2[%c0_3, %c0_4] : memref<8x1xf32, #tpu.memory_space<vmem>>, vector<8x1xf32>
    %4 = vector.broadcast %3 : vector<8x1xf32> to vector<8x512xf32>
    %5 = arith.addf %2, %4 : vector<8x512xf32>
    %cst_5 = arith.constant 0.000000e+00 : f32
    %6 = vector.broadcast %cst_5 : f32 to vector<8x512xf32>
    %7 = arith.maximumf %5, %6 : vector<8x512xf32>
    %8 = arith.truncf %7 : vector<8x512xf32> to vector<8x512xbf16>
    %c0_6 = arith.constant 0 : index
    %c0_7 = arith.constant 0 : index
    %9 = vector.load %arg3[%c0_6, %c0_7] : memref<8x512xbf16, #tpu.memory_space<vmem>>, vector<8x512xbf16>
    tpu.vector_store %arg3[%c0_6, %c0_7], %8 {strides = array<i32>} : memref<8x512xbf16, #tpu.memory_space<vmem>>, vector<8x512xbf16>,
    return
  }
}

module attributes {stable_mosaic.version = 11 : i64} {
  func.func @_conv_matmul_kernel(%arg0: memref<8x32xbf16, #tpu.memory_space<vmem>>, %arg1: memref<32x512xbf16, #tpu.memory_space<vmem>>, %arg2: memref<8x1xf32, #tpu.memory_space<vmem>>, %arg3: memref<8x512xbf16, #tpu.memory_space<vmem>>) attributes {dimension_semantics = [], scalar_prefetch = 0 : i64, scratch_operands = 0 : i64, tpu.core_type = #tpu.core_type<tc>} {
    %c0 = arith.constant 0 : index
    %c0_0 = arith.constant 0 : index
    %0 = vector.load %arg0[%c0, %c0_0] : memref<8x32xbf16, #tpu.memory_space<vmem>>, vector<8x32xbf16>
    %c0_1 = arith.constant 0 : index
    %c0_2 = arith.constant 0 : index
    %1 = vector.load %arg1[%c0_1, %c0_2] : memref<32x512xbf16, #tpu.memory_space<vmem>>, vector<32x512xbf16>
    %cst = arith.constant dense<0.000000e+00> : vector<8x512xf32>
    %2 = tpu.matmul %0, %1, %cst {dimension_numbers = #tpu.dot_dimension_numbers<[1], [0], [0], [1], [0, 0, 1, 1], [], []>} : vector<8x32xbf16>, vector<32x512xbf16>, vector<8x512xf32> -> vector<8x512xf32>
    %c0_3 = arith.constant 0 : index
    %c0_4 = arith.constant 0 : index
    %3 = vector.load %arg2[%c0_3, %c0_4] : memref<8x1xf32, #tpu.memory_space<vmem>>, vector<8x1xf32>
    %4 = vector.broadcast %3 : vector<8x1xf32> to vector<8x512xf32>
    %5 = arith.addf %2, %4 : vector<8x512xf32>
    %6 = arith.truncf %5 : vector<8x512xf32> to vector<8x512xbf16>
    %c0_5 = arith.constant 0 : index
    %c0_6 = arith.constant 0 : index
    %7 = vector.load %arg3[%c0_5, %c0_6] : memref<8x512xbf16, #tpu.memory_space<vmem>>, vector<8x512xbf16>
    tpu.vector_store %arg3[%c0_5, %c0_6], %6 {strides = array<i32>} : memref<8x512xbf16, #tpu.memory_space<vmem>>, vector<8x512xbf16>,
    return
  }
}

module attributes {stable_mosaic.version = 11 : i64} {
  func.func @_conv_matmul_kernel(%arg0: memref<8x288xbf16, #tpu.memory_space<vmem>>, %arg1: memref<288x512xbf16, #tpu.memory_space<vmem>>, %arg2: memref<8x1xf32, #tpu.memory_space<vmem>>, %arg3: memref<8x512xbf16, #tpu.memory_space<vmem>>) attributes {dimension_semantics = [], scalar_prefetch = 0 : i64, scratch_operands = 0 : i64, tpu.core_type = #tpu.core_type<tc>} {
    %c0 = arith.constant 0 : index
    %c0_0 = arith.constant 0 : index
    %0 = vector.load %arg0[%c0, %c0_0] : memref<8x288xbf16, #tpu.memory_space<vmem>>, vector<8x288xbf16>
    %c0_1 = arith.constant 0 : index
    %c0_2 = arith.constant 0 : index
    %1 = vector.load %arg1[%c0_1, %c0_2] : memref<288x512xbf16, #tpu.memory_space<vmem>>, vector<288x512xbf16>
    %cst = arith.constant dense<0.000000e+00> : vector<8x512xf32>
    %2 = tpu.matmul %0, %1, %cst {dimension_numbers = #tpu.dot_dimension_numbers<[1], [0], [0], [1], [0, 0, 1, 1], [], []>} : vector<8x288xbf16>, vector<288x512xbf16>, vector<8x512xf32> -> vector<8x512xf32>
    %c0_3 = arith.constant 0 : index
    %c0_4 = arith.constant 0 : index
    %3 = vector.load %arg2[%c0_3, %c0_4] : memref<8x1xf32, #tpu.memory_space<vmem>>, vector<8x1xf32>
    %4 = vector.broadcast %3 : vector<8x1xf32> to vector<8x512xf32>
    %5 = arith.addf %2, %4 : vector<8x512xf32>
    %cst_5 = arith.constant 0.000000e+00 : f32
    %6 = vector.broadcast %cst_5 : f32 to vector<8x512xf32>
    %7 = arith.maximumf %5, %6 : vector<8x512xf32>
    %8 = arith.truncf %7 : vector<8x512xf32> to vector<8x512xbf16>
    %c0_6 = arith.constant 0 : index
    %c0_7 = arith.constant 0 : index
    %9 = vector.load %arg3[%c0_6, %c0_7] : memref<8x512xbf16, #tpu.memory_space<vmem>>, vector<8x512xbf16>
    tpu.vector_store %arg3[%c0_6, %c0_7], %8 {strides = array<i32>} : memref<8x512xbf16, #tpu.memory_space<vmem>>, vector<8x512xbf16>,
    return
  }
}

module attributes {stable_mosaic.version = 11 : i64} {
  func.func @_conv_matmul_kernel(%arg0: memref<8x368xbf16, #tpu.memory_space<vmem>>, %arg1: memref<368x512xbf16, #tpu.memory_space<vmem>>, %arg2: memref<8x1xf32, #tpu.memory_space<vmem>>, %arg3: memref<8x512xbf16, #tpu.memory_space<vmem>>) attributes {dimension_semantics = [], scalar_prefetch = 0 : i64, scratch_operands = 0 : i64, tpu.core_type = #tpu.core_type<tc>} {
    %c0 = arith.constant 0 : index
    %c0_0 = arith.constant 0 : index
    %0 = vector.load %arg0[%c0, %c0_0] : memref<8x368xbf16, #tpu.memory_space<vmem>>, vector<8x368xbf16>
    %c0_1 = arith.constant 0 : index
    %c0_2 = arith.constant 0 : index
    %1 = vector.load %arg1[%c0_1, %c0_2] : memref<368x512xbf16, #tpu.memory_space<vmem>>, vector<368x512xbf16>
    %cst = arith.constant dense<0.000000e+00> : vector<8x512xf32>
    %2 = tpu.matmul %0, %1, %cst {dimension_numbers = #tpu.dot_dimension_numbers<[1], [0], [0], [1], [0, 0, 1, 1], [], []>} : vector<8x368xbf16>, vector<368x512xbf16>, vector<8x512xf32> -> vector<8x512xf32>
    %c0_3 = arith.constant 0 : index
    %c0_4 = arith.constant 0 : index
    %3 = vector.load %arg2[%c0_3, %c0_4] : memref<8x1xf32, #tpu.memory_space<vmem>>, vector<8x1xf32>
    %4 = vector.broadcast %3 : vector<8x1xf32> to vector<8x512xf32>
    %5 = arith.addf %2, %4 : vector<8x512xf32>
    %cst_5 = arith.constant 0.000000e+00 : f32
    %6 = vector.broadcast %cst_5 : f32 to vector<8x512xf32>
    %7 = arith.maximumf %5, %6 : vector<8x512xf32>
    %8 = arith.truncf %7 : vector<8x512xf32> to vector<8x512xbf16>
    %c0_6 = arith.constant 0 : index
    %c0_7 = arith.constant 0 : index
    %9 = vector.load %arg3[%c0_6, %c0_7] : memref<8x512xbf16, #tpu.memory_space<vmem>>, vector<8x512xbf16>
    tpu.vector_store %arg3[%c0_6, %c0_7], %8 {strides = array<i32>} : memref<8x512xbf16, #tpu.memory_space<vmem>>, vector<8x512xbf16>,
    return
  }
}

module attributes {stable_mosaic.version = 11 : i64} {
  func.func @_conv_matmul_kernel(%arg0: memref<8x48xbf16, #tpu.memory_space<vmem>>, %arg1: memref<48x512xbf16, #tpu.memory_space<vmem>>, %arg2: memref<8x1xf32, #tpu.memory_space<vmem>>, %arg3: memref<8x512xbf16, #tpu.memory_space<vmem>>) attributes {dimension_semantics = [], scalar_prefetch = 0 : i64, scratch_operands = 0 : i64, tpu.core_type = #tpu.core_type<tc>} {
    %c0 = arith.constant 0 : index
    %c0_0 = arith.constant 0 : index
    %0 = vector.load %arg0[%c0, %c0_0] : memref<8x48xbf16, #tpu.memory_space<vmem>>, vector<8x48xbf16>
    %c0_1 = arith.constant 0 : index
    %c0_2 = arith.constant 0 : index
    %1 = vector.load %arg1[%c0_1, %c0_2] : memref<48x512xbf16, #tpu.memory_space<vmem>>, vector<48x512xbf16>
    %cst = arith.constant dense<0.000000e+00> : vector<8x512xf32>
    %2 = tpu.matmul %0, %1, %cst {dimension_numbers = #tpu.dot_dimension_numbers<[1], [0], [0], [1], [0, 0, 1, 1], [], []>} : vector<8x48xbf16>, vector<48x512xbf16>, vector<8x512xf32> -> vector<8x512xf32>
    %c0_3 = arith.constant 0 : index
    %c0_4 = arith.constant 0 : index
    %3 = vector.load %arg2[%c0_3, %c0_4] : memref<8x1xf32, #tpu.memory_space<vmem>>, vector<8x1xf32>
    %4 = vector.broadcast %3 : vector<8x1xf32> to vector<8x512xf32>
    %5 = arith.addf %2, %4 : vector<8x512xf32>
    %6 = arith.truncf %5 : vector<8x512xf32> to vector<8x512xbf16>
    %c0_5 = arith.constant 0 : index
    %c0_6 = arith.constant 0 : index
    %7 = vector.load %arg3[%c0_5, %c0_6] : memref<8x512xbf16, #tpu.memory_space<vmem>>, vector<8x512xbf16>
    tpu.vector_store %arg3[%c0_5, %c0_6], %6 {strides = array<i32>} : memref<8x512xbf16, #tpu.memory_space<vmem>>, vector<8x512xbf16>,
    return
  }
}

module attributes {stable_mosaic.version = 11 : i64} {
  func.func @_conv_matmul_kernel(%arg0: memref<8x80xbf16, #tpu.memory_space<vmem>>, %arg1: memref<80x128xbf16, #tpu.memory_space<vmem>>, %arg2: memref<8x1xf32, #tpu.memory_space<vmem>>, %arg3: memref<8x128xbf16, #tpu.memory_space<vmem>>) attributes {dimension_semantics = [], scalar_prefetch = 0 : i64, scratch_operands = 0 : i64, tpu.core_type = #tpu.core_type<tc>} {
    %c0 = arith.constant 0 : index
    %c0_0 = arith.constant 0 : index
    %0 = vector.load %arg0[%c0, %c0_0] : memref<8x80xbf16, #tpu.memory_space<vmem>>, vector<8x80xbf16>
    %c0_1 = arith.constant 0 : index
    %c0_2 = arith.constant 0 : index
    %1 = vector.load %arg1[%c0_1, %c0_2] : memref<80x128xbf16, #tpu.memory_space<vmem>>, vector<80x128xbf16>
    %cst = arith.constant dense<0.000000e+00> : vector<8x128xf32>
    %2 = tpu.matmul %0, %1, %cst {dimension_numbers = #tpu.dot_dimension_numbers<[1], [0], [0], [1], [0, 0, 1, 1], [], []>} : vector<8x80xbf16>, vector<80x128xbf16>, vector<8x128xf32> -> vector<8x128xf32>
    %c0_3 = arith.constant 0 : index
    %c0_4 = arith.constant 0 : index
    %3 = vector.load %arg2[%c0_3, %c0_4] : memref<8x1xf32, #tpu.memory_space<vmem>>, vector<8x1xf32>
    %4 = vector.broadcast %3 : vector<8x1xf32> to vector<8x128xf32>
    %5 = arith.addf %2, %4 : vector<8x128xf32>
    %cst_5 = arith.constant 0.000000e+00 : f32
    %6 = vector.broadcast %cst_5 : f32 to vector<8x128xf32>
    %7 = arith.maximumf %5, %6 : vector<8x128xf32>
    %8 = arith.truncf %7 : vector<8x128xf32> to vector<8x128xbf16>
    %c0_6 = arith.constant 0 : index
    %c0_7 = arith.constant 0 : index
    %9 = vector.load %arg3[%c0_6, %c0_7] : memref<8x128xbf16, #tpu.memory_space<vmem>>, vector<8x128xbf16>
    tpu.vector_store %arg3[%c0_6, %c0_7], %8 {strides = array<i32>} : memref<8x128xbf16, #tpu.memory_space<vmem>>, vector<8x128xbf16>,
    return
  }
}

module attributes {stable_mosaic.version = 11 : i64} {
  func.func @_conv_matmul_kernel(%arg0: memref<8x144xbf16, #tpu.memory_space<vmem>>, %arg1: memref<144x128xbf16, #tpu.memory_space<vmem>>, %arg2: memref<8x1xf32, #tpu.memory_space<vmem>>, %arg3: memref<8x128xbf16, #tpu.memory_space<vmem>>) attributes {dimension_semantics = [], scalar_prefetch = 0 : i64, scratch_operands = 0 : i64, tpu.core_type = #tpu.core_type<tc>} {
    %c0 = arith.constant 0 : index
    %c0_0 = arith.constant 0 : index
    %0 = vector.load %arg0[%c0, %c0_0] : memref<8x144xbf16, #tpu.memory_space<vmem>>, vector<8x144xbf16>
    %c0_1 = arith.constant 0 : index
    %c0_2 = arith.constant 0 : index
    %1 = vector.load %arg1[%c0_1, %c0_2] : memref<144x128xbf16, #tpu.memory_space<vmem>>, vector<144x128xbf16>
    %cst = arith.constant dense<0.000000e+00> : vector<8x128xf32>
    %2 = tpu.matmul %0, %1, %cst {dimension_numbers = #tpu.dot_dimension_numbers<[1], [0], [0], [1], [0, 0, 1, 1], [], []>} : vector<8x144xbf16>, vector<144x128xbf16>, vector<8x128xf32> -> vector<8x128xf32>
    %c0_3 = arith.constant 0 : index
    %c0_4 = arith.constant 0 : index
    %3 = vector.load %arg2[%c0_3, %c0_4] : memref<8x1xf32, #tpu.memory_space<vmem>>, vector<8x1xf32>
    %4 = vector.broadcast %3 : vector<8x1xf32> to vector<8x128xf32>
    %5 = arith.addf %2, %4 : vector<8x128xf32>
    %cst_5 = arith.constant 0.000000e+00 : f32
    %6 = vector.broadcast %cst_5 : f32 to vector<8x128xf32>
    %7 = arith.maximumf %5, %6 : vector<8x128xf32>
    %8 = arith.truncf %7 : vector<8x128xf32> to vector<8x128xbf16>
    %c0_6 = arith.constant 0 : index
    %c0_7 = arith.constant 0 : index
    %9 = vector.load %arg3[%c0_6, %c0_7] : memref<8x128xbf16, #tpu.memory_space<vmem>>, vector<8x128xbf16>
    tpu.vector_store %arg3[%c0_6, %c0_7], %8 {strides = array<i32>} : memref<8x128xbf16, #tpu.memory_space<vmem>>, vector<8x128xbf16>,
    return
  }
}

module attributes {stable_mosaic.version = 11 : i64} {
  func.func @_conv_matmul_kernel(%arg0: memref<8x224xbf16, #tpu.memory_space<vmem>>, %arg1: memref<224x128xbf16, #tpu.memory_space<vmem>>, %arg2: memref<8x1xf32, #tpu.memory_space<vmem>>, %arg3: memref<8x128xbf16, #tpu.memory_space<vmem>>) attributes {dimension_semantics = [], scalar_prefetch = 0 : i64, scratch_operands = 0 : i64, tpu.core_type = #tpu.core_type<tc>} {
    %c0 = arith.constant 0 : index
    %c0_0 = arith.constant 0 : index
    %0 = vector.load %arg0[%c0, %c0_0] : memref<8x224xbf16, #tpu.memory_space<vmem>>, vector<8x224xbf16>
    %c0_1 = arith.constant 0 : index
    %c0_2 = arith.constant 0 : index
    %1 = vector.load %arg1[%c0_1, %c0_2] : memref<224x128xbf16, #tpu.memory_space<vmem>>, vector<224x128xbf16>
    %cst = arith.constant dense<0.000000e+00> : vector<8x128xf32>
    %2 = tpu.matmul %0, %1, %cst {dimension_numbers = #tpu.dot_dimension_numbers<[1], [0], [0], [1], [0, 0, 1, 1], [], []>} : vector<8x224xbf16>, vector<224x128xbf16>, vector<8x128xf32> -> vector<8x128xf32>
    %c0_3 = arith.constant 0 : index
    %c0_4 = arith.constant 0 : index
    %3 = vector.load %arg2[%c0_3, %c0_4] : memref<8x1xf32, #tpu.memory_space<vmem>>, vector<8x1xf32>
    %4 = vector.broadcast %3 : vector<8x1xf32> to vector<8x128xf32>
    %5 = arith.addf %2, %4 : vector<8x128xf32>
    %cst_5 = arith.constant 0.000000e+00 : f32
    %6 = vector.broadcast %cst_5 : f32 to vector<8x128xf32>
    %7 = arith.maximumf %5, %6 : vector<8x128xf32>
    %8 = arith.truncf %7 : vector<8x128xf32> to vector<8x128xbf16>
    %c0_6 = arith.constant 0 : index
    %c0_7 = arith.constant 0 : index
    %9 = vector.load %arg3[%c0_6, %c0_7] : memref<8x128xbf16, #tpu.memory_space<vmem>>, vector<8x128xbf16>
    tpu.vector_store %arg3[%c0_6, %c0_7], %8 {strides = array<i32>} : memref<8x128xbf16, #tpu.memory_space<vmem>>, vector<8x128xbf16>,
    return
  }
}

module attributes {stable_mosaic.version = 11 : i64} {
  func.func @_conv_matmul_kernel(%arg0: memref<8x288xbf16, #tpu.memory_space<vmem>>, %arg1: memref<288x128xbf16, #tpu.memory_space<vmem>>, %arg2: memref<8x1xf32, #tpu.memory_space<vmem>>, %arg3: memref<8x128xbf16, #tpu.memory_space<vmem>>) attributes {dimension_semantics = [], scalar_prefetch = 0 : i64, scratch_operands = 0 : i64, tpu.core_type = #tpu.core_type<tc>} {
    %c0 = arith.constant 0 : index
    %c0_0 = arith.constant 0 : index
    %0 = vector.load %arg0[%c0, %c0_0] : memref<8x288xbf16, #tpu.memory_space<vmem>>, vector<8x288xbf16>
    %c0_1 = arith.constant 0 : index
    %c0_2 = arith.constant 0 : index
    %1 = vector.load %arg1[%c0_1, %c0_2] : memref<288x128xbf16, #tpu.memory_space<vmem>>, vector<288x128xbf16>
    %cst = arith.constant dense<0.000000e+00> : vector<8x128xf32>
    %2 = tpu.matmul %0, %1, %cst {dimension_numbers = #tpu.dot_dimension_numbers<[1], [0], [0], [1], [0, 0, 1, 1], [], []>} : vector<8x288xbf16>, vector<288x128xbf16>, vector<8x128xf32> -> vector<8x128xf32>
    %c0_3 = arith.constant 0 : index
    %c0_4 = arith.constant 0 : index
    %3 = vector.load %arg2[%c0_3, %c0_4] : memref<8x1xf32, #tpu.memory_space<vmem>>, vector<8x1xf32>
    %4 = vector.broadcast %3 : vector<8x1xf32> to vector<8x128xf32>
    %5 = arith.addf %2, %4 : vector<8x128xf32>
    %cst_5 = arith.constant 0.000000e+00 : f32
    %6 = vector.broadcast %cst_5 : f32 to vector<8x128xf32>
    %7 = arith.maximumf %5, %6 : vector<8x128xf32>
    %8 = arith.truncf %7 : vector<8x128xf32> to vector<8x128xbf16>
    %c0_6 = arith.constant 0 : index
    %c0_7 = arith.constant 0 : index
    %9 = vector.load %arg3[%c0_6, %c0_7] : memref<8x128xbf16, #tpu.memory_space<vmem>>, vector<8x128xbf16>
    tpu.vector_store %arg3[%c0_6, %c0_7], %8 {strides = array<i32>} : memref<8x128xbf16, #tpu.memory_space<vmem>>, vector<8x128xbf16>,
    return
  }
}

module attributes {stable_mosaic.version = 11 : i64} {
  func.func @_conv_matmul_kernel(%arg0: memref<8x368xbf16, #tpu.memory_space<vmem>>, %arg1: memref<368x128xbf16, #tpu.memory_space<vmem>>, %arg2: memref<8x1xf32, #tpu.memory_space<vmem>>, %arg3: memref<8x128xbf16, #tpu.memory_space<vmem>>) attributes {dimension_semantics = [], scalar_prefetch = 0 : i64, scratch_operands = 0 : i64, tpu.core_type = #tpu.core_type<tc>} {
    %c0 = arith.constant 0 : index
    %c0_0 = arith.constant 0 : index
    %0 = vector.load %arg0[%c0, %c0_0] : memref<8x368xbf16, #tpu.memory_space<vmem>>, vector<8x368xbf16>
    %c0_1 = arith.constant 0 : index
    %c0_2 = arith.constant 0 : index
    %1 = vector.load %arg1[%c0_1, %c0_2] : memref<368x128xbf16, #tpu.memory_space<vmem>>, vector<368x128xbf16>
    %cst = arith.constant dense<0.000000e+00> : vector<8x128xf32>
    %2 = tpu.matmul %0, %1, %cst {dimension_numbers = #tpu.dot_dimension_numbers<[1], [0], [0], [1], [0, 0, 1, 1], [], []>} : vector<8x368xbf16>, vector<368x128xbf16>, vector<8x128xf32> -> vector<8x128xf32>
    %c0_3 = arith.constant 0 : index
    %c0_4 = arith.constant 0 : index
    %3 = vector.load %arg2[%c0_3, %c0_4] : memref<8x1xf32, #tpu.memory_space<vmem>>, vector<8x1xf32>
    %4 = vector.broadcast %3 : vector<8x1xf32> to vector<8x128xf32>
    %5 = arith.addf %2, %4 : vector<8x128xf32>
    %cst_5 = arith.constant 0.000000e+00 : f32
    %6 = vector.broadcast %cst_5 : f32 to vector<8x128xf32>
    %7 = arith.maximumf %5, %6 : vector<8x128xf32>
    %8 = arith.truncf %7 : vector<8x128xf32> to vector<8x128xbf16>
    %c0_6 = arith.constant 0 : index
    %c0_7 = arith.constant 0 : index
    %9 = vector.load %arg3[%c0_6, %c0_7] : memref<8x128xbf16, #tpu.memory_space<vmem>>, vector<8x128xbf16>
    tpu.vector_store %arg3[%c0_6, %c0_7], %8 {strides = array<i32>} : memref<8x128xbf16, #tpu.memory_space<vmem>>, vector<8x128xbf16>,
    return
  }
}

module attributes {stable_mosaic.version = 11 : i64} {
  func.func @_conv_matmul_kernel(%arg0: memref<8x48xbf16, #tpu.memory_space<vmem>>, %arg1: memref<48x128xbf16, #tpu.memory_space<vmem>>, %arg2: memref<8x1xf32, #tpu.memory_space<vmem>>, %arg3: memref<8x128xbf16, #tpu.memory_space<vmem>>) attributes {dimension_semantics = [], scalar_prefetch = 0 : i64, scratch_operands = 0 : i64, tpu.core_type = #tpu.core_type<tc>} {
    %c0 = arith.constant 0 : index
    %c0_0 = arith.constant 0 : index
    %0 = vector.load %arg0[%c0, %c0_0] : memref<8x48xbf16, #tpu.memory_space<vmem>>, vector<8x48xbf16>
    %c0_1 = arith.constant 0 : index
    %c0_2 = arith.constant 0 : index
    %1 = vector.load %arg1[%c0_1, %c0_2] : memref<48x128xbf16, #tpu.memory_space<vmem>>, vector<48x128xbf16>
    %cst = arith.constant dense<0.000000e+00> : vector<8x128xf32>
    %2 = tpu.matmul %0, %1, %cst {dimension_numbers = #tpu.dot_dimension_numbers<[1], [0], [0], [1], [0, 0, 1, 1], [], []>} : vector<8x48xbf16>, vector<48x128xbf16>, vector<8x128xf32> -> vector<8x128xf32>
    %c0_3 = arith.constant 0 : index
    %c0_4 = arith.constant 0 : index
    %3 = vector.load %arg2[%c0_3, %c0_4] : memref<8x1xf32, #tpu.memory_space<vmem>>, vector<8x1xf32>
    %4 = vector.broadcast %3 : vector<8x1xf32> to vector<8x128xf32>
    %5 = arith.addf %2, %4 : vector<8x128xf32>
    %6 = arith.truncf %5 : vector<8x128xf32> to vector<8x128xbf16>
    %c0_5 = arith.constant 0 : index
    %c0_6 = arith.constant 0 : index
    %7 = vector.load %arg3[%c0_5, %c0_6] : memref<8x128xbf16, #tpu.memory_space<vmem>>, vector<8x128xbf16>
    tpu.vector_store %arg3[%c0_5, %c0_6], %6 {strides = array<i32>} : memref<8x128xbf16, #tpu.memory_space<vmem>>, vector<8x128xbf16>,
    return
  }
}

module attributes {stable_mosaic.version = 11 : i64} {
  func.func @_conv_matmul_kernel(%arg0: memref<16x80xbf16, #tpu.memory_space<vmem>>, %arg1: memref<80x128xbf16, #tpu.memory_space<vmem>>, %arg2: memref<16x1xf32, #tpu.memory_space<vmem>>, %arg3: memref<16x128xbf16, #tpu.memory_space<vmem>>) attributes {dimension_semantics = [], scalar_prefetch = 0 : i64, scratch_operands = 0 : i64, tpu.core_type = #tpu.core_type<tc>} {
    %c0 = arith.constant 0 : index
    %c0_0 = arith.constant 0 : index
    %0 = vector.load %arg0[%c0, %c0_0] : memref<16x80xbf16, #tpu.memory_space<vmem>>, vector<16x80xbf16>
    %c0_1 = arith.constant 0 : index
    %c0_2 = arith.constant 0 : index
    %1 = vector.load %arg1[%c0_1, %c0_2] : memref<80x128xbf16, #tpu.memory_space<vmem>>, vector<80x128xbf16>
    %cst = arith.constant dense<0.000000e+00> : vector<16x128xf32>
    %2 = tpu.matmul %0, %1, %cst {dimension_numbers = #tpu.dot_dimension_numbers<[1], [0], [0], [1], [0, 0, 1, 1], [], []>} : vector<16x80xbf16>, vector<80x128xbf16>, vector<16x128xf32> -> vector<16x128xf32>
    %c0_3 = arith.constant 0 : index
    %c0_4 = arith.constant 0 : index
    %3 = vector.load %arg2[%c0_3, %c0_4] : memref<16x1xf32, #tpu.memory_space<vmem>>, vector<16x1xf32>
    %4 = vector.broadcast %3 : vector<16x1xf32> to vector<16x128xf32>
    %5 = arith.addf %2, %4 : vector<16x128xf32>
    %cst_5 = arith.constant 0.000000e+00 : f32
    %6 = vector.broadcast %cst_5 : f32 to vector<16x128xf32>
    %7 = arith.maximumf %5, %6 : vector<16x128xf32>
    %8 = arith.truncf %7 : vector<16x128xf32> to vector<16x128xbf16>
    %c0_6 = arith.constant 0 : index
    %c0_7 = arith.constant 0 : index
    %9 = vector.load %arg3[%c0_6, %c0_7] : memref<16x128xbf16, #tpu.memory_space<vmem>>, vector<16x128xbf16>
    tpu.vector_store %arg3[%c0_6, %c0_7], %8 {strides = array<i32>} : memref<16x128xbf16, #tpu.memory_space<vmem>>, vector<16x128xbf16>,
    return
  }
}

module attributes {stable_mosaic.version = 11 : i64} {
  func.func @_conv_matmul_kernel(%arg0: memref<16x48xbf16, #tpu.memory_space<vmem>>, %arg1: memref<48x128xbf16, #tpu.memory_space<vmem>>, %arg2: memref<16x1xf32, #tpu.memory_space<vmem>>, %arg3: memref<16x128xbf16, #tpu.memory_space<vmem>>) attributes {dimension_semantics = [], scalar_prefetch = 0 : i64, scratch_operands = 0 : i64, tpu.core_type = #tpu.core_type<tc>} {
    %c0 = arith.constant 0 : index
    %c0_0 = arith.constant 0 : index
    %0 = vector.load %arg0[%c0, %c0_0] : memref<16x48xbf16, #tpu.memory_space<vmem>>, vector<16x48xbf16>
    %c0_1 = arith.constant 0 : index
    %c0_2 = arith.constant 0 : index
    %1 = vector.load %arg1[%c0_1, %c0_2] : memref<48x128xbf16, #tpu.memory_space<vmem>>, vector<48x128xbf16>
    %cst = arith.constant dense<0.000000e+00> : vector<16x128xf32>
    %2 = tpu.matmul %0, %1, %cst {dimension_numbers = #tpu.dot_dimension_numbers<[1], [0], [0], [1], [0, 0, 1, 1], [], []>} : vector<16x48xbf16>, vector<48x128xbf16>, vector<16x128xf32> -> vector<16x128xf32>
    %c0_3 = arith.constant 0 : index
    %c0_4 = arith.constant 0 : index
    %3 = vector.load %arg2[%c0_3, %c0_4] : memref<16x1xf32, #tpu.memory_space<vmem>>, vector<16x1xf32>
    %4 = vector.broadcast %3 : vector<16x1xf32> to vector<16x128xf32>
    %5 = arith.addf %2, %4 : vector<16x128xf32>
    %6 = arith.truncf %5 : vector<16x128xf32> to vector<16x128xbf16>
    %c0_5 = arith.constant 0 : index
    %c0_6 = arith.constant 0 : index
    %7 = vector.load %arg3[%c0_5, %c0_6] : memref<16x128xbf16, #tpu.memory_space<vmem>>, vector<16x128xbf16>
    tpu.vector_store %arg3[%c0_5, %c0_6], %6 {strides = array<i32>} : memref<16x128xbf16, #tpu.memory_space<vmem>>, vector<16x128xbf16>,
    return
  }
}

module attributes {stable_mosaic.version = 11 : i64} {
  func.func @_conv_matmul_kernel(%arg0: memref<8x432xbf16, #tpu.memory_space<vmem>>, %arg1: memref<432x128xbf16, #tpu.memory_space<vmem>>, %arg2: memref<8x1xf32, #tpu.memory_space<vmem>>, %arg3: memref<8x128xbf16, #tpu.memory_space<vmem>>) attributes {dimension_semantics = [], scalar_prefetch = 0 : i64, scratch_operands = 0 : i64, tpu.core_type = #tpu.core_type<tc>} {
    %c0 = arith.constant 0 : index
    %c0_0 = arith.constant 0 : index
    %0 = vector.load %arg0[%c0, %c0_0] : memref<8x432xbf16, #tpu.memory_space<vmem>>, vector<8x432xbf16>
    %c0_1 = arith.constant 0 : index
    %c0_2 = arith.constant 0 : index
    %1 = vector.load %arg1[%c0_1, %c0_2] : memref<432x128xbf16, #tpu.memory_space<vmem>>, vector<432x128xbf16>
    %cst = arith.constant dense<0.000000e+00> : vector<8x128xf32>
    %2 = tpu.matmul %0, %1, %cst {dimension_numbers = #tpu.dot_dimension_numbers<[1], [0], [0], [1], [0, 0, 1, 1], [], []>} : vector<8x432xbf16>, vector<432x128xbf16>, vector<8x128xf32> -> vector<8x128xf32>
    %c0_3 = arith.constant 0 : index
    %c0_4 = arith.constant 0 : index
    %3 = vector.load %arg2[%c0_3, %c0_4] : memref<8x1xf32, #tpu.memory_space<vmem>>, vector<8x1xf32>
    %4 = vector.broadcast %3 : vector<8x1xf32> to vector<8x128xf32>
    %5 = arith.addf %2, %4 : vector<8x128xf32>
    %cst_5 = arith.constant 0.000000e+00 : f32
    %6 = vector.broadcast %cst_5 : f32 to vector<8x128xf32>
    %7 = arith.maximumf %5, %6 : vector<8x128xf32>
    %8 = arith.truncf %7 : vector<8x128xf32> to vector<8x128xbf16>
    %c0_6 = arith.constant 0 : index
    %c0_7 = arith.constant 0 : index
    %9 = vector.load %arg3[%c0_6, %c0_7] : memref<8x128xbf16, #tpu.memory_space<vmem>>, vector<8x128xbf16>
    tpu.vector_store %arg3[%c0_6, %c0_7], %8 {strides = array<i32>} : memref<8x128xbf16, #tpu.memory_space<vmem>>, vector<8x128xbf16>,
    return
  }
}

module attributes {stable_mosaic.version = 11 : i64} {
  func.func @_conv_matmul_kernel(%arg0: memref<16x64xbf16, #tpu.memory_space<vmem>>, %arg1: memref<64x128xbf16, #tpu.memory_space<vmem>>, %arg2: memref<16x1xf32, #tpu.memory_space<vmem>>, %arg3: memref<16x128xbf16, #tpu.memory_space<vmem>>) attributes {dimension_semantics = [], scalar_prefetch = 0 : i64, scratch_operands = 0 : i64, tpu.core_type = #tpu.core_type<tc>} {
    %c0 = arith.constant 0 : index
    %c0_0 = arith.constant 0 : index
    %0 = vector.load %arg0[%c0, %c0_0] : memref<16x64xbf16, #tpu.memory_space<vmem>>, vector<16x64xbf16>
    %c0_1 = arith.constant 0 : index
    %c0_2 = arith.constant 0 : index
    %1 = vector.load %arg1[%c0_1, %c0_2] : memref<64x128xbf16, #tpu.memory_space<vmem>>, vector<64x128xbf16>
    %cst = arith.constant dense<0.000000e+00> : vector<16x128xf32>
    %2 = tpu.matmul %0, %1, %cst {dimension_numbers = #tpu.dot_dimension_numbers<[1], [0], [0], [1], [0, 0, 1, 1], [], []>} : vector<16x64xbf16>, vector<64x128xbf16>, vector<16x128xf32> -> vector<16x128xf32>
    %c0_3 = arith.constant 0 : index
    %c0_4 = arith.constant 0 : index
    %3 = vector.load %arg2[%c0_3, %c0_4] : memref<16x1xf32, #tpu.memory_space<vmem>>, vector<16x1xf32>
    %4 = vector.broadcast %3 : vector<16x1xf32> to vector<16x128xf32>
    %5 = arith.addf %2, %4 : vector<16x128xf32>
    %6 = arith.truncf %5 : vector<16x128xf32> to vector<16x128xbf16>
    %c0_5 = arith.constant 0 : index
    %c0_6 = arith.constant 0 : index
    %7 = vector.load %arg3[%c0_5, %c0_6] : memref<16x128xbf16, #tpu.memory_space<vmem>>, vector<16x128xbf16>
    tpu.vector_store %arg3[%c0_5, %c0_6], %6 {strides = array<i32>} : memref<16x128xbf16, #tpu.memory_space<vmem>>, vector<16x128xbf16>,
    return
  }
}

module attributes {stable_mosaic.version = 11 : i64} {
  func.func @_conv_matmul_kernel(%arg0: memref<32x144xbf16, #tpu.memory_space<vmem>>, %arg1: memref<144x128xbf16, #tpu.memory_space<vmem>>, %arg2: memref<32x1xf32, #tpu.memory_space<vmem>>, %arg3: memref<32x128xbf16, #tpu.memory_space<vmem>>) attributes {dimension_semantics = [], scalar_prefetch = 0 : i64, scratch_operands = 0 : i64, tpu.core_type = #tpu.core_type<tc>} {
    %c0 = arith.constant 0 : index
    %c0_0 = arith.constant 0 : index
    %0 = vector.load %arg0[%c0, %c0_0] : memref<32x144xbf16, #tpu.memory_space<vmem>>, vector<32x144xbf16>
    %c0_1 = arith.constant 0 : index
    %c0_2 = arith.constant 0 : index
    %1 = vector.load %arg1[%c0_1, %c0_2] : memref<144x128xbf16, #tpu.memory_space<vmem>>, vector<144x128xbf16>
    %cst = arith.constant dense<0.000000e+00> : vector<32x128xf32>
    %2 = tpu.matmul %0, %1, %cst {dimension_numbers = #tpu.dot_dimension_numbers<[1], [0], [0], [1], [0, 0, 1, 1], [], []>} : vector<32x144xbf16>, vector<144x128xbf16>, vector<32x128xf32> -> vector<32x128xf32>
    %c0_3 = arith.constant 0 : index
    %c0_4 = arith.constant 0 : index
    %3 = vector.load %arg2[%c0_3, %c0_4] : memref<32x1xf32, #tpu.memory_space<vmem>>, vector<32x1xf32>
    %4 = vector.broadcast %3 : vector<32x1xf32> to vector<32x128xf32>
    %5 = arith.addf %2, %4 : vector<32x128xf32>
    %cst_5 = arith.constant 0.000000e+00 : f32
    %6 = vector.broadcast %cst_5 : f32 to vector<32x128xf32>
    %7 = arith.maximumf %5, %6 : vector<32x128xf32>
    %8 = arith.truncf %7 : vector<32x128xf32> to vector<32x128xbf16>
    %c0_6 = arith.constant 0 : index
    %c0_7 = arith.constant 0 : index
    %9 = vector.load %arg3[%c0_6, %c0_7] : memref<32x128xbf16, #tpu.memory_space<vmem>>, vector<32x128xbf16>
    tpu.vector_store %arg3[%c0_6, %c0_7], %8 {strides = array<i32>} : memref<32x128xbf16, #tpu.memory_space<vmem>>, vector<32x128xbf16>,
    return
  }
}

module attributes {stable_mosaic.version = 11 : i64} {
  func.func @_conv_matmul_kernel(%arg0: memref<32x64xbf16, #tpu.memory_space<vmem>>, %arg1: memref<64x128xbf16, #tpu.memory_space<vmem>>, %arg2: memref<32x1xf32, #tpu.memory_space<vmem>>, %arg3: memref<32x128xbf16, #tpu.memory_space<vmem>>) attributes {dimension_semantics = [], scalar_prefetch = 0 : i64, scratch_operands = 0 : i64, tpu.core_type = #tpu.core_type<tc>} {
    %c0 = arith.constant 0 : index
    %c0_0 = arith.constant 0 : index
    %0 = vector.load %arg0[%c0, %c0_0] : memref<32x64xbf16, #tpu.memory_space<vmem>>, vector<32x64xbf16>
    %c0_1 = arith.constant 0 : index
    %c0_2 = arith.constant 0 : index
    %1 = vector.load %arg1[%c0_1, %c0_2] : memref<64x128xbf16, #tpu.memory_space<vmem>>, vector<64x128xbf16>
    %cst = arith.constant dense<0.000000e+00> : vector<32x128xf32>
    %2 = tpu.matmul %0, %1, %cst {dimension_numbers = #tpu.dot_dimension_numbers<[1], [0], [0], [1], [0, 0, 1, 1], [], []>} : vector<32x64xbf16>, vector<64x128xbf16>, vector<32x128xf32> -> vector<32x128xf32>
    %c0_3 = arith.constant 0 : index
    %c0_4 = arith.constant 0 : index
    %3 = vector.load %arg2[%c0_3, %c0_4] : memref<32x1xf32, #tpu.memory_space<vmem>>, vector<32x1xf32>
    %4 = vector.broadcast %3 : vector<32x1xf32> to vector<32x128xf32>
    %5 = arith.addf %2, %4 : vector<32x128xf32>
    %6 = arith.truncf %5 : vector<32x128xf32> to vector<32x128xbf16>
    %c0_5 = arith.constant 0 : index
    %c0_6 = arith.constant 0 : index
    %7 = vector.load %arg3[%c0_5, %c0_6] : memref<32x128xbf16, #tpu.memory_space<vmem>>, vector<32x128xbf16>
    tpu.vector_store %arg3[%c0_5, %c0_6], %6 {strides = array<i32>} : memref<32x128xbf16, #tpu.memory_space<vmem>>, vector<32x128xbf16>,
    return
  }
}

module attributes {stable_mosaic.version = 11 : i64} {
  func.func @_conv_matmul_kernel(%arg0: memref<8x512xbf16, #tpu.memory_space<vmem>>, %arg1: memref<512x128xbf16, #tpu.memory_space<vmem>>, %arg2: memref<8x1xf32, #tpu.memory_space<vmem>>, %arg3: memref<8x128xbf16, #tpu.memory_space<vmem>>) attributes {dimension_semantics = [], scalar_prefetch = 0 : i64, scratch_operands = 0 : i64, tpu.core_type = #tpu.core_type<tc>} {
    %c0 = arith.constant 0 : index
    %c0_0 = arith.constant 0 : index
    %0 = vector.load %arg0[%c0, %c0_0] : memref<8x512xbf16, #tpu.memory_space<vmem>>, vector<8x512xbf16>
    %c0_1 = arith.constant 0 : index
    %c0_2 = arith.constant 0 : index
    %1 = vector.load %arg1[%c0_1, %c0_2] : memref<512x128xbf16, #tpu.memory_space<vmem>>, vector<512x128xbf16>
    %cst = arith.constant dense<0.000000e+00> : vector<8x128xf32>
    %2 = tpu.matmul %0, %1, %cst {dimension_numbers = #tpu.dot_dimension_numbers<[1], [0], [0], [1], [0, 0, 1, 1], [], []>} : vector<8x512xbf16>, vector<512x128xbf16>, vector<8x128xf32> -> vector<8x128xf32>
    %c0_3 = arith.constant 0 : index
    %c0_4 = arith.constant 0 : index
    %3 = vector.load %arg2[%c0_3, %c0_4] : memref<8x1xf32, #tpu.memory_space<vmem>>, vector<8x1xf32>
    %4 = vector.broadcast %3 : vector<8x1xf32> to vector<8x128xf32>
    %5 = arith.addf %2, %4 : vector<8x128xf32>
    %cst_5 = arith.constant 0.000000e+00 : f32
    %6 = vector.broadcast %cst_5 : f32 to vector<8x128xf32>
    %7 = arith.maximumf %5, %6 : vector<8x128xf32>
    %8 = arith.truncf %7 : vector<8x128xf32> to vector<8x128xbf16>
    %c0_6 = arith.constant 0 : index
    %c0_7 = arith.constant 0 : index
    %9 = vector.load %arg3[%c0_6, %c0_7] : memref<8x128xbf16, #tpu.memory_space<vmem>>, vector<8x128xbf16>
    tpu.vector_store %arg3[%c0_6, %c0_7], %8 {strides = array<i32>} : memref<8x128xbf16, #tpu.memory_space<vmem>>, vector<8x128xbf16>,
    return
  }
}

module attributes {stable_mosaic.version = 11 : i64} {
  func.func @_conv_matmul_kernel(%arg0: memref<8x576xbf16, #tpu.memory_space<vmem>>, %arg1: memref<576x128xbf16, #tpu.memory_space<vmem>>, %arg2: memref<8x1xf32, #tpu.memory_space<vmem>>, %arg3: memref<8x128xbf16, #tpu.memory_space<vmem>>) attributes {dimension_semantics = [], scalar_prefetch = 0 : i64, scratch_operands = 0 : i64, tpu.core_type = #tpu.core_type<tc>} {
    %c0 = arith.constant 0 : index
    %c0_0 = arith.constant 0 : index
    %0 = vector.load %arg0[%c0, %c0_0] : memref<8x576xbf16, #tpu.memory_space<vmem>>, vector<8x576xbf16>
    %c0_1 = arith.constant 0 : index
    %c0_2 = arith.constant 0 : index
    %1 = vector.load %arg1[%c0_1, %c0_2] : memref<576x128xbf16, #tpu.memory_space<vmem>>, vector<576x128xbf16>
    %cst = arith.constant dense<0.000000e+00> : vector<8x128xf32>
    %2 = tpu.matmul %0, %1, %cst {dimension_numbers = #tpu.dot_dimension_numbers<[1], [0], [0], [1], [0, 0, 1, 1], [], []>} : vector<8x576xbf16>, vector<576x128xbf16>, vector<8x128xf32> -> vector<8x128xf32>
    %c0_3 = arith.constant 0 : index
    %c0_4 = arith.constant 0 : index
    %3 = vector.load %arg2[%c0_3, %c0_4] : memref<8x1xf32, #tpu.memory_space<vmem>>, vector<8x1xf32>
    %4 = vector.broadcast %3 : vector<8x1xf32> to vector<8x128xf32>
    %5 = arith.addf %2, %4 : vector<8x128xf32>
    %cst_5 = arith.constant 0.000000e+00 : f32
    %6 = vector.broadcast %cst_5 : f32 to vector<8x128xf32>
    %7 = arith.maximumf %5, %6 : vector<8x128xf32>
    %8 = arith.truncf %7 : vector<8x128xf32> to vector<8x128xbf16>
    %c0_6 = arith.constant 0 : index
    %c0_7 = arith.constant 0 : index
    %9 = vector.load %arg3[%c0_6, %c0_7] : memref<8x128xbf16, #tpu.memory_space<vmem>>, vector<8x128xbf16>
    tpu.vector_store %arg3[%c0_6, %c0_7], %8 {strides = array<i32>} : memref<8x128xbf16, #tpu.memory_space<vmem>>, vector<8x128xbf16>,
    return
  }
}

module attributes {stable_mosaic.version = 11 : i64} {
  func.func @_conv_matmul_kernel(%arg0: memref<32x80xbf16, #tpu.memory_space<vmem>>, %arg1: memref<80x128xbf16, #tpu.memory_space<vmem>>, %arg2: memref<32x1xf32, #tpu.memory_space<vmem>>, %arg3: memref<32x128xbf16, #tpu.memory_space<vmem>>) attributes {dimension_semantics = [], scalar_prefetch = 0 : i64, scratch_operands = 0 : i64, tpu.core_type = #tpu.core_type<tc>} {
    %c0 = arith.constant 0 : index
    %c0_0 = arith.constant 0 : index
    %0 = vector.load %arg0[%c0, %c0_0] : memref<32x80xbf16, #tpu.memory_space<vmem>>, vector<32x80xbf16>
    %c0_1 = arith.constant 0 : index
    %c0_2 = arith.constant 0 : index
    %1 = vector.load %arg1[%c0_1, %c0_2] : memref<80x128xbf16, #tpu.memory_space<vmem>>, vector<80x128xbf16>
    %cst = arith.constant dense<0.000000e+00> : vector<32x128xf32>
    %2 = tpu.matmul %0, %1, %cst {dimension_numbers = #tpu.dot_dimension_numbers<[1], [0], [0], [1], [0, 0, 1, 1], [], []>} : vector<32x80xbf16>, vector<80x128xbf16>, vector<32x128xf32> -> vector<32x128xf32>
    %c0_3 = arith.constant 0 : index
    %c0_4 = arith.constant 0 : index
    %3 = vector.load %arg2[%c0_3, %c0_4] : memref<32x1xf32, #tpu.memory_space<vmem>>, vector<32x1xf32>
    %4 = vector.broadcast %3 : vector<32x1xf32> to vector<32x128xf32>
    %5 = arith.addf %2, %4 : vector<32x128xf32>
    %6 = arith.truncf %5 : vector<32x128xf32> to vector<32x128xbf16>
    %c0_5 = arith.constant 0 : index
    %c0_6 = arith.constant 0 : index
    %7 = vector.load %arg3[%c0_5, %c0_6] : memref<32x128xbf16, #tpu.memory_space<vmem>>, vector<32x128xbf16>
    tpu.vector_store %arg3[%c0_5, %c0_6], %6 {strides = array<i32>} : memref<32x128xbf16, #tpu.memory_space<vmem>>, vector<32x128xbf16>,
    return
  }
}

</mosaic_0001>

<bundles_post_ra>
// kernel: encoder_forward.69
= control target key start
LH: loop header
LB: loop body
LE: loop exit
PB: predicated region body
PF: predicated region fallthrough
CT: control target
= control target key end

     0   :  { %v887_v1 = vmov 0   ;;  %vm489_vm0 = vcmask 392192   ;;  %s1160_s1 = inlined_call_operand.vmem [shape: bf16[304,512], index: 1, kind: input, shape index: {}]   ;;  %s1161_s0 = inlined_call_operand.vmem [shape: bf16[8,304], index: 0, kind: input, shape index: {}]   ;;  %s1162_s2 = inlined_call_operand.vmem [shape: f32[8,1], index: 2, kind: input, shape index: {}]   ;;  %s1163_s3 = inlined_call_operand.vmem [shape: bf16[8,512], index: 3, kind: output, shape index: {}]  }
   0x1   :  { %v770_v0 = vld [vmem:[%s1160_s1 + $0xe4] ss:$16 sps:$4 sm:$0xff]   ;;  %566 = vmatprep.mubr.bf16.mxu1 %v887_v1  ;;  %769 = vset.pattern.permute.xlu0 %v887_v1  ;;  %v774_v3 = vld [vmem:[%s1160_s1 + $0xe0] ss:$16 sps:$4 sm:$0xff]   ;;  %v952_v14 = vld [vmem:[%s1161_s0 + $0x8] ss:$0 sps:$4 sm:$0xff]  }
   0x2   :  { %v772_v2 = vld [vmem:[%s1160_s1 + $0x244] ss:$16 sps:$4 sm:$0xff]   ;;  %493 = vmatprep.subr.bf16.mxu0 %v770_v0  ;;  %v775_v4 = vld [vmem:[%s1160_s1 + $0x240] ss:$16 sps:$4 sm:$0xff]   ;;  %v793_v15 = vld [vmem:[%s1160_s1 + $0xec] ss:$16 sps:$4 sm:$0xff]  }
   0x3   :  { %544 = vmatprep.subr.bf16.mxu1 %v772_v2  ;;  %v776_v5 = vld [vmem:[%s1160_s1 + $0xc4] ss:$16 sps:$4 sm:$0xff]   ;;  %494 = vmatpush1.bf16.msra.mxu0 %v774_v3  ;;  %v780_v7 = vld [vmem:[%s1160_s1 + $0xc0] ss:$16 sps:$4 sm:$0xff]   ;;  %v791_v16 = vld [vmem:[%s1160_s1 + $0xe8] ss:$16 sps:$4 sm:$0xff]  }
   0x4   :  { %545 = vmatpush1.bf16.msra.mxu1 %v775_v4  ;;  %v778_v6 = vld [vmem:[%s1160_s1 + $0x224] ss:$16 sps:$4 sm:$0xff]   ;;  %495 = vmatprep.subr.bf16.mxu0 %v776_v5  ;;  %v781_v8 = vld [vmem:[%s1160_s1 + $0x220] ss:$16 sps:$4 sm:$0xff]   ;;  %v799_v19 = vld [vmem:[%s1160_s1 + $0xcc] ss:$16 sps:$4 sm:$0xff]  }
   0x5   :  { %546 = vmatprep.subr.bf16.mxu1 %v778_v6  ;;  %v782_v9 = vld [vmem:[%s1160_s1 + $0xa4] ss:$16 sps:$4 sm:$0xff]   ;;  %v786_v11 = vld [vmem:[%s1160_s1 + $0xa0] ss:$16 sps:$4 sm:$0xff]   ;;  %v797_v20 = vld [vmem:[%s1160_s1 + $0xc8] ss:$16 sps:$4 sm:$0xff]  }
   0x6   :  { %v784_v10 = vld [vmem:[%s1160_s1 + $0x204] ss:$16 sps:$4 sm:$0xff]   ;;  %v787_v12 = vld [vmem:[%s1160_s1 + $0x200] ss:$16 sps:$4 sm:$0xff]   ;;  %v805_v23 = vld [vmem:[%s1160_s1 + $0xac] ss:$16 sps:$4 sm:$0xff]  }
   0x7   :  { %496 = vmatpush1.bf16.msra.mxu0 %v780_v7  ;;  %v788_v13 = vld [vmem:[%s1160_s1 + $0x84] ss:$16 sps:$4 sm:$0xff]   ;;  %v794_v17 = vld [vmem:[%s1160_s1 + $0x80] ss:$16 sps:$4 sm:$0xff]   ;;  %v803_v24 = vld [vmem:[%s1160_s1 + $0xa8] ss:$16 sps:$4 sm:$0xff]  }
   0x8   :  { %547 = vmatpush1.bf16.msra.mxu1 %v781_v8  ;;  %497 = vmatprep.subr.bf16.mxu0 %v782_v9  ;;  %v795_v18 = vld [vmem:[%s1160_s1 + $0x64] ss:$16 sps:$4 sm:$0xff]   ;;  %v800_v21 = vld [vmem:[%s1160_s1 + $0x60] ss:$16 sps:$4 sm:$0xff]   ;;  %v811_v27 = vld [vmem:[%s1160_s1 + $0x8c] ss:$16 sps:$4 sm:$0xff]  }
   0x9   :  { %548 = vmatprep.subr.bf16.mxu1 %v784_v10  ;;  %v801_v22 = vld [vmem:[%s1160_s1 + $0x44] ss:$16 sps:$4 sm:$0xff]   ;;  %v806_v25 = vld [vmem:[%s1160_s1 + $0x40] ss:$16 sps:$4 sm:$0xff]   ;;  %v809_v28 = vld [vmem:[%s1160_s1 + $0x88] ss:$16 sps:$4 sm:$0xff]  }
   0xa   :  { %v807_v26 = vld [vmem:[%s1160_s1 + $0x24] ss:$16 sps:$4 sm:$0xff]   ;;  %v812_v29 = vld [vmem:[%s1160_s1 + $0x20] ss:$16 sps:$4 sm:$0xff]   ;;  %v817_v31 = vld [vmem:[%s1160_s1 + $0x6c] ss:$16 sps:$4 sm:$0xff]  }
   0xb   :  { %498 = vmatpush1.bf16.msra.mxu0 %v786_v11  ;;  %v813_v30 = vld [vmem:[%s1160_s1 + $0x4] ss:$16 sps:$4 sm:$0xff]   ;;  %v815_v32 = vld [vmem:[%s1160_s1 + $0x68] ss:$16 sps:$4 sm:$0xff]   ;;  %v818_v33 = vld [vmem:[%s1160_s1] ss:$16 sps:$4 sm:$0xff]  }
   0xc   :  { %549 = vmatpush1.bf16.msra.mxu1 %v787_v12  ;;  %499 = vmatprep.subr.bf16.mxu0 %v788_v13  ;;  %v819_v34 = vld [vmem:[%s1160_s1 + $0x1e4] ss:$16 sps:$4 sm:$0xff]   ;;  %v823_v35 = vld [vmem:[%s1160_s1 + $0x4c] ss:$16 sps:$4 sm:$0xff]   ;;  %v821_v36 = vld [vmem:[%s1160_s1 + $0x48] ss:$16 sps:$4 sm:$0xff]  }
   0xd   :  { %575 = vmatprep.subr.bf16.mxu1 %v793_v15  ;;  %v824_v37 = vld [vmem:[%s1160_s1 + $0x1e0] ss:$16 sps:$4 sm:$0xff]   ;;  %v825_v38 = vld [vmem:[%s1160_s1 + $0x1c4] ss:$16 sps:$4 sm:$0xff]   ;;  %v829_v39 = vld [vmem:[%s1160_s1 + $0x2c] ss:$16 sps:$4 sm:$0xff]  }
   0xe   :  { %v827_v40 = vld [vmem:[%s1160_s1 + $0x28] ss:$16 sps:$4 sm:$0xff]   ;;  %v830_v41 = vld [vmem:[%s1160_s1 + $0x1c0] ss:$16 sps:$4 sm:$0xff]   ;;  %v831_v42 = vld [vmem:[%s1160_s1 + $0x1a4] ss:$16 sps:$4 sm:$0xff]  }
   0xf   :  { %762 = vmatmul.mubr.msk.bf16.vlgmr.msra.gmra.mxu1 %vm489_vm0, %v952_v14  ;;  %500 = vmatpush1.bf16.msra.mxu0 %v794_v17  ;;  %v835_v43 = vld [vmem:[%s1160_s1 + $0xc] ss:$16 sps:$4 sm:$0xff]   ;;  %v833_v44 = vld [vmem:[%s1160_s1 + $0x8] ss:$16 sps:$4 sm:$0xff]   ;;  %v836_v45 = vld [vmem:[%s1160_s1 + $0x1a0] ss:$16 sps:$4 sm:$0xff]  }
  0x10   :  { %576 = vmatpush1.bf16.msra.mxu1 %v791_v16  ;;  %501 = vmatprep.subr.bf16.mxu0 %v795_v18  ;;  %v837_v46 = vld [vmem:[%s1160_s1 + $0x184] ss:$16 sps:$4 sm:$0xff]   ;;  %v841_v47 = vld [vmem:[%s1160_s1 + $0x1ec] ss:$16 sps:$4 sm:$0xff]   ;;  %v839_v48 = vld [vmem:[%s1160_s1 + $0x1e8] ss:$16 sps:$4 sm:$0xff]  }
  0x11   :  { %577 = vmatprep.subr.bf16.mxu1 %v799_v19  ;;  %v15_v49 = vld [vmem:[%s1161_s0] sm:$0xff]  ;;  %v847_v53 = vld [vmem:[%s1160_s1 + $0x1cc] ss:$16 sps:$4 sm:$0xff]   ;;  %v845_v54 = vld [vmem:[%s1160_s1 + $0x1c8] ss:$16 sps:$4 sm:$0xff]  }
  0x12   :  { %v842_v50 = vld [vmem:[%s1160_s1 + $0x180] ss:$16 sps:$4 sm:$0xff]   ;;  %v843_v51 = vld [vmem:[%s1160_s1 + $0x164] ss:$16 sps:$4 sm:$0xff]   ;;  %v684_v52 = vcombine.high %v15_v49, %v15_v49  ;;  %v853_v57 = vld [vmem:[%s1160_s1 + $0x1ac] ss:$16 sps:$4 sm:$0xff]   ;;  %v683_v8 = vcombine.low %v15_v49, %v15_v49 }
  0x13   :  { %502 = vmatpush1.bf16.msra.mxu0 %v800_v21  ;;  %v848_v55 = vld [vmem:[%s1160_s1 + $0x160] ss:$16 sps:$4 sm:$0xff]   ;;  %v849_v56 = vld [vmem:[%s1160_s1 + $0x144] ss:$16 sps:$4 sm:$0xff]   ;;  %v851_v59 = vld [vmem:[%s1160_s1 + $0x1a8] ss:$16 sps:$4 sm:$0xff]  }
  0x14   :  { %578 = vmatpush1.bf16.msra.mxu1 %v797_v20  ;;  %503 = vmatprep.subr.bf16.mxu0 %v801_v22  ;;  %v93_v58 = vld [vmem:[%s1162_s2] sm:$0xff]  ;;  %v859_v62 = vld [vmem:[%s1160_s1 + $0x18c] ss:$16 sps:$4 sm:$0xff]   ;;  %v857_v63 = vld [vmem:[%s1160_s1 + $0x188] ss:$16 sps:$4 sm:$0xff]  }
  0x15   :  { %579 = vmatprep.subr.bf16.mxu1 %v805_v23  ;;  %525 = vmatprep.mubr.bf16.mxu0 %v684_v52  ;;  %v854_v60 = vld [vmem:[%s1160_s1 + $0x140] ss:$16 sps:$4 sm:$0xff]   ;;  %v855_v61 = vld [vmem:[%s1160_s1 + $0x124] ss:$16 sps:$4 sm:$0xff]   ;;  %v865_v3 = vld [vmem:[%s1160_s1 + $0x16c] ss:$16 sps:$4 sm:$0xff]  }
  0x16   :  { %607 = vmatprep.mubr.bf16.mxu1 %v684_v52  ;;  %96 = vperm.xlu0 %769, %v93_v58   ;;  %v860_v0 = vld [vmem:[%s1160_s1 + $0x120] ss:$16 sps:$4 sm:$0xff]   ;;  %v861_v2 = vld [vmem:[%s1160_s1 + $0x104] ss:$16 sps:$4 sm:$0xff]   ;;  %v863_v4 = vld [vmem:[%s1160_s1 + $0x168] ss:$16 sps:$4 sm:$0xff]  }
  0x17   :  { %504 = vmatpush1.bf16.msra.mxu0 %v806_v25  ;;  %v866_v5 = vld [vmem:[%s1160_s1 + $0x100] ss:$16 sps:$4 sm:$0xff]   ;;  %v871_v6 = vld [vmem:[%s1160_s1 + $0x14c] ss:$16 sps:$4 sm:$0xff]   ;;  %v869_v9 = vld [vmem:[%s1160_s1 + $0x148] ss:$16 sps:$4 sm:$0xff]  }
  0x18   :  { %580 = vmatpush1.bf16.msra.mxu1 %v803_v24  ;;  %505 = vmatprep.subr.bf16.mxu0 %v807_v26  ;;  %v874_v7 = vld [vmem:[%s1160_s1 + $0x24c] ss:$16 sps:$4 sm:$0xff]   ;;  %v872_v10 = vld [vmem:[%s1160_s1 + $0x248] ss:$16 sps:$4 sm:$0xff]  }
  0x19   :  { %581 = vmatprep.subr.bf16.mxu1 %v811_v27  ;;  %v877_v11 = vld [vmem:[%s1160_s1 + $0x12c] ss:$16 sps:$4 sm:$0xff]   ;;  %v875_v13 = vld [vmem:[%s1160_s1 + $0x128] ss:$16 sps:$4 sm:$0xff]  }
  0x1a   :  { %v880_v12 = vld [vmem:[%s1160_s1 + $0x22c] ss:$16 sps:$4 sm:$0xff]   ;;  %v878_v15 = vld [vmem:[%s1160_s1 + $0x228] ss:$16 sps:$4 sm:$0xff]  }
  0x1b   :  { %506 = vmatpush1.bf16.msra.mxu0 %v812_v29  ;;  %v883_v16 = vld [vmem:[%s1160_s1 + $0x10c] ss:$16 sps:$4 sm:$0xff]   ;;  %v881_v18 = vld [vmem:[%s1160_s1 + $0x108] ss:$16 sps:$4 sm:$0xff]  }
  0x1c   :  { %582 = vmatpush1.bf16.msra.mxu1 %v809_v28  ;;  %507 = vmatprep.subr.bf16.mxu0 %v813_v30  ;;  %v886_v17 = vld [vmem:[%s1160_s1 + $0x20c] ss:$16 sps:$4 sm:$0xff]   ;;  %v884_v19 = vld [vmem:[%s1160_s1 + $0x208] ss:$16 sps:$4 sm:$0xff]  }
  0x1d   :  { %583 = vmatprep.subr.bf16.mxu1 %v817_v31 }
  0x1f   :  { %508 = vmatpush1.bf16.msra.mxu0 %v818_v33 }
  0x20   :  { %584 = vmatpush1.bf16.msra.mxu1 %v815_v32  ;;  %509 = vmatprep.subr.bf16.mxu0 %v819_v34 }
  0x21   :  { %585 = vmatprep.subr.bf16.mxu1 %v823_v35 }
  0x23   :  { %510 = vmatpush2.bf16.msra.mxu0 %v824_v37 }
  0x24   :  { %586 = vmatpush1.bf16.msra.mxu1 %v821_v36  ;;  %511 = vmatprep.subr.bf16.mxu0 %v825_v38 }
  0x25   :  { %587 = vmatprep.subr.bf16.mxu1 %v829_v39 }
  0x27   :  { %512 = vmatpush2.bf16.msra.mxu0 %v830_v41 }
  0x28   :  { %588 = vmatpush1.bf16.msra.mxu1 %v827_v40  ;;  %513 = vmatprep.subr.bf16.mxu0 %v831_v42 }
  0x29   :  { %589 = vmatprep.subr.bf16.mxu1 %v835_v43 }
  0x2b   :  { %514 = vmatpush2.bf16.msra.mxu0 %v836_v45 }
  0x2c   :  { %590 = vmatpush1.bf16.msra.mxu1 %v833_v44  ;;  %515 = vmatprep.subr.bf16.mxu0 %v837_v46 }
  0x2d   :  { %591 = vmatprep.subr.bf16.mxu1 %v841_v47 }
  0x2f   :  { %516 = vmatpush2.bf16.msra.mxu0 %v842_v50 }
  0x30   :  { %592 = vmatpush2.bf16.msra.mxu1 %v839_v48  ;;  %517 = vmatprep.subr.bf16.mxu0 %v843_v51 }
  0x31   :  { %593 = vmatprep.subr.bf16.mxu1 %v847_v53 }
  0x33   :  { %518 = vmatpush2.bf16.msra.mxu0 %v848_v55 }
  0x34   :  { %594 = vmatpush2.bf16.msra.mxu1 %v845_v54  ;;  %519 = vmatprep.subr.bf16.mxu0 %v849_v56 }
  0x35   :  { %595 = vmatprep.subr.bf16.mxu1 %v853_v57 }
  0x37   :  { %520 = vmatpush2.bf16.msra.mxu0 %v854_v60 }
  0x38   :  { %596 = vmatpush2.bf16.msra.mxu1 %v851_v59  ;;  %521 = vmatprep.subr.bf16.mxu0 %v855_v61 }
  0x39   :  { %597 = vmatprep.subr.bf16.mxu1 %v859_v62 }
  0x3b   :  { %522 = vmatpush2.bf16.msra.mxu0 %v860_v0 }
  0x3c   :  { %598 = vmatpush2.bf16.msra.mxu1 %v857_v63  ;;  %523 = vmatprep.subr.bf16.mxu0 %v861_v2 }
  0x3d   :  { %599 = vmatprep.subr.bf16.mxu1 %v865_v3 }
  0x3f   :  { %524 = vmatpush2.bf16.msra.mxu0 %v866_v5 }
  0x40   :  { %600 = vmatpush2.bf16.msra.mxu1 %v863_v4  ;;  %626 = vmatprep.subr.bf16.mxu0 %v874_v7 }
  0x41   :  { %601 = vmatprep.subr.bf16.mxu1 %v871_v6 }
  0x42   :  { %526 = vmatmul.mubr.bf16.vlgmr.msra.gmra.mxu0 %v683_v8 }
  0x43   :  { %627 = vmatpush1.bf16.msra.mxu0 %v872_v10  ;;  %648 = vmatprep.mubr.bf16.mxu0 %v887_v1 }
  0x44   :  { %602 = vmatpush2.bf16.msra.mxu1 %v869_v9  ;;  %628 = vmatprep.subr.bf16.mxu0 %v880_v12 }
  0x45   :  { %603 = vmatprep.subr.bf16.mxu1 %v877_v11 }
  0x47   :  { %629 = vmatpush1.bf16.msra.mxu0 %v878_v15 }
  0x48   :  { %604 = vmatpush2.bf16.msra.mxu1 %v875_v13  ;;  %630 = vmatprep.subr.bf16.mxu0 %v886_v17 }
  0x49   :  { %605 = vmatprep.subr.bf16.mxu1 %v883_v16 }
  0x4b   :  { %631 = vmatpush1.bf16.msra.mxu0 %v884_v19 }
  0x4c   :  { %606 = vmatpush2.bf16.msra.mxu1 %v881_v18 }
  0x4e   :  { %763 = vmatmul.mubr.msk.bf16.vlgmr.msra.gmra.mxu0 %vm489_vm0, %v952_v14 }
  0x4f   :  { %608 = vmatmul.mubr.bf16.vlgmr.msra.gmra.mxu1 %v683_v8 }
  0x91   :  { %v97_v23 = vpop.permute.xlu0 %96 }
  0xcf   :  { %v568_v20 = vpop.f32.mrf.mxu1 }
  0xd1   :  { %v570_v1 = vpop.f32.mrf.mxu1 }
  0xd3   :  { %v572_v21 = vpop.f32.mrf.mxu1 }
  0xd5   :  { %v573_v22 = vpop.f32.mrf.mxu1 }
 0x102   :  { %v527_v24 = vpop.f32.mrf.mxu0 }
 0x103   :  { %v528_v25 = vadd.f32 %v527_v24, %v97_v23 }
 0x104   :  { %v529_v26 = vpop.f32.mrf.mxu0 }
 0x105   :  { %v569_v27 = vadd.f32 %v568_v20, %v528_v25  ;;  %v530_v28 = vadd.f32 %v529_v26, %v97_v23 }
 0x106   :  { %v531_v29 = vpop.f32.mrf.mxu0 }
 0x107   :  { %v571_v30 = vadd.f32 %v570_v1, %v530_v28  ;;  %v657_v32 = vmax.f32 %v569_v27, 0.0 }
 0x108   :  { %v532_v31 = vpop.f32.mrf.mxu0 }
 0x109   :  { %v658_v33 = vmax.f32 %v571_v30, 0.0 }
 0x10b   :  { %v766_v34 = vpack.c.bf16 %v658_v33, %v657_v32 }
 0x10d   :  { %677 = vst [vmem:[%s1163_s3] sm:$0xff] %v766_v34 }
 0x10e   :  { %v650_v35 = vpop.f32.mrf.mxu0 }
 0x10f   :  { %v609_v14 = vpop.f32.mrf.mxu1 }
 0x110   :  { %v610_v36 = vadd.f32 %v609_v14, %v97_v23  ;;  %v652_v38 = vpop.f32.mrf.mxu0 }
 0x111   :  { %v611_v37 = vpop.f32.mrf.mxu1 }
 0x112   :  { %v651_v39 = vadd.f32 %v650_v35, %v610_v36  ;;  %v612_v40 = vadd.f32 %v611_v37, %v97_v23  ;;  %v654_v42 = vpop.f32.mrf.mxu0 }
 0x113   :  { %v613_v41 = vpop.f32.mrf.mxu1 }
 0x114   :  { %v653_v43 = vadd.f32 %v652_v38, %v612_v40  ;;  %v655_v45 = vpop.f32.mrf.mxu0  ;;  %v659_v46 = vmax.f32 %v651_v39, 0.0 }
 0x115   :  { %v614_v44 = vpop.f32.mrf.mxu1 }
 0x116   :  { %v660_v47 = vmax.f32 %v653_v43, 0.0 }
 0x118   :  { %v767_v48 = vpack.c.bf16 %v660_v47, %v659_v46 }
 0x11a   :  { %678 = vst [vmem:[%s1163_s3 + $0x8] sm:$0xff] %v767_v48 }

// kernel: encoder_forward.70
= control target key start
LH: loop header
LB: loop body
LE: loop exit
PB: predicated region body
PF: predicated region fallthrough
CT: control target
= control target key end

     0   :  { %v312_v1 = vmov 0   ;;  %vm142_vm0 = vcmask 654336   ;;  %s405_s1 = inlined_call_operand.vmem [shape: bf16[80,512], index: 1, kind: input, shape index: {}]   ;;  %s406_s2 = inlined_call_operand.vmem [shape: f32[8,1], index: 2, kind: input, shape index: {}]   ;;  %s407_s0 = inlined_call_operand.vmem [shape: bf16[8,80], index: 0, kind: input, shape index: {}]   ;;  %s408_s3 = inlined_call_operand.vmem [shape: bf16[8,512], index: 3, kind: output, shape index: {}]  }
   0x1   :  { %v282_v0 = vld [vmem:[%s405_s1 + $0x84] ss:$16 sps:$4 sm:$0xff]   ;;  %178 = vmatprep.mubr.bf16.mxu0 %v312_v1  ;;  %219 = vmatprep.mubr.bf16.mxu1 %v312_v1  ;;  %v284_v2 = vld [vmem:[%s405_s1 + $0x8c] ss:$16 sps:$4 sm:$0xff]   ;;  %v286_v3 = vld [vmem:[%s405_s1 + $0x80] ss:$16 sps:$4 sm:$0xff]  }
   0x2   :  { %281 = vset.pattern.permute.xlu0 %v312_v1  ;;  %152 = vmatprep.subr.bf16.mxu0 %v282_v0  ;;  %v287_v4 = vld [vmem:[%s405_s1 + $0x88] ss:$16 sps:$4 sm:$0xff]   ;;  %v288_v5 = vld [vmem:[%s405_s1 + $0x64] ss:$16 sps:$4 sm:$0xff]   ;;  %v290_v6 = vld [vmem:[%s405_s1 + $0x6c] ss:$16 sps:$4 sm:$0xff]  }
   0x3   :  { %193 = vmatprep.subr.bf16.mxu1 %v284_v2  ;;  %153 = vmatpush1.bf16.msra.mxu0 %v286_v3  ;;  %v292_v7 = vld [vmem:[%s405_s1 + $0x60] ss:$16 sps:$4 sm:$0xff]   ;;  %v293_v8 = vld [vmem:[%s405_s1 + $0x68] ss:$16 sps:$4 sm:$0xff]   ;;  %v294_v9 = vld [vmem:[%s405_s1 + $0x44] ss:$16 sps:$4 sm:$0xff]  }
   0x4   :  { %194 = vmatpush1.bf16.msra.mxu1 %v287_v4  ;;  %154 = vmatprep.subr.bf16.mxu0 %v288_v5  ;;  %v296_v10 = vld [vmem:[%s405_s1 + $0x4c] ss:$16 sps:$4 sm:$0xff]   ;;  %v298_v11 = vld [vmem:[%s405_s1 + $0x40] ss:$16 sps:$4 sm:$0xff]   ;;  %v299_v12 = vld [vmem:[%s405_s1 + $0x48] ss:$16 sps:$4 sm:$0xff]  }
   0x5   :  { %195 = vmatprep.subr.bf16.mxu1 %v290_v6  ;;  %v300_v13 = vld [vmem:[%s405_s1 + $0x24] ss:$16 sps:$4 sm:$0xff]   ;;  %v302_v14 = vld [vmem:[%s405_s1 + $0x2c] ss:$16 sps:$4 sm:$0xff]   ;;  %v304_v15 = vld [vmem:[%s405_s1 + $0x20] ss:$16 sps:$4 sm:$0xff]  }
   0x6   :  { %v305_v16 = vld [vmem:[%s405_s1 + $0x28] ss:$16 sps:$4 sm:$0xff]   ;;  %v306_v17 = vld [vmem:[%s405_s1 + $0x4] ss:$16 sps:$4 sm:$0xff]   ;;  %v308_v18 = vld [vmem:[%s405_s1 + $0xc] ss:$16 sps:$4 sm:$0xff]  }
   0x7   :  { %155 = vmatpush1.bf16.msra.mxu0 %v292_v7  ;;  %v36_v19 = vld [vmem:[%s406_s2] sm:$0xff]  ;;  %v311_v21 = vld [vmem:[%s405_s1 + $0x8] ss:$16 sps:$4 sm:$0xff]  }
   0x8   :  { %196 = vmatpush1.bf16.msra.mxu1 %v293_v8  ;;  %156 = vmatprep.subr.bf16.mxu0 %v294_v9  ;;  %v310_v20 = vld [vmem:[%s405_s1] ss:$16 sps:$4 sm:$0xff]  }
   0x9   :  { %197 = vmatprep.subr.bf16.mxu1 %v296_v10  ;;  %39 = vperm.xlu0 %281, %v36_v19   ;;  %v15_v22 = vld [vmem:[%s407_s0] sm:$0xf] }
   0xb   :  { %157 = vmatpush1.bf16.msra.mxu0 %v298_v11 }
   0xc   :  { %198 = vmatpush1.bf16.msra.mxu1 %v299_v12  ;;  %158 = vmatprep.subr.bf16.mxu0 %v300_v13 }
   0xd   :  { %199 = vmatprep.subr.bf16.mxu1 %v302_v14 }
   0xf   :  { %159 = vmatpush1.bf16.msra.mxu0 %v304_v15 }
  0x10   :  { %200 = vmatpush1.bf16.msra.mxu1 %v305_v16  ;;  %160 = vmatprep.subr.bf16.mxu0 %v306_v17 }
  0x11   :  { %201 = vmatprep.subr.bf16.mxu1 %v308_v18 }
  0x13   :  { %161 = vmatpush1.bf16.msra.mxu0 %v310_v20 }
  0x14   :  { %202 = vmatpush1.bf16.msra.mxu1 %v311_v21 }
  0x16   :  { %274 = vmatmul.mubr.msk.bf16.vlgmr.msra.gmra.mxu0 %vm142_vm0, %v15_v22 }
  0x17   :  { %275 = vmatmul.mubr.msk.bf16.vlgmr.msra.gmra.mxu1 %vm142_vm0, %v15_v22 }
  0x84   :  { %v40_v23 = vpop.permute.xlu0 %39 }
  0xd6   :  { %v180_v24 = vpop.f32.mrf.mxu0 }
  0xd7   :  { %v221_v25 = vpop.f32.mrf.mxu1  ;;  %v181_v26 = vadd.f32 %v180_v24, %v40_v23 }
  0xd8   :  { %v222_v27 = vadd.f32 %v221_v25, %v40_v23  ;;  %v182_v28 = vpop.f32.mrf.mxu0 }
  0xd9   :  { %v223_v29 = vpop.f32.mrf.mxu1  ;;  %v183_v30 = vadd.f32 %v182_v28, %v40_v23  ;;  %v228_v34 = vmax.f32 %v181_v26, 0.0 }
  0xda   :  { %v224_v31 = vadd.f32 %v223_v29, %v40_v23  ;;  %v184_v32 = vpop.f32.mrf.mxu0  ;;  %v230_v35 = vmax.f32 %v222_v27, 0.0 }
  0xdb   :  { %v225_v33 = vpop.f32.mrf.mxu1  ;;  %v229_v36 = vmax.f32 %v183_v30, 0.0 }
  0xdc   :  { %v231_v37 = vmax.f32 %v224_v31, 0.0  ;;  %v185_v38 = vpop.f32.mrf.mxu0 }
  0xdd   :  { %v226_v39 = vpop.f32.mrf.mxu1  ;;  %v278_v40 = vpack.c.bf16 %v229_v36, %v228_v34 }
  0xde   :  { %v279_v41 = vpack.c.bf16 %v231_v37, %v230_v35 }
  0xdf   :  { %248 = vst [vmem:[%s408_s3] sm:$0xff] %v278_v40 }
  0xe0   :  { %249 = vst [vmem:[%s408_s3 + $0x8] sm:$0xff] %v279_v41 }

// kernel: encoder_forward.71
= control target key start
LH: loop header
LB: loop body
LE: loop exit
PB: predicated region body
PF: predicated region fallthrough
CT: control target
= control target key end

     0   :  { %v458_v1 = vmov 0   ;;  %vm244_vm0 = vcmask 130048   ;;  %s599_s1 = inlined_call_operand.vmem [shape: bf16[144,512], index: 1, kind: input, shape index: {}]   ;;  %s600_s0 = inlined_call_operand.vmem [shape: bf16[8,144], index: 0, kind: input, shape index: {}]   ;;  %s601_s2 = inlined_call_operand.vmem [shape: f32[8,1], index: 2, kind: input, shape index: {}]   ;;  %s602_s3 = inlined_call_operand.vmem [shape: bf16[8,512], index: 3, kind: output, shape index: {}]  }
   0x1   :  { %v402_v0 = vld [vmem:[%s599_s1 + $0xe4] ss:$16 sps:$4 sm:$0xff]   ;;  %401 = vset.pattern.permute.xlu0 %v458_v1  ;;  %v404_v2 = vld [vmem:[%s599_s1 + $0xec] ss:$16 sps:$4 sm:$0xff]   ;;  %v406_v3 = vld [vmem:[%s599_s1 + $0xe0] ss:$16 sps:$4 sm:$0xff]  }
   0x2   :  { %248 = vmatprep.subr.bf16.mxu0 %v402_v0  ;;  %v407_v4 = vld [vmem:[%s599_s1 + $0xe8] ss:$16 sps:$4 sm:$0xff]   ;;  %289 = vmatprep.subr.bf16.mxu1 %v404_v2  ;;  %v408_v5 = vld [vmem:[%s599_s1 + $0xc4] ss:$16 sps:$4 sm:$0xff]   ;;  %v410_v6 = vld [vmem:[%s599_s1 + $0xcc] ss:$16 sps:$4 sm:$0xff]  }
   0x3   :  { %249 = vmatpush1.bf16.msra.mxu0 %v406_v3  ;;  %290 = vmatpush1.bf16.msra.mxu1 %v407_v4  ;;  %v412_v7 = vld [vmem:[%s599_s1 + $0xc0] ss:$16 sps:$4 sm:$0xff]   ;;  %v413_v8 = vld [vmem:[%s599_s1 + $0xc8] ss:$16 sps:$4 sm:$0xff]   ;;  %v414_v9 = vld [vmem:[%s599_s1 + $0xa4] ss:$16 sps:$4 sm:$0xff]  }
   0x4   :  { %250 = vmatprep.subr.bf16.mxu0 %v408_v5  ;;  %291 = vmatprep.subr.bf16.mxu1 %v410_v6  ;;  %v416_v10 = vld [vmem:[%s599_s1 + $0xac] ss:$16 sps:$4 sm:$0xff]   ;;  %v418_v11 = vld [vmem:[%s599_s1 + $0xa0] ss:$16 sps:$4 sm:$0xff]   ;;  %v419_v12 = vld [vmem:[%s599_s1 + $0xa8] ss:$16 sps:$4 sm:$0xff]  }
   0x5   :  { %v420_v13 = vld [vmem:[%s599_s1 + $0x84] ss:$16 sps:$4 sm:$0xff]   ;;  %v422_v14 = vld [vmem:[%s599_s1 + $0x8c] ss:$16 sps:$4 sm:$0xff]   ;;  %v424_v15 = vld [vmem:[%s599_s1 + $0x80] ss:$16 sps:$4 sm:$0xff]  }
   0x6   :  { %v425_v16 = vld [vmem:[%s599_s1 + $0x88] ss:$16 sps:$4 sm:$0xff]   ;;  %v426_v17 = vld [vmem:[%s599_s1 + $0x64] ss:$16 sps:$4 sm:$0xff]   ;;  %v428_v18 = vld [vmem:[%s599_s1 + $0x6c] ss:$16 sps:$4 sm:$0xff]  }
   0x7   :  { %251 = vmatpush1.bf16.msra.mxu0 %v412_v7  ;;  %292 = vmatpush1.bf16.msra.mxu1 %v413_v8  ;;  %v430_v19 = vld [vmem:[%s599_s1 + $0x60] ss:$16 sps:$4 sm:$0xff]   ;;  %v431_v20 = vld [vmem:[%s599_s1 + $0x68] ss:$16 sps:$4 sm:$0xff]   ;;  %v432_v21 = vld [vmem:[%s599_s1 + $0x44] ss:$16 sps:$4 sm:$0xff]  }
   0x8   :  { %252 = vmatprep.subr.bf16.mxu0 %v414_v9  ;;  %293 = vmatprep.subr.bf16.mxu1 %v416_v10  ;;  %v434_v22 = vld [vmem:[%s599_s1 + $0x4c] ss:$16 sps:$4 sm:$0xff]   ;;  %v436_v23 = vld [vmem:[%s599_s1 + $0x40] ss:$16 sps:$4 sm:$0xff]   ;;  %v437_v24 = vld [vmem:[%s599_s1 + $0x48] ss:$16 sps:$4 sm:$0xff]  }
   0x9   :  { %v438_v25 = vld [vmem:[%s599_s1 + $0x24] ss:$16 sps:$4 sm:$0xff]   ;;  %v440_v26 = vld [vmem:[%s599_s1 + $0x2c] ss:$16 sps:$4 sm:$0xff]   ;;  %v442_v27 = vld [vmem:[%s599_s1 + $0x20] ss:$16 sps:$4 sm:$0xff]  }
   0xa   :  { %v443_v28 = vld [vmem:[%s599_s1 + $0x28] ss:$16 sps:$4 sm:$0xff]   ;;  %v15_v29 = vld [vmem:[%s600_s0] sm:$0xff]  ;;  %v446_v32 = vld [vmem:[%s599_s1 + $0xc] ss:$16 sps:$4 sm:$0xff]  }
   0xb   :  { %253 = vmatpush1.bf16.msra.mxu0 %v418_v11  ;;  %294 = vmatpush1.bf16.msra.mxu1 %v419_v12  ;;  %v52_v30 = vld [vmem:[%s601_s2] sm:$0xff]  ;;  %v357_v33 = vcombine.high %v15_v29, %v15_v29  ;;  %v449_v35 = vld [vmem:[%s599_s1 + $0x8] ss:$16 sps:$4 sm:$0xff]   ;;  %v452_v37 = vld [vmem:[%s599_s1 + $0x10c] ss:$16 sps:$4 sm:$0xff]   ;;  %v356_v40 = vcombine.low %v15_v29, %v15_v29 }
   0xc   :  { %254 = vmatprep.subr.bf16.mxu0 %v420_v13  ;;  %295 = vmatprep.subr.bf16.mxu1 %v422_v14  ;;  %v444_v31 = vld [vmem:[%s599_s1 + $0x4] ss:$16 sps:$4 sm:$0xff]   ;;  %v448_v34 = vld [vmem:[%s599_s1] ss:$16 sps:$4 sm:$0xff]   ;;  %v455_v39 = vld [vmem:[%s599_s1 + $0x108] ss:$16 sps:$4 sm:$0xff]  }
   0xd   :  { %55 = vperm.xlu0 %401, %v52_v30   ;;  %394 = vmatprep.mubr.msk.bf16.mxu0 %vm244_vm0, %v357_v33  ;;  %v450_v36 = vld [vmem:[%s599_s1 + $0x104] ss:$16 sps:$4 sm:$0xff]   ;;  %v454_v38 = vld [vmem:[%s599_s1 + $0x100] ss:$16 sps:$4 sm:$0xff]  }
   0xe   :  { %395 = vmatprep.mubr.msk.bf16.mxu1 %vm244_vm0, %v357_v33 }
   0xf   :  { %255 = vmatpush1.bf16.msra.mxu0 %v424_v15  ;;  %296 = vmatpush1.bf16.msra.mxu1 %v425_v16 }
  0x10   :  { %256 = vmatprep.subr.bf16.mxu0 %v426_v17  ;;  %297 = vmatprep.subr.bf16.mxu1 %v428_v18 }
  0x13   :  { %257 = vmatpush1.bf16.msra.mxu0 %v430_v19  ;;  %298 = vmatpush1.bf16.msra.mxu1 %v431_v20 }
  0x14   :  { %258 = vmatprep.subr.bf16.mxu0 %v432_v21  ;;  %299 = vmatprep.subr.bf16.mxu1 %v434_v22 }
  0x17   :  { %259 = vmatpush1.bf16.msra.mxu0 %v436_v23  ;;  %300 = vmatpush1.bf16.msra.mxu1 %v437_v24 }
  0x18   :  { %260 = vmatprep.subr.bf16.mxu0 %v438_v25  ;;  %301 = vmatprep.subr.bf16.mxu1 %v440_v26 }
  0x1b   :  { %261 = vmatpush1.bf16.msra.mxu0 %v442_v27  ;;  %302 = vmatpush1.bf16.msra.mxu1 %v443_v28 }
  0x1c   :  { %262 = vmatprep.subr.bf16.mxu0 %v444_v31  ;;  %303 = vmatprep.subr.bf16.mxu1 %v446_v32 }
  0x1f   :  { %263 = vmatpush1.bf16.msra.mxu0 %v448_v34  ;;  %304 = vmatpush1.bf16.msra.mxu1 %v449_v35 }
  0x20   :  { %278 = vmatprep.subr.bf16.mxu0 %v450_v36  ;;  %319 = vmatprep.subr.bf16.mxu1 %v452_v37 }
  0x23   :  { %279 = vmatpush2.bf16.msra.mxu0 %v454_v38  ;;  %320 = vmatpush2.bf16.msra.mxu1 %v455_v39 }
  0x26   :  { %281 = vmatmul.mubr.bf16.vlgmr.msra.gmra.mxu0 %v356_v40  ;;  %322 = vmatmul.mubr.bf16.vlgmr.msra.gmra.mxu1 %v356_v40 }
  0x88   :  { %v56_v41 = vpop.permute.xlu0 %55 }
  0xe6   :  { %v282_v42 = vpop.f32.mrf.mxu0  ;;  %v323_v43 = vpop.f32.mrf.mxu1 }
  0xe7   :  { %v283_v44 = vadd.f32 %v282_v42, %v56_v41  ;;  %v324_v45 = vadd.f32 %v323_v43, %v56_v41 }
  0xe8   :  { %v284_v46 = vpop.f32.mrf.mxu0  ;;  %v325_v47 = vpop.f32.mrf.mxu1 }
  0xe9   :  { %v285_v48 = vadd.f32 %v284_v46, %v56_v41  ;;  %v326_v49 = vadd.f32 %v325_v47, %v56_v41  ;;  %v330_v52 = vmax.f32 %v283_v44, 0.0  ;;  %v332_v53 = vmax.f32 %v324_v45, 0.0 }
  0xea   :  { %v286_v50 = vpop.f32.mrf.mxu0  ;;  %v327_v51 = vpop.f32.mrf.mxu1 }
  0xeb   :  { %v331_v54 = vmax.f32 %v285_v48, 0.0  ;;  %v333_v55 = vmax.f32 %v326_v49, 0.0 }
  0xec   :  { %v287_v56 = vpop.f32.mrf.mxu0  ;;  %v328_v57 = vpop.f32.mrf.mxu1 }
  0xed   :  { %v398_v58 = vpack.c.bf16 %v331_v54, %v330_v52  ;;  %v399_v59 = vpack.c.bf16 %v333_v55, %v332_v53 }
  0xef   :  { %350 = vst [vmem:[%s602_s3] sm:$0xff] %v398_v58  ;;  %351 = vst [vmem:[%s602_s3 + $0x8] sm:$0xff] %v399_v59 }

// kernel: encoder_forward.73
= control target key start
LH: loop header
LB: loop body
LE: loop exit
PB: predicated region body
PF: predicated region fallthrough
CT: control target
= control target key end

     0   :  { %v206_v1 = vmov 0   ;;  %vm70_vm0 = vcmask 261120   ;;  %s263_s1 = inlined_call_operand.vmem [shape: bf16[32,512], index: 1, kind: input, shape index: {}]   ;;  %s264_s2 = inlined_call_operand.vmem [shape: f32[8,1], index: 2, kind: input, shape index: {}]   ;;  %s265_s0 = inlined_call_operand.vmem [shape: bf16[8,32], index: 0, kind: input, shape index: {}]   ;;  %s266_s3 = inlined_call_operand.vmem [shape: bf16[8,512], index: 3, kind: output, shape index: {}]  }
   0x1   :  { %v194_v0 = vld [vmem:[%s263_s1 + $0x24] ss:$16 sps:$4 sm:$0xff]   ;;  %106 = vmatprep.mubr.bf16.mxu0 %v206_v1  ;;  %147 = vmatprep.mubr.bf16.mxu1 %v206_v1  ;;  %v196_v2 = vld [vmem:[%s263_s1 + $0x2c] ss:$16 sps:$4 sm:$0xff]   ;;  %v198_v3 = vld [vmem:[%s263_s1 + $0x20] ss:$16 sps:$4 sm:$0xff]  }
   0x2   :  { %193 = vset.pattern.permute.xlu0 %v206_v1  ;;  %86 = vmatprep.subr.bf16.mxu0 %v194_v0  ;;  %v199_v4 = vld [vmem:[%s263_s1 + $0x28] ss:$16 sps:$4 sm:$0xff]   ;;  %v200_v5 = vld [vmem:[%s263_s1 + $0x4] ss:$16 sps:$4 sm:$0xff]   ;;  %v202_v6 = vld [vmem:[%s263_s1 + $0xc] ss:$16 sps:$4 sm:$0xff]  }
   0x3   :  { %127 = vmatprep.subr.bf16.mxu1 %v196_v2  ;;  %87 = vmatpush1.bf16.msra.mxu0 %v198_v3  ;;  %v204_v7 = vld [vmem:[%s263_s1] ss:$16 sps:$4 sm:$0xff]   ;;  %v205_v8 = vld [vmem:[%s263_s1 + $0x8] ss:$16 sps:$4 sm:$0xff]  }
   0x4   :  { %128 = vmatpush1.bf16.msra.mxu1 %v199_v4  ;;  %88 = vmatprep.subr.bf16.mxu0 %v200_v5  ;;  %v24_v9 = vld [vmem:[%s264_s2] sm:$0xff] }
   0x5   :  { %129 = vmatprep.subr.bf16.mxu1 %v202_v6  ;;  %27 = vperm.xlu0 %193, %v24_v9   ;;  %v15_v10 = vld [vmem:[%s265_s0] sm:$0xf] }
   0x7   :  { %89 = vmatpush1.bf16.msra.mxu0 %v204_v7 }
   0x8   :  { %130 = vmatpush1.bf16.msra.mxu1 %v205_v8 }
   0xa   :  { %186 = vmatmul.mubr.msk.bf16.vlgmr.msra.gmra.mxu0 %vm70_vm0, %v15_v10 }
   0xb   :  { %187 = vmatmul.mubr.msk.bf16.vlgmr.msra.gmra.mxu1 %vm70_vm0, %v15_v10 }
  0x80   :  { %v28_v11 = vpop.permute.xlu0 %27 }
  0xca   :  { %v108_v12 = vpop.f32.mrf.mxu0 }
  0xcb   :  { %v149_v13 = vpop.f32.mrf.mxu1  ;;  %v109_v16 = vadd.f32 %v108_v12, %v28_v11 }
  0xcc   :  { %v110_v14 = vpop.f32.mrf.mxu0  ;;  %v150_v17 = vadd.f32 %v149_v13, %v28_v11 }
  0xcd   :  { %v151_v15 = vpop.f32.mrf.mxu1  ;;  %v111_v18 = vadd.f32 %v110_v14, %v28_v11 }
  0xce   :  { %v152_v19 = vadd.f32 %v151_v15, %v28_v11  ;;  %v112_v20 = vpop.f32.mrf.mxu0 }
  0xcf   :  { %v153_v21 = vpop.f32.mrf.mxu1  ;;  %v190_v22 = vpack.c.bf16 %v111_v18, %v109_v16 }
  0xd0   :  { %v191_v23 = vpack.c.bf16 %v152_v19, %v150_v17  ;;  %v113_v24 = vpop.f32.mrf.mxu0 }
  0xd1   :  { %v154_v25 = vpop.f32.mrf.mxu1  ;;  %172 = vst [vmem:[%s266_s3] sm:$0xff] %v190_v22 }
  0xd2   :  { %173 = vst [vmem:[%s266_s3 + $0x8] sm:$0xff] %v191_v23 }

// kernel: encoder_forward.72
= control target key start
LH: loop header
LB: loop body
LE: loop exit
PB: predicated region body
PF: predicated region fallthrough
CT: control target
= control target key end

     0   :  { %v628_v1 = vmov 0   ;;  %vm364_vm0 = vcmask 785408   ;;  %s829_s1 = inlined_call_operand.vmem [shape: bf16[224,512], index: 1, kind: input, shape index: {}]   ;;  %s830_s0 = inlined_call_operand.vmem [shape: bf16[8,224], index: 0, kind: input, shape index: {}]   ;;  %s831_s2 = inlined_call_operand.vmem [shape: f32[8,1], index: 2, kind: input, shape index: {}]   ;;  %s832_s3 = inlined_call_operand.vmem [shape: bf16[8,512], index: 3, kind: output, shape index: {}]  }
   0x1   :  { %v542_v0 = vld [vmem:[%s829_s1 + $0xe4] ss:$16 sps:$4 sm:$0xff]   ;;  %541 = vset.pattern.permute.xlu0 %v628_v1  ;;  %v544_v2 = vld [vmem:[%s829_s1 + $0xec] ss:$16 sps:$4 sm:$0xff]   ;;  %v546_v3 = vld [vmem:[%s829_s1 + $0xe0] ss:$16 sps:$4 sm:$0xff]  }
   0x2   :  { %368 = vmatprep.subr.bf16.mxu0 %v542_v0  ;;  %v547_v4 = vld [vmem:[%s829_s1 + $0xe8] ss:$16 sps:$4 sm:$0xff]   ;;  %409 = vmatprep.subr.bf16.mxu1 %v544_v2  ;;  %v548_v5 = vld [vmem:[%s829_s1 + $0xc4] ss:$16 sps:$4 sm:$0xff]   ;;  %v550_v6 = vld [vmem:[%s829_s1 + $0xcc] ss:$16 sps:$4 sm:$0xff]  }
   0x3   :  { %369 = vmatpush1.bf16.msra.mxu0 %v546_v3  ;;  %410 = vmatpush1.bf16.msra.mxu1 %v547_v4  ;;  %v552_v7 = vld [vmem:[%s829_s1 + $0xc0] ss:$16 sps:$4 sm:$0xff]   ;;  %v553_v8 = vld [vmem:[%s829_s1 + $0xc8] ss:$16 sps:$4 sm:$0xff]   ;;  %v554_v9 = vld [vmem:[%s829_s1 + $0xa4] ss:$16 sps:$4 sm:$0xff]  }
   0x4   :  { %370 = vmatprep.subr.bf16.mxu0 %v548_v5  ;;  %411 = vmatprep.subr.bf16.mxu1 %v550_v6  ;;  %v556_v10 = vld [vmem:[%s829_s1 + $0xac] ss:$16 sps:$4 sm:$0xff]   ;;  %v558_v11 = vld [vmem:[%s829_s1 + $0xa0] ss:$16 sps:$4 sm:$0xff]   ;;  %v559_v12 = vld [vmem:[%s829_s1 + $0xa8] ss:$16 sps:$4 sm:$0xff]  }
   0x5   :  { %v560_v13 = vld [vmem:[%s829_s1 + $0x84] ss:$16 sps:$4 sm:$0xff]   ;;  %v562_v14 = vld [vmem:[%s829_s1 + $0x8c] ss:$16 sps:$4 sm:$0xff]   ;;  %v564_v15 = vld [vmem:[%s829_s1 + $0x80] ss:$16 sps:$4 sm:$0xff]  }
   0x6   :  { %v565_v16 = vld [vmem:[%s829_s1 + $0x88] ss:$16 sps:$4 sm:$0xff]   ;;  %v566_v17 = vld [vmem:[%s829_s1 + $0x64] ss:$16 sps:$4 sm:$0xff]   ;;  %v568_v18 = vld [vmem:[%s829_s1 + $0x6c] ss:$16 sps:$4 sm:$0xff]  }
   0x7   :  { %371 = vmatpush1.bf16.msra.mxu0 %v552_v7  ;;  %412 = vmatpush1.bf16.msra.mxu1 %v553_v8  ;;  %v570_v19 = vld [vmem:[%s829_s1 + $0x60] ss:$16 sps:$4 sm:$0xff]   ;;  %v571_v20 = vld [vmem:[%s829_s1 + $0x68] ss:$16 sps:$4 sm:$0xff]   ;;  %v572_v21 = vld [vmem:[%s829_s1 + $0x44] ss:$16 sps:$4 sm:$0xff]  }
   0x8   :  { %372 = vmatprep.subr.bf16.mxu0 %v554_v9  ;;  %413 = vmatprep.subr.bf16.mxu1 %v556_v10  ;;  %v574_v22 = vld [vmem:[%s829_s1 + $0x4c] ss:$16 sps:$4 sm:$0xff]   ;;  %v576_v23 = vld [vmem:[%s829_s1 + $0x40] ss:$16 sps:$4 sm:$0xff]   ;;  %v577_v24 = vld [vmem:[%s829_s1 + $0x48] ss:$16 sps:$4 sm:$0xff]  }
   0x9   :  { %v578_v25 = vld [vmem:[%s829_s1 + $0x24] ss:$16 sps:$4 sm:$0xff]   ;;  %v580_v26 = vld [vmem:[%s829_s1 + $0x2c] ss:$16 sps:$4 sm:$0xff]   ;;  %v582_v27 = vld [vmem:[%s829_s1 + $0x20] ss:$16 sps:$4 sm:$0xff]  }
   0xa   :  { %v583_v28 = vld [vmem:[%s829_s1 + $0x28] ss:$16 sps:$4 sm:$0xff]   ;;  %v584_v29 = vld [vmem:[%s829_s1 + $0x4] ss:$16 sps:$4 sm:$0xff]   ;;  %v586_v30 = vld [vmem:[%s829_s1 + $0xc] ss:$16 sps:$4 sm:$0xff]  }
   0xb   :  { %373 = vmatpush1.bf16.msra.mxu0 %v558_v11  ;;  %414 = vmatpush1.bf16.msra.mxu1 %v559_v12  ;;  %v588_v31 = vld [vmem:[%s829_s1] ss:$16 sps:$4 sm:$0xff]   ;;  %v589_v32 = vld [vmem:[%s829_s1 + $0x8] ss:$16 sps:$4 sm:$0xff]   ;;  %v590_v33 = vld [vmem:[%s829_s1 + $0x1a4] ss:$16 sps:$4 sm:$0xff]  }
   0xc   :  { %374 = vmatprep.subr.bf16.mxu0 %v560_v13  ;;  %415 = vmatprep.subr.bf16.mxu1 %v562_v14  ;;  %v592_v34 = vld [vmem:[%s829_s1 + $0x1ac] ss:$16 sps:$4 sm:$0xff]   ;;  %v594_v35 = vld [vmem:[%s829_s1 + $0x1a0] ss:$16 sps:$4 sm:$0xff]   ;;  %v595_v36 = vld [vmem:[%s829_s1 + $0x1a8] ss:$16 sps:$4 sm:$0xff]  }
   0xd   :  { %v596_v37 = vld [vmem:[%s829_s1 + $0x184] ss:$16 sps:$4 sm:$0xff]   ;;  %v598_v38 = vld [vmem:[%s829_s1 + $0x18c] ss:$16 sps:$4 sm:$0xff]   ;;  %v600_v39 = vld [vmem:[%s829_s1 + $0x180] ss:$16 sps:$4 sm:$0xff]  }
   0xe   :  { %v601_v40 = vld [vmem:[%s829_s1 + $0x188] ss:$16 sps:$4 sm:$0xff]   ;;  %v602_v41 = vld [vmem:[%s829_s1 + $0x164] ss:$16 sps:$4 sm:$0xff]   ;;  %v604_v42 = vld [vmem:[%s829_s1 + $0x16c] ss:$16 sps:$4 sm:$0xff]  }
   0xf   :  { %375 = vmatpush1.bf16.msra.mxu0 %v564_v15  ;;  %416 = vmatpush1.bf16.msra.mxu1 %v565_v16  ;;  %v15_v43 = vld [vmem:[%s830_s0] sm:$0xff]  ;;  %v607_v47 = vld [vmem:[%s829_s1 + $0x168] ss:$16 sps:$4 sm:$0xff]   ;;  %v610_v49 = vld [vmem:[%s829_s1 + $0x14c] ss:$16 sps:$4 sm:$0xff]  }
  0x10   :  { %376 = vmatprep.subr.bf16.mxu0 %v566_v17  ;;  %417 = vmatprep.subr.bf16.mxu1 %v568_v18  ;;  %v72_v44 = vld [vmem:[%s831_s2] sm:$0xff]  ;;  %v477_v45 = vcombine.high %v15_v43, %v15_v43  ;;  %v613_v51 = vld [vmem:[%s829_s1 + $0x148] ss:$16 sps:$4 sm:$0xff]   ;;  %v616_v53 = vld [vmem:[%s829_s1 + $0x12c] ss:$16 sps:$4 sm:$0xff]   ;;  %v476_v60 = vcombine.low %v15_v43, %v15_v43 }
  0x11   :  { %75 = vperm.xlu0 %541, %v72_v44   ;;  %v606_v46 = vld [vmem:[%s829_s1 + $0x160] ss:$16 sps:$4 sm:$0xff]   ;;  %v608_v48 = vld [vmem:[%s829_s1 + $0x144] ss:$16 sps:$4 sm:$0xff]   ;;  %v619_v55 = vld [vmem:[%s829_s1 + $0x128] ss:$16 sps:$4 sm:$0xff]  }
  0x12   :  { %534 = vmatprep.mubr.msk.bf16.mxu0 %vm364_vm0, %v477_v45  ;;  %535 = vmatprep.mubr.msk.bf16.mxu1 %vm364_vm0, %v477_v45  ;;  %v612_v50 = vld [vmem:[%s829_s1 + $0x140] ss:$16 sps:$4 sm:$0xff]   ;;  %v614_v52 = vld [vmem:[%s829_s1 + $0x124] ss:$16 sps:$4 sm:$0xff]   ;;  %v622_v57 = vld [vmem:[%s829_s1 + $0x10c] ss:$16 sps:$4 sm:$0xff]  }
  0x13   :  { %377 = vmatpush1.bf16.msra.mxu0 %v570_v19  ;;  %418 = vmatpush1.bf16.msra.mxu1 %v571_v20  ;;  %v618_v54 = vld [vmem:[%s829_s1 + $0x120] ss:$16 sps:$4 sm:$0xff]   ;;  %v620_v56 = vld [vmem:[%s829_s1 + $0x104] ss:$16 sps:$4 sm:$0xff]   ;;  %v625_v59 = vld [vmem:[%s829_s1 + $0x108] ss:$16 sps:$4 sm:$0xff]  }
  0x14   :  { %378 = vmatprep.subr.bf16.mxu0 %v572_v21  ;;  %419 = vmatprep.subr.bf16.mxu1 %v574_v22  ;;  %v624_v58 = vld [vmem:[%s829_s1 + $0x100] ss:$16 sps:$4 sm:$0xff]  }
  0x17   :  { %379 = vmatpush1.bf16.msra.mxu0 %v576_v23  ;;  %420 = vmatpush1.bf16.msra.mxu1 %v577_v24 }
  0x18   :  { %380 = vmatprep.subr.bf16.mxu0 %v578_v25  ;;  %421 = vmatprep.subr.bf16.mxu1 %v580_v26 }
  0x1b   :  { %381 = vmatpush1.bf16.msra.mxu0 %v582_v27  ;;  %422 = vmatpush1.bf16.msra.mxu1 %v583_v28 }
  0x1c   :  { %382 = vmatprep.subr.bf16.mxu0 %v584_v29  ;;  %423 = vmatprep.subr.bf16.mxu1 %v586_v30 }
  0x1f   :  { %383 = vmatpush1.bf16.msra.mxu0 %v588_v31  ;;  %424 = vmatpush1.bf16.msra.mxu1 %v589_v32 }
  0x20   :  { %388 = vmatprep.subr.bf16.mxu0 %v590_v33  ;;  %429 = vmatprep.subr.bf16.mxu1 %v592_v34 }
  0x23   :  { %389 = vmatpush2.bf16.msra.mxu0 %v594_v35  ;;  %430 = vmatpush2.bf16.msra.mxu1 %v595_v36 }
  0x24   :  { %390 = vmatprep.subr.bf16.mxu0 %v596_v37  ;;  %431 = vmatprep.subr.bf16.mxu1 %v598_v38 }
  0x27   :  { %391 = vmatpush2.bf16.msra.mxu0 %v600_v39  ;;  %432 = vmatpush2.bf16.msra.mxu1 %v601_v40 }
  0x28   :  { %392 = vmatprep.subr.bf16.mxu0 %v602_v41  ;;  %433 = vmatprep.subr.bf16.mxu1 %v604_v42 }
  0x2b   :  { %393 = vmatpush2.bf16.msra.mxu0 %v606_v46  ;;  %434 = vmatpush2.bf16.msra.mxu1 %v607_v47 }
  0x2c   :  { %394 = vmatprep.subr.bf16.mxu0 %v608_v48  ;;  %435 = vmatprep.subr.bf16.mxu1 %v610_v49 }
  0x2f   :  { %395 = vmatpush2.bf16.msra.mxu0 %v612_v50  ;;  %436 = vmatpush2.bf16.msra.mxu1 %v613_v51 }
  0x30   :  { %396 = vmatprep.subr.bf16.mxu0 %v614_v52  ;;  %437 = vmatprep.subr.bf16.mxu1 %v616_v53 }
  0x33   :  { %397 = vmatpush2.bf16.msra.mxu0 %v618_v54  ;;  %438 = vmatpush2.bf16.msra.mxu1 %v619_v55 }
  0x34   :  { %398 = vmatprep.subr.bf16.mxu0 %v620_v56  ;;  %439 = vmatprep.subr.bf16.mxu1 %v622_v57 }
  0x37   :  { %399 = vmatpush2.bf16.msra.mxu0 %v624_v58  ;;  %440 = vmatpush2.bf16.msra.mxu1 %v625_v59 }
  0x3a   :  { %401 = vmatmul.mubr.bf16.vlgmr.msra.gmra.mxu0 %v476_v60  ;;  %442 = vmatmul.mubr.bf16.vlgmr.msra.gmra.mxu1 %v476_v60 }
  0x8c   :  { %v76_v61 = vpop.permute.xlu0 %75 }
  0xfa   :  { %v402_v62 = vpop.f32.mrf.mxu0  ;;  %v443_v63 = vpop.f32.mrf.mxu1 }
  0xfb   :  { %v403_v0 = vadd.f32 %v402_v62, %v76_v61  ;;  %v444_v1 = vadd.f32 %v443_v63, %v76_v61 }
  0xfc   :  { %v404_v2 = vpop.f32.mrf.mxu0  ;;  %v445_v3 = vpop.f32.mrf.mxu1 }
  0xfd   :  { %v405_v4 = vadd.f32 %v404_v2, %v76_v61  ;;  %v446_v5 = vadd.f32 %v445_v3, %v76_v61  ;;  %v450_v8 = vmax.f32 %v403_v0, 0.0  ;;  %v452_v9 = vmax.f32 %v444_v1, 0.0 }
  0xfe   :  { %v406_v6 = vpop.f32.mrf.mxu0  ;;  %v447_v7 = vpop.f32.mrf.mxu1 }
  0xff   :  { %v451_v10 = vmax.f32 %v405_v4, 0.0  ;;  %v453_v11 = vmax.f32 %v446_v5, 0.0 }
 0x100   :  { %v407_v12 = vpop.f32.mrf.mxu0  ;;  %v448_v13 = vpop.f32.mrf.mxu1 }
 0x101   :  { %v538_v14 = vpack.c.bf16 %v451_v10, %v450_v8  ;;  %v539_v15 = vpack.c.bf16 %v453_v11, %v452_v9 }
 0x103   :  { %470 = vst [vmem:[%s832_s3] sm:$0xff] %v538_v14  ;;  %471 = vst [vmem:[%s832_s3 + $0x8] sm:$0xff] %v539_v15 }

// kernel: encoder_forward.77
= control target key start
LH: loop header
LB: loop body
LE: loop exit
PB: predicated region body
PF: predicated region fallthrough
CT: control target
= control target key end

     0   :  { %v853_v1 = vmov 0   ;;  %vm465_vm0 = vcmask 261120   ;;  %s1114_s1 = inlined_call_operand.vmem [shape: bf16[288,512], index: 1, kind: input, shape index: {}]   ;;  %s1115_s0 = inlined_call_operand.vmem [shape: bf16[8,288], index: 0, kind: input, shape index: {}]   ;;  %s1116_s2 = inlined_call_operand.vmem [shape: f32[8,1], index: 2, kind: input, shape index: {}]   ;;  %s1117_s3 = inlined_call_operand.vmem [shape: bf16[8,512], index: 3, kind: output, shape index: {}]  }
   0x1   :  { %v742_v0 = vld [vmem:[%s1114_s1 + $0xe4] ss:$16 sps:$4 sm:$0xff]   ;;  %542 = vmatprep.mubr.bf16.mxu1 %v853_v1  ;;  %741 = vset.pattern.permute.xlu0 %v853_v1  ;;  %v746_v3 = vld [vmem:[%s1114_s1 + $0xe0] ss:$16 sps:$4 sm:$0xff]   ;;  %v906_v10 = vld [vmem:[%s1115_s0 + $0x8] ss:$0 sps:$4 sm:$0xff]  }
   0x2   :  { %v744_v2 = vld [vmem:[%s1114_s1 + $0x224] ss:$16 sps:$4 sm:$0xff]   ;;  %469 = vmatprep.subr.bf16.mxu0 %v742_v0  ;;  %v747_v4 = vld [vmem:[%s1114_s1 + $0x220] ss:$16 sps:$4 sm:$0xff]   ;;  %v757_v11 = vld [vmem:[%s1114_s1 + $0xe8] ss:$16 sps:$4 sm:$0xff]  }
   0x3   :  { %522 = vmatprep.subr.bf16.mxu1 %v744_v2  ;;  %v748_v5 = vld [vmem:[%s1114_s1 + $0xc4] ss:$16 sps:$4 sm:$0xff]   ;;  %470 = vmatpush1.bf16.msra.mxu0 %v746_v3  ;;  %v752_v7 = vld [vmem:[%s1114_s1 + $0xc0] ss:$16 sps:$4 sm:$0xff]   ;;  %v759_v12 = vld [vmem:[%s1114_s1 + $0xec] ss:$16 sps:$4 sm:$0xff]  }
   0x4   :  { %523 = vmatpush1.bf16.msra.mxu1 %v747_v4  ;;  %v750_v6 = vld [vmem:[%s1114_s1 + $0x204] ss:$16 sps:$4 sm:$0xff]   ;;  %471 = vmatprep.subr.bf16.mxu0 %v748_v5  ;;  %v753_v8 = vld [vmem:[%s1114_s1 + $0x200] ss:$16 sps:$4 sm:$0xff]   ;;  %v765_v15 = vld [vmem:[%s1114_s1 + $0xcc] ss:$16 sps:$4 sm:$0xff]  }
   0x5   :  { %524 = vmatprep.subr.bf16.mxu1 %v750_v6  ;;  %v754_v9 = vld [vmem:[%s1114_s1 + $0xa4] ss:$16 sps:$4 sm:$0xff]   ;;  %v760_v13 = vld [vmem:[%s1114_s1 + $0xa0] ss:$16 sps:$4 sm:$0xff]   ;;  %v763_v16 = vld [vmem:[%s1114_s1 + $0xc8] ss:$16 sps:$4 sm:$0xff]  }
   0x6   :  { %v761_v14 = vld [vmem:[%s1114_s1 + $0x84] ss:$16 sps:$4 sm:$0xff]   ;;  %v766_v17 = vld [vmem:[%s1114_s1 + $0x80] ss:$16 sps:$4 sm:$0xff]   ;;  %v771_v19 = vld [vmem:[%s1114_s1 + $0xac] ss:$16 sps:$4 sm:$0xff]  }
   0x7   :  { %472 = vmatpush1.bf16.msra.mxu0 %v752_v7  ;;  %v767_v18 = vld [vmem:[%s1114_s1 + $0x64] ss:$16 sps:$4 sm:$0xff]   ;;  %v769_v20 = vld [vmem:[%s1114_s1 + $0xa8] ss:$16 sps:$4 sm:$0xff]   ;;  %v772_v21 = vld [vmem:[%s1114_s1 + $0x60] ss:$16 sps:$4 sm:$0xff]  }
   0x8   :  { %525 = vmatpush1.bf16.msra.mxu1 %v753_v8  ;;  %473 = vmatprep.subr.bf16.mxu0 %v754_v9  ;;  %v773_v22 = vld [vmem:[%s1114_s1 + $0x44] ss:$16 sps:$4 sm:$0xff]   ;;  %v777_v23 = vld [vmem:[%s1114_s1 + $0x8c] ss:$16 sps:$4 sm:$0xff]   ;;  %v775_v24 = vld [vmem:[%s1114_s1 + $0x88] ss:$16 sps:$4 sm:$0xff]  }
   0x9   :  { %551 = vmatprep.subr.bf16.mxu1 %v759_v12  ;;  %v778_v25 = vld [vmem:[%s1114_s1 + $0x40] ss:$16 sps:$4 sm:$0xff]   ;;  %v779_v26 = vld [vmem:[%s1114_s1 + $0x24] ss:$16 sps:$4 sm:$0xff]   ;;  %v783_v27 = vld [vmem:[%s1114_s1 + $0x6c] ss:$16 sps:$4 sm:$0xff]  }
   0xa   :  { %v781_v28 = vld [vmem:[%s1114_s1 + $0x68] ss:$16 sps:$4 sm:$0xff]   ;;  %v784_v29 = vld [vmem:[%s1114_s1 + $0x20] ss:$16 sps:$4 sm:$0xff]   ;;  %v785_v30 = vld [vmem:[%s1114_s1 + $0x4] ss:$16 sps:$4 sm:$0xff]  }
   0xb   :  { %734 = vmatmul.mubr.msk.bf16.vlgmr.msra.gmra.mxu1 %vm465_vm0, %v906_v10  ;;  %474 = vmatpush1.bf16.msra.mxu0 %v760_v13  ;;  %v789_v31 = vld [vmem:[%s1114_s1 + $0x4c] ss:$16 sps:$4 sm:$0xff]   ;;  %v787_v32 = vld [vmem:[%s1114_s1 + $0x48] ss:$16 sps:$4 sm:$0xff]   ;;  %v790_v33 = vld [vmem:[%s1114_s1] ss:$16 sps:$4 sm:$0xff]  }
   0xc   :  { %552 = vmatpush1.bf16.msra.mxu1 %v757_v11  ;;  %475 = vmatprep.subr.bf16.mxu0 %v761_v14  ;;  %v791_v34 = vld [vmem:[%s1114_s1 + $0x1e4] ss:$16 sps:$4 sm:$0xff]   ;;  %v795_v35 = vld [vmem:[%s1114_s1 + $0x2c] ss:$16 sps:$4 sm:$0xff]   ;;  %v793_v36 = vld [vmem:[%s1114_s1 + $0x28] ss:$16 sps:$4 sm:$0xff]  }
   0xd   :  { %553 = vmatprep.subr.bf16.mxu1 %v765_v15  ;;  %v796_v37 = vld [vmem:[%s1114_s1 + $0x1e0] ss:$16 sps:$4 sm:$0xff]   ;;  %v797_v38 = vld [vmem:[%s1114_s1 + $0x1c4] ss:$16 sps:$4 sm:$0xff]   ;;  %v801_v39 = vld [vmem:[%s1114_s1 + $0xc] ss:$16 sps:$4 sm:$0xff]  }
   0xe   :  { %v799_v40 = vld [vmem:[%s1114_s1 + $0x8] ss:$16 sps:$4 sm:$0xff]   ;;  %v802_v41 = vld [vmem:[%s1114_s1 + $0x1c0] ss:$16 sps:$4 sm:$0xff]   ;;  %v803_v42 = vld [vmem:[%s1114_s1 + $0x1a4] ss:$16 sps:$4 sm:$0xff]  }
   0xf   :  { %476 = vmatpush1.bf16.msra.mxu0 %v766_v17  ;;  %v807_v43 = vld [vmem:[%s1114_s1 + $0x1ec] ss:$16 sps:$4 sm:$0xff]   ;;  %v805_v44 = vld [vmem:[%s1114_s1 + $0x1e8] ss:$16 sps:$4 sm:$0xff]   ;;  %v808_v45 = vld [vmem:[%s1114_s1 + $0x1a0] ss:$16 sps:$4 sm:$0xff]  }
  0x10   :  { %554 = vmatpush1.bf16.msra.mxu1 %v763_v16  ;;  %477 = vmatprep.subr.bf16.mxu0 %v767_v18  ;;  %v809_v46 = vld [vmem:[%s1114_s1 + $0x184] ss:$16 sps:$4 sm:$0xff]   ;;  %v813_v47 = vld [vmem:[%s1114_s1 + $0x1cc] ss:$16 sps:$4 sm:$0xff]   ;;  %v811_v48 = vld [vmem:[%s1114_s1 + $0x1c8] ss:$16 sps:$4 sm:$0xff]  }
  0x11   :  { %555 = vmatprep.subr.bf16.mxu1 %v771_v19  ;;  %v15_v49 = vld [vmem:[%s1115_s0] sm:$0xff]  ;;  %v819_v53 = vld [vmem:[%s1114_s1 + $0x1ac] ss:$16 sps:$4 sm:$0xff]   ;;  %v817_v54 = vld [vmem:[%s1114_s1 + $0x1a8] ss:$16 sps:$4 sm:$0xff]  }
  0x12   :  { %v814_v50 = vld [vmem:[%s1114_s1 + $0x180] ss:$16 sps:$4 sm:$0xff]   ;;  %v815_v51 = vld [vmem:[%s1114_s1 + $0x164] ss:$16 sps:$4 sm:$0xff]   ;;  %v660_v52 = vcombine.high %v15_v49, %v15_v49  ;;  %v825_v57 = vld [vmem:[%s1114_s1 + $0x18c] ss:$16 sps:$4 sm:$0xff]   ;;  %v659_v8 = vcombine.low %v15_v49, %v15_v49 }
  0x13   :  { %478 = vmatpush1.bf16.msra.mxu0 %v772_v21  ;;  %v820_v55 = vld [vmem:[%s1114_s1 + $0x160] ss:$16 sps:$4 sm:$0xff]   ;;  %v821_v56 = vld [vmem:[%s1114_s1 + $0x144] ss:$16 sps:$4 sm:$0xff]   ;;  %v823_v59 = vld [vmem:[%s1114_s1 + $0x188] ss:$16 sps:$4 sm:$0xff]  }
  0x14   :  { %556 = vmatpush1.bf16.msra.mxu1 %v769_v20  ;;  %479 = vmatprep.subr.bf16.mxu0 %v773_v22  ;;  %v89_v58 = vld [vmem:[%s1116_s2] sm:$0xff]  ;;  %v831_v62 = vld [vmem:[%s1114_s1 + $0x16c] ss:$16 sps:$4 sm:$0xff]   ;;  %v829_v63 = vld [vmem:[%s1114_s1 + $0x168] ss:$16 sps:$4 sm:$0xff]  }
  0x15   :  { %557 = vmatprep.subr.bf16.mxu1 %v777_v23  ;;  %501 = vmatprep.mubr.bf16.mxu0 %v660_v52  ;;  %v826_v60 = vld [vmem:[%s1114_s1 + $0x140] ss:$16 sps:$4 sm:$0xff]   ;;  %v827_v61 = vld [vmem:[%s1114_s1 + $0x124] ss:$16 sps:$4 sm:$0xff]   ;;  %v837_v3 = vld [vmem:[%s1114_s1 + $0x14c] ss:$16 sps:$4 sm:$0xff]  }
  0x16   :  { %583 = vmatprep.mubr.bf16.mxu1 %v660_v52  ;;  %92 = vperm.xlu0 %741, %v89_v58   ;;  %v832_v0 = vld [vmem:[%s1114_s1 + $0x120] ss:$16 sps:$4 sm:$0xff]   ;;  %v833_v2 = vld [vmem:[%s1114_s1 + $0x104] ss:$16 sps:$4 sm:$0xff]   ;;  %v835_v4 = vld [vmem:[%s1114_s1 + $0x148] ss:$16 sps:$4 sm:$0xff]  }
  0x17   :  { %480 = vmatpush1.bf16.msra.mxu0 %v778_v25  ;;  %v838_v5 = vld [vmem:[%s1114_s1 + $0x100] ss:$16 sps:$4 sm:$0xff]   ;;  %v843_v6 = vld [vmem:[%s1114_s1 + $0x12c] ss:$16 sps:$4 sm:$0xff]   ;;  %v841_v9 = vld [vmem:[%s1114_s1 + $0x128] ss:$16 sps:$4 sm:$0xff]  }
  0x18   :  { %558 = vmatpush1.bf16.msra.mxu1 %v775_v24  ;;  %481 = vmatprep.subr.bf16.mxu0 %v779_v26  ;;  %v846_v7 = vld [vmem:[%s1114_s1 + $0x22c] ss:$16 sps:$4 sm:$0xff]   ;;  %v844_v11 = vld [vmem:[%s1114_s1 + $0x228] ss:$16 sps:$4 sm:$0xff]  }
  0x19   :  { %559 = vmatprep.subr.bf16.mxu1 %v783_v27  ;;  %v849_v12 = vld [vmem:[%s1114_s1 + $0x10c] ss:$16 sps:$4 sm:$0xff]   ;;  %v847_v14 = vld [vmem:[%s1114_s1 + $0x108] ss:$16 sps:$4 sm:$0xff]  }
  0x1a   :  { %v852_v13 = vld [vmem:[%s1114_s1 + $0x20c] ss:$16 sps:$4 sm:$0xff]   ;;  %v850_v15 = vld [vmem:[%s1114_s1 + $0x208] ss:$16 sps:$4 sm:$0xff]  }
  0x1b   :  { %482 = vmatpush1.bf16.msra.mxu0 %v784_v29 }
  0x1c   :  { %560 = vmatpush1.bf16.msra.mxu1 %v781_v28  ;;  %483 = vmatprep.subr.bf16.mxu0 %v785_v30 }
  0x1d   :  { %561 = vmatprep.subr.bf16.mxu1 %v789_v31 }
  0x1f   :  { %484 = vmatpush1.bf16.msra.mxu0 %v790_v33 }
  0x20   :  { %562 = vmatpush1.bf16.msra.mxu1 %v787_v32  ;;  %485 = vmatprep.subr.bf16.mxu0 %v791_v34 }
  0x21   :  { %563 = vmatprep.subr.bf16.mxu1 %v795_v35 }
  0x23   :  { %486 = vmatpush2.bf16.msra.mxu0 %v796_v37 }
  0x24   :  { %564 = vmatpush1.bf16.msra.mxu1 %v793_v36  ;;  %487 = vmatprep.subr.bf16.mxu0 %v797_v38 }
  0x25   :  { %565 = vmatprep.subr.bf16.mxu1 %v801_v39 }
  0x27   :  { %488 = vmatpush2.bf16.msra.mxu0 %v802_v41 }
  0x28   :  { %566 = vmatpush1.bf16.msra.mxu1 %v799_v40  ;;  %489 = vmatprep.subr.bf16.mxu0 %v803_v42 }
  0x29   :  { %567 = vmatprep.subr.bf16.mxu1 %v807_v43 }
  0x2b   :  { %490 = vmatpush2.bf16.msra.mxu0 %v808_v45 }
  0x2c   :  { %568 = vmatpush2.bf16.msra.mxu1 %v805_v44  ;;  %491 = vmatprep.subr.bf16.mxu0 %v809_v46 }
  0x2d   :  { %569 = vmatprep.subr.bf16.mxu1 %v813_v47 }
  0x2f   :  { %492 = vmatpush2.bf16.msra.mxu0 %v814_v50 }
  0x30   :  { %570 = vmatpush2.bf16.msra.mxu1 %v811_v48  ;;  %493 = vmatprep.subr.bf16.mxu0 %v815_v51 }
  0x31   :  { %571 = vmatprep.subr.bf16.mxu1 %v819_v53 }
  0x33   :  { %494 = vmatpush2.bf16.msra.mxu0 %v820_v55 }
  0x34   :  { %572 = vmatpush2.bf16.msra.mxu1 %v817_v54  ;;  %495 = vmatprep.subr.bf16.mxu0 %v821_v56 }
  0x35   :  { %573 = vmatprep.subr.bf16.mxu1 %v825_v57 }
  0x37   :  { %496 = vmatpush2.bf16.msra.mxu0 %v826_v60 }
  0x38   :  { %574 = vmatpush2.bf16.msra.mxu1 %v823_v59  ;;  %497 = vmatprep.subr.bf16.mxu0 %v827_v61 }
  0x39   :  { %575 = vmatprep.subr.bf16.mxu1 %v831_v62 }
  0x3b   :  { %498 = vmatpush2.bf16.msra.mxu0 %v832_v0 }
  0x3c   :  { %576 = vmatpush2.bf16.msra.mxu1 %v829_v63  ;;  %499 = vmatprep.subr.bf16.mxu0 %v833_v2 }
  0x3d   :  { %577 = vmatprep.subr.bf16.mxu1 %v837_v3 }
  0x3f   :  { %500 = vmatpush2.bf16.msra.mxu0 %v838_v5 }
  0x40   :  { %578 = vmatpush2.bf16.msra.mxu1 %v835_v4  ;;  %604 = vmatprep.subr.bf16.mxu0 %v846_v7 }
  0x41   :  { %579 = vmatprep.subr.bf16.mxu1 %v843_v6 }
  0x42   :  { %502 = vmatmul.mubr.bf16.vlgmr.msra.gmra.mxu0 %v659_v8 }
  0x43   :  { %605 = vmatpush1.bf16.msra.mxu0 %v844_v11  ;;  %624 = vmatprep.mubr.bf16.mxu0 %v853_v1 }
  0x44   :  { %580 = vmatpush2.bf16.msra.mxu1 %v841_v9  ;;  %606 = vmatprep.subr.bf16.mxu0 %v852_v13 }
  0x45   :  { %581 = vmatprep.subr.bf16.mxu1 %v849_v12 }
  0x47   :  { %607 = vmatpush1.bf16.msra.mxu0 %v850_v15 }
  0x48   :  { %582 = vmatpush2.bf16.msra.mxu1 %v847_v14 }
  0x4a   :  { %735 = vmatmul.mubr.msk.bf16.vlgmr.msra.gmra.mxu0 %vm465_vm0, %v906_v10 }
  0x4b   :  { %584 = vmatmul.mubr.bf16.vlgmr.msra.gmra.mxu1 %v659_v8 }
  0x91   :  { %v93_v20 = vpop.permute.xlu0 %92 }
  0xcb   :  { %v544_v16 = vpop.f32.mrf.mxu1 }
  0xcd   :  { %v546_v17 = vpop.f32.mrf.mxu1 }
  0xcf   :  { %v548_v18 = vpop.f32.mrf.mxu1 }
  0xd1   :  { %v549_v19 = vpop.f32.mrf.mxu1 }
 0x102   :  { %v503_v21 = vpop.f32.mrf.mxu0 }
 0x103   :  { %v504_v22 = vadd.f32 %v503_v21, %v93_v20 }
 0x104   :  { %v505_v23 = vpop.f32.mrf.mxu0 }
 0x105   :  { %v545_v24 = vadd.f32 %v544_v16, %v504_v22  ;;  %v506_v25 = vadd.f32 %v505_v23, %v93_v20 }
 0x106   :  { %v507_v26 = vpop.f32.mrf.mxu0 }
 0x107   :  { %v547_v27 = vadd.f32 %v546_v17, %v506_v25  ;;  %v633_v1 = vmax.f32 %v545_v24, 0.0 }
 0x108   :  { %v508_v28 = vpop.f32.mrf.mxu0 }
 0x109   :  { %v634_v29 = vmax.f32 %v547_v27, 0.0 }
 0x10a   :  { %v626_v31 = vpop.f32.mrf.mxu0 }
 0x10b   :  { %v585_v30 = vpop.f32.mrf.mxu1  ;;  %v738_v32 = vpack.c.bf16 %v634_v29, %v633_v1 }
 0x10c   :  { %v586_v33 = vadd.f32 %v585_v30, %v93_v20  ;;  %v628_v34 = vpop.f32.mrf.mxu0 }
 0x10d   :  { %v587_v10 = vpop.f32.mrf.mxu1  ;;  %653 = vst [vmem:[%s1117_s3] sm:$0xff] %v738_v32 }
 0x10e   :  { %v627_v35 = vadd.f32 %v626_v31, %v586_v33  ;;  %v588_v36 = vadd.f32 %v587_v10, %v93_v20  ;;  %v630_v38 = vpop.f32.mrf.mxu0 }
 0x10f   :  { %v589_v37 = vpop.f32.mrf.mxu1 }
 0x110   :  { %v629_v39 = vadd.f32 %v628_v34, %v588_v36  ;;  %v631_v41 = vpop.f32.mrf.mxu0  ;;  %v635_v42 = vmax.f32 %v627_v35, 0.0 }
 0x111   :  { %v590_v40 = vpop.f32.mrf.mxu1 }
 0x112   :  { %v636_v43 = vmax.f32 %v629_v39, 0.0 }
 0x114   :  { %v739_v44 = vpack.c.bf16 %v636_v43, %v635_v42 }
 0x116   :  { %654 = vst [vmem:[%s1117_s3 + $0x8] sm:$0xff] %v739_v44 }

// kernel: encoder_forward.78
= control target key start
LH: loop header
LB: loop body
LE: loop exit
PB: predicated region body
PF: predicated region fallthrough
CT: control target
= control target key end

     0   :  { %v1023_v1 = vmov 0   ;;  %vm585_vm0 = vcmask 916480   ;;  %s1344_s1 = inlined_call_operand.vmem [shape: bf16[368,512], index: 1, kind: input, shape index: {}]   ;;  %s1345_s0 = inlined_call_operand.vmem [shape: bf16[8,368], index: 0, kind: input, shape index: {}]   ;;  %s1346_s2 = inlined_call_operand.vmem [shape: f32[8,1], index: 2, kind: input, shape index: {}]   ;;  %s1347_s3 = inlined_call_operand.vmem [shape: bf16[8,512], index: 3, kind: output, shape index: {}]  }
   0x1   :  { %v882_v0 = vld [vmem:[%s1344_s1 + $0xe4] ss:$16 sps:$4 sm:$0xff]   ;;  %662 = vmatprep.mubr.bf16.mxu1 %v1023_v1  ;;  %881 = vset.pattern.permute.xlu0 %v1023_v1  ;;  %v886_v3 = vld [vmem:[%s1344_s1 + $0xe0] ss:$16 sps:$4 sm:$0xff]   ;;  %v929_v30 = vld [vmem:[%s1344_s1 + $0xec] ss:$16 sps:$4 sm:$0xff]  }
   0x2   :  { %v884_v2 = vld [vmem:[%s1344_s1 + $0x2c4] ss:$16 sps:$4 sm:$0xff]   ;;  %589 = vmatprep.subr.bf16.mxu0 %v882_v0  ;;  %v887_v4 = vld [vmem:[%s1344_s1 + $0x2c0] ss:$16 sps:$4 sm:$0xff]   ;;  %v1139_v31 = vld [vmem:[%s1345_s0 + $0x8] ss:$0 sps:$4 sm:$0xff]  }
   0x3   :  { %632 = vmatprep.subr.bf16.mxu1 %v884_v2  ;;  %v888_v5 = vld [vmem:[%s1344_s1 + $0xc4] ss:$16 sps:$4 sm:$0xff]   ;;  %590 = vmatpush1.bf16.msra.mxu0 %v886_v3  ;;  %v892_v7 = vld [vmem:[%s1344_s1 + $0xc0] ss:$16 sps:$4 sm:$0xff]   ;;  %v927_v32 = vld [vmem:[%s1344_s1 + $0xe8] ss:$16 sps:$4 sm:$0xff]  }
   0x4   :  { %633 = vmatpush1.bf16.msra.mxu1 %v887_v4  ;;  %v890_v6 = vld [vmem:[%s1344_s1 + $0x2a4] ss:$16 sps:$4 sm:$0xff]   ;;  %591 = vmatprep.subr.bf16.mxu0 %v888_v5  ;;  %v893_v8 = vld [vmem:[%s1344_s1 + $0x2a0] ss:$16 sps:$4 sm:$0xff]   ;;  %v935_v35 = vld [vmem:[%s1344_s1 + $0xcc] ss:$16 sps:$4 sm:$0xff]  }
   0x5   :  { %634 = vmatprep.subr.bf16.mxu1 %v890_v6  ;;  %v894_v9 = vld [vmem:[%s1344_s1 + $0xa4] ss:$16 sps:$4 sm:$0xff]   ;;  %v898_v11 = vld [vmem:[%s1344_s1 + $0xa0] ss:$16 sps:$4 sm:$0xff]   ;;  %v933_v36 = vld [vmem:[%s1344_s1 + $0xc8] ss:$16 sps:$4 sm:$0xff]  }
   0x6   :  { %v896_v10 = vld [vmem:[%s1344_s1 + $0x284] ss:$16 sps:$4 sm:$0xff]   ;;  %v899_v12 = vld [vmem:[%s1344_s1 + $0x280] ss:$16 sps:$4 sm:$0xff]   ;;  %v941_v39 = vld [vmem:[%s1344_s1 + $0xac] ss:$16 sps:$4 sm:$0xff]  }
   0x7   :  { %592 = vmatpush1.bf16.msra.mxu0 %v892_v7  ;;  %v900_v13 = vld [vmem:[%s1344_s1 + $0x84] ss:$16 sps:$4 sm:$0xff]   ;;  %v904_v15 = vld [vmem:[%s1344_s1 + $0x80] ss:$16 sps:$4 sm:$0xff]   ;;  %v939_v40 = vld [vmem:[%s1344_s1 + $0xa8] ss:$16 sps:$4 sm:$0xff]  }
   0x8   :  { %635 = vmatpush1.bf16.msra.mxu1 %v893_v8  ;;  %593 = vmatprep.subr.bf16.mxu0 %v894_v9  ;;  %v902_v14 = vld [vmem:[%s1344_s1 + $0x264] ss:$16 sps:$4 sm:$0xff]   ;;  %v905_v16 = vld [vmem:[%s1344_s1 + $0x260] ss:$16 sps:$4 sm:$0xff]   ;;  %v947_v43 = vld [vmem:[%s1344_s1 + $0x8c] ss:$16 sps:$4 sm:$0xff]  }
   0x9   :  { %636 = vmatprep.subr.bf16.mxu1 %v896_v10  ;;  %v906_v17 = vld [vmem:[%s1344_s1 + $0x64] ss:$16 sps:$4 sm:$0xff]   ;;  %v910_v19 = vld [vmem:[%s1344_s1 + $0x60] ss:$16 sps:$4 sm:$0xff]   ;;  %v945_v44 = vld [vmem:[%s1344_s1 + $0x88] ss:$16 sps:$4 sm:$0xff]  }
   0xa   :  { %v908_v18 = vld [vmem:[%s1344_s1 + $0x244] ss:$16 sps:$4 sm:$0xff]   ;;  %v911_v20 = vld [vmem:[%s1344_s1 + $0x240] ss:$16 sps:$4 sm:$0xff]   ;;  %v953_v47 = vld [vmem:[%s1344_s1 + $0x6c] ss:$16 sps:$4 sm:$0xff]  }
   0xb   :  { %594 = vmatpush1.bf16.msra.mxu0 %v898_v11  ;;  %v912_v21 = vld [vmem:[%s1344_s1 + $0x44] ss:$16 sps:$4 sm:$0xff]   ;;  %v916_v23 = vld [vmem:[%s1344_s1 + $0x40] ss:$16 sps:$4 sm:$0xff]   ;;  %v951_v48 = vld [vmem:[%s1344_s1 + $0x68] ss:$16 sps:$4 sm:$0xff]  }
   0xc   :  { %637 = vmatpush1.bf16.msra.mxu1 %v899_v12  ;;  %595 = vmatprep.subr.bf16.mxu0 %v900_v13  ;;  %v914_v22 = vld [vmem:[%s1344_s1 + $0x224] ss:$16 sps:$4 sm:$0xff]   ;;  %v917_v24 = vld [vmem:[%s1344_s1 + $0x220] ss:$16 sps:$4 sm:$0xff]   ;;  %v959_v53 = vld [vmem:[%s1344_s1 + $0x4c] ss:$16 sps:$4 sm:$0xff]  }
   0xd   :  { %638 = vmatprep.subr.bf16.mxu1 %v902_v14  ;;  %v918_v25 = vld [vmem:[%s1344_s1 + $0x24] ss:$16 sps:$4 sm:$0xff]   ;;  %v922_v27 = vld [vmem:[%s1344_s1 + $0x20] ss:$16 sps:$4 sm:$0xff]   ;;  %v957_v54 = vld [vmem:[%s1344_s1 + $0x48] ss:$16 sps:$4 sm:$0xff]  }
   0xe   :  { %v920_v26 = vld [vmem:[%s1344_s1 + $0x204] ss:$16 sps:$4 sm:$0xff]   ;;  %v923_v28 = vld [vmem:[%s1344_s1 + $0x200] ss:$16 sps:$4 sm:$0xff]   ;;  %v965_v57 = vld [vmem:[%s1344_s1 + $0x2c] ss:$16 sps:$4 sm:$0xff]  }
   0xf   :  { %596 = vmatpush1.bf16.msra.mxu0 %v904_v15  ;;  %v924_v29 = vld [vmem:[%s1344_s1 + $0x4] ss:$16 sps:$4 sm:$0xff]   ;;  %v930_v33 = vld [vmem:[%s1344_s1] ss:$16 sps:$4 sm:$0xff]   ;;  %v963_v58 = vld [vmem:[%s1344_s1 + $0x28] ss:$16 sps:$4 sm:$0xff]  }
  0x10   :  { %639 = vmatpush1.bf16.msra.mxu1 %v905_v16  ;;  %597 = vmatprep.subr.bf16.mxu0 %v906_v17  ;;  %v931_v34 = vld [vmem:[%s1344_s1 + $0x1e4] ss:$16 sps:$4 sm:$0xff]   ;;  %v936_v37 = vld [vmem:[%s1344_s1 + $0x1e0] ss:$16 sps:$4 sm:$0xff]   ;;  %v971_v61 = vld [vmem:[%s1344_s1 + $0xc] ss:$16 sps:$4 sm:$0xff]  }
  0x11   :  { %640 = vmatprep.subr.bf16.mxu1 %v908_v18  ;;  %v937_v38 = vld [vmem:[%s1344_s1 + $0x1c4] ss:$16 sps:$4 sm:$0xff]   ;;  %v942_v41 = vld [vmem:[%s1344_s1 + $0x1c0] ss:$16 sps:$4 sm:$0xff]   ;;  %v969_v62 = vld [vmem:[%s1344_s1 + $0x8] ss:$16 sps:$4 sm:$0xff]  }
  0x12   :  { %v943_v42 = vld [vmem:[%s1344_s1 + $0x1a4] ss:$16 sps:$4 sm:$0xff]   ;;  %v948_v45 = vld [vmem:[%s1344_s1 + $0x1a0] ss:$16 sps:$4 sm:$0xff]   ;;  %v977_v2 = vld [vmem:[%s1344_s1 + $0x1ec] ss:$16 sps:$4 sm:$0xff]  }
  0x13   :  { %598 = vmatpush1.bf16.msra.mxu0 %v910_v19  ;;  %v949_v46 = vld [vmem:[%s1344_s1 + $0x184] ss:$16 sps:$4 sm:$0xff]   ;;  %v954_v50 = vld [vmem:[%s1344_s1 + $0x180] ss:$16 sps:$4 sm:$0xff]   ;;  %v975_v3 = vld [vmem:[%s1344_s1 + $0x1e8] ss:$16 sps:$4 sm:$0xff]  }
  0x14   :  { %641 = vmatpush1.bf16.msra.mxu1 %v911_v20  ;;  %599 = vmatprep.subr.bf16.mxu0 %v912_v21  ;;  %v15_v49 = vld [vmem:[%s1345_s0] sm:$0xff]  ;;  %v983_v5 = vld [vmem:[%s1344_s1 + $0x1cc] ss:$16 sps:$4 sm:$0xff]   ;;  %v981_v9 = vld [vmem:[%s1344_s1 + $0x1c8] ss:$16 sps:$4 sm:$0xff]  }
  0x15   :  { %642 = vmatprep.subr.bf16.mxu1 %v914_v22  ;;  %v955_v51 = vld [vmem:[%s1344_s1 + $0x164] ss:$16 sps:$4 sm:$0xff]   ;;  %v780_v52 = vcombine.high %v15_v49, %v15_v49  ;;  %v960_v55 = vld [vmem:[%s1344_s1 + $0x160] ss:$16 sps:$4 sm:$0xff]   ;;  %v986_v6 = vld [vmem:[%s1344_s1 + $0x2cc] ss:$16 sps:$4 sm:$0xff]   ;;  %v779_v8 = vcombine.low %v15_v49, %v15_v49 }
  0x16   :  { %v961_v56 = vld [vmem:[%s1344_s1 + $0x144] ss:$16 sps:$4 sm:$0xff]   ;;  %v966_v59 = vld [vmem:[%s1344_s1 + $0x140] ss:$16 sps:$4 sm:$0xff]   ;;  %v984_v10 = vld [vmem:[%s1344_s1 + $0x2c8] ss:$16 sps:$4 sm:$0xff]  }
  0x17   :  { %600 = vmatpush1.bf16.msra.mxu0 %v916_v23  ;;  %621 = vmatprep.mubr.bf16.mxu0 %v780_v52  ;;  %v967_v60 = vld [vmem:[%s1344_s1 + $0x124] ss:$16 sps:$4 sm:$0xff]   ;;  %v972_v63 = vld [vmem:[%s1344_s1 + $0x120] ss:$16 sps:$4 sm:$0xff]   ;;  %v989_v11 = vld [vmem:[%s1344_s1 + $0x1ac] ss:$16 sps:$4 sm:$0xff]  }
  0x18   :  { %643 = vmatpush1.bf16.msra.mxu1 %v917_v24  ;;  %601 = vmatprep.subr.bf16.mxu0 %v918_v25  ;;  %v973_v0 = vld [vmem:[%s1344_s1 + $0x104] ss:$16 sps:$4 sm:$0xff]   ;;  %v978_v4 = vld [vmem:[%s1344_s1 + $0x100] ss:$16 sps:$4 sm:$0xff]   ;;  %v992_v12 = vld [vmem:[%s1344_s1 + $0x2ac] ss:$16 sps:$4 sm:$0xff]  }
  0x19   :  { %644 = vmatprep.subr.bf16.mxu1 %v920_v26  ;;  %v109_v7 = vld [vmem:[%s1346_s2] sm:$0xff]  ;;  %v987_v13 = vld [vmem:[%s1344_s1 + $0x1a8] ss:$16 sps:$4 sm:$0xff]   ;;  %v995_v15 = vld [vmem:[%s1344_s1 + $0x18c] ss:$16 sps:$4 sm:$0xff]  }
  0x1a   :  { %112 = vperm.xlu0 %881, %v109_v7   ;;  %v990_v14 = vld [vmem:[%s1344_s1 + $0x2a8] ss:$16 sps:$4 sm:$0xff]   ;;  %v998_v16 = vld [vmem:[%s1344_s1 + $0x28c] ss:$16 sps:$4 sm:$0xff]  }
  0x1b   :  { %602 = vmatpush1.bf16.msra.mxu0 %v922_v27  ;;  %v993_v17 = vld [vmem:[%s1344_s1 + $0x188] ss:$16 sps:$4 sm:$0xff]   ;;  %v1001_v19 = vld [vmem:[%s1344_s1 + $0x16c] ss:$16 sps:$4 sm:$0xff]  }
  0x1c   :  { %645 = vmatpush1.bf16.msra.mxu1 %v923_v28  ;;  %603 = vmatprep.subr.bf16.mxu0 %v924_v29  ;;  %v996_v18 = vld [vmem:[%s1344_s1 + $0x288] ss:$16 sps:$4 sm:$0xff]   ;;  %v1007_v22 = vld [vmem:[%s1344_s1 + $0x14c] ss:$16 sps:$4 sm:$0xff]  }
  0x1d   :  { %671 = vmatprep.subr.bf16.mxu1 %v929_v30  ;;  %v999_v20 = vld [vmem:[%s1344_s1 + $0x168] ss:$16 sps:$4 sm:$0xff]   ;;  %v1010_v23 = vld [vmem:[%s1344_s1 + $0x24c] ss:$16 sps:$4 sm:$0xff]  }
  0x1e   :  { %v1002_v21 = vld [vmem:[%s1344_s1 + $0x268] ss:$16 sps:$4 sm:$0xff]   ;;  %v1013_v26 = vld [vmem:[%s1344_s1 + $0x12c] ss:$16 sps:$4 sm:$0xff]  }
  0x1f   :  { %874 = vmatmul.mubr.msk.bf16.vlgmr.msra.gmra.mxu1 %vm585_vm0, %v1139_v31  ;;  %604 = vmatpush1.bf16.msra.mxu0 %v930_v33  ;;  %v1005_v24 = vld [vmem:[%s1344_s1 + $0x148] ss:$16 sps:$4 sm:$0xff]   ;;  %v1016_v27 = vld [vmem:[%s1344_s1 + $0x22c] ss:$16 sps:$4 sm:$0xff]  }
  0x20   :  { %672 = vmatpush1.bf16.msra.mxu1 %v927_v32  ;;  %605 = vmatprep.subr.bf16.mxu0 %v931_v34  ;;  %v1008_v25 = vld [vmem:[%s1344_s1 + $0x248] ss:$16 sps:$4 sm:$0xff]   ;;  %v1019_v30 = vld [vmem:[%s1344_s1 + $0x10c] ss:$16 sps:$4 sm:$0xff]  }
  0x21   :  { %673 = vmatprep.subr.bf16.mxu1 %v935_v35  ;;  %703 = vmatprep.mubr.bf16.mxu1 %v780_v52  ;;  %v1011_v28 = vld [vmem:[%s1344_s1 + $0x128] ss:$16 sps:$4 sm:$0xff]   ;;  %v1022_v32 = vld [vmem:[%s1344_s1 + $0x20c] ss:$16 sps:$4 sm:$0xff]  }
  0x22   :  { %v1014_v29 = vld [vmem:[%s1344_s1 + $0x228] ss:$16 sps:$4 sm:$0xff]  }
  0x23   :  { %606 = vmatpush2.bf16.msra.mxu0 %v936_v37  ;;  %v1017_v33 = vld [vmem:[%s1344_s1 + $0x108] ss:$16 sps:$4 sm:$0xff]  }
  0x24   :  { %674 = vmatpush1.bf16.msra.mxu1 %v933_v36  ;;  %607 = vmatprep.subr.bf16.mxu0 %v937_v38  ;;  %v1020_v34 = vld [vmem:[%s1344_s1 + $0x208] ss:$16 sps:$4 sm:$0xff]  }
  0x25   :  { %675 = vmatprep.subr.bf16.mxu1 %v941_v39 }
  0x27   :  { %608 = vmatpush2.bf16.msra.mxu0 %v942_v41 }
  0x28   :  { %676 = vmatpush1.bf16.msra.mxu1 %v939_v40  ;;  %609 = vmatprep.subr.bf16.mxu0 %v943_v42 }
  0x29   :  { %677 = vmatprep.subr.bf16.mxu1 %v947_v43 }
  0x2b   :  { %610 = vmatpush2.bf16.msra.mxu0 %v948_v45 }
  0x2c   :  { %678 = vmatpush1.bf16.msra.mxu1 %v945_v44  ;;  %611 = vmatprep.subr.bf16.mxu0 %v949_v46 }
  0x2d   :  { %679 = vmatprep.subr.bf16.mxu1 %v953_v47 }
  0x2f   :  { %612 = vmatpush2.bf16.msra.mxu0 %v954_v50 }
  0x30   :  { %680 = vmatpush1.bf16.msra.mxu1 %v951_v48  ;;  %613 = vmatprep.subr.bf16.mxu0 %v955_v51 }
  0x31   :  { %681 = vmatprep.subr.bf16.mxu1 %v959_v53 }
  0x33   :  { %614 = vmatpush2.bf16.msra.mxu0 %v960_v55 }
  0x34   :  { %682 = vmatpush1.bf16.msra.mxu1 %v957_v54  ;;  %615 = vmatprep.subr.bf16.mxu0 %v961_v56 }
  0x35   :  { %683 = vmatprep.subr.bf16.mxu1 %v965_v57 }
  0x37   :  { %616 = vmatpush2.bf16.msra.mxu0 %v966_v59 }
  0x38   :  { %684 = vmatpush1.bf16.msra.mxu1 %v963_v58  ;;  %617 = vmatprep.subr.bf16.mxu0 %v967_v60 }
  0x39   :  { %685 = vmatprep.subr.bf16.mxu1 %v971_v61 }
  0x3b   :  { %618 = vmatpush2.bf16.msra.mxu0 %v972_v63 }
  0x3c   :  { %686 = vmatpush1.bf16.msra.mxu1 %v969_v62  ;;  %619 = vmatprep.subr.bf16.mxu0 %v973_v0 }
  0x3d   :  { %687 = vmatprep.subr.bf16.mxu1 %v977_v2 }
  0x3f   :  { %620 = vmatpush2.bf16.msra.mxu0 %v978_v4 }
  0x40   :  { %688 = vmatpush2.bf16.msra.mxu1 %v975_v3  ;;  %714 = vmatprep.subr.bf16.mxu0 %v986_v6 }
  0x41   :  { %689 = vmatprep.subr.bf16.mxu1 %v983_v5 }
  0x42   :  { %622 = vmatmul.mubr.bf16.vlgmr.msra.gmra.mxu0 %v779_v8 }
  0x43   :  { %715 = vmatpush1.bf16.msra.mxu0 %v984_v10  ;;  %744 = vmatprep.mubr.bf16.mxu0 %v1023_v1  ;;  %v1004_v1 = vld [vmem:[%s1344_s1 + $0x26c] ss:$16 sps:$4 sm:$0xff]  }
  0x44   :  { %690 = vmatpush2.bf16.msra.mxu1 %v981_v9  ;;  %716 = vmatprep.subr.bf16.mxu0 %v992_v12 }
  0x45   :  { %691 = vmatprep.subr.bf16.mxu1 %v989_v11 }
  0x47   :  { %717 = vmatpush1.bf16.msra.mxu0 %v990_v14 }
  0x48   :  { %692 = vmatpush2.bf16.msra.mxu1 %v987_v13  ;;  %718 = vmatprep.subr.bf16.mxu0 %v998_v16 }
  0x49   :  { %693 = vmatprep.subr.bf16.mxu1 %v995_v15 }
  0x4b   :  { %719 = vmatpush1.bf16.msra.mxu0 %v996_v18 }
  0x4c   :  { %694 = vmatpush2.bf16.msra.mxu1 %v993_v17  ;;  %720 = vmatprep.subr.bf16.mxu0 %v1004_v1 }
  0x4d   :  { %695 = vmatprep.subr.bf16.mxu1 %v1001_v19 }
  0x4f   :  { %721 = vmatpush1.bf16.msra.mxu0 %v1002_v21 }
  0x50   :  { %696 = vmatpush2.bf16.msra.mxu1 %v999_v20  ;;  %722 = vmatprep.subr.bf16.mxu0 %v1010_v23 }
  0x51   :  { %697 = vmatprep.subr.bf16.mxu1 %v1007_v22 }
  0x53   :  { %723 = vmatpush1.bf16.msra.mxu0 %v1008_v25 }
  0x54   :  { %698 = vmatpush2.bf16.msra.mxu1 %v1005_v24  ;;  %724 = vmatprep.subr.bf16.mxu0 %v1016_v27 }
  0x55   :  { %699 = vmatprep.subr.bf16.mxu1 %v1013_v26 }
  0x57   :  { %725 = vmatpush1.bf16.msra.mxu0 %v1014_v29 }
  0x58   :  { %700 = vmatpush2.bf16.msra.mxu1 %v1011_v28  ;;  %726 = vmatprep.subr.bf16.mxu0 %v1022_v32 }
  0x59   :  { %701 = vmatprep.subr.bf16.mxu1 %v1019_v30 }
  0x5b   :  { %727 = vmatpush1.bf16.msra.mxu0 %v1020_v34 }
  0x5c   :  { %702 = vmatpush2.bf16.msra.mxu1 %v1017_v33 }
  0x5e   :  { %875 = vmatmul.mubr.msk.bf16.vlgmr.msra.gmra.mxu0 %vm585_vm0, %v1139_v31 }
  0x5f   :  { %704 = vmatmul.mubr.bf16.vlgmr.msra.gmra.mxu1 %v779_v8 }
  0x95   :  { %v113_v39 = vpop.permute.xlu0 %112 }
  0xdf   :  { %v664_v35 = vpop.f32.mrf.mxu1 }
  0xe1   :  { %v666_v36 = vpop.f32.mrf.mxu1 }
  0xe3   :  { %v668_v37 = vpop.f32.mrf.mxu1 }
  0xe5   :  { %v669_v38 = vpop.f32.mrf.mxu1 }
 0x102   :  { %v623_v40 = vpop.f32.mrf.mxu0 }
 0x103   :  { %v624_v41 = vadd.f32 %v623_v40, %v113_v39 }
 0x104   :  { %v625_v42 = vpop.f32.mrf.mxu0 }
 0x105   :  { %v665_v43 = vadd.f32 %v664_v35, %v624_v41  ;;  %v626_v44 = vadd.f32 %v625_v42, %v113_v39 }
 0x106   :  { %v627_v45 = vpop.f32.mrf.mxu0 }
 0x107   :  { %v667_v46 = vadd.f32 %v666_v36, %v626_v44  ;;  %v753_v48 = vmax.f32 %v665_v43, 0.0 }
 0x108   :  { %v628_v47 = vpop.f32.mrf.mxu0 }
 0x109   :  { %v754_v49 = vmax.f32 %v667_v46, 0.0 }
 0x10b   :  { %v878_v50 = vpack.c.bf16 %v754_v49, %v753_v48 }
 0x10d   :  { %773 = vst [vmem:[%s1347_s3] sm:$0xff] %v878_v50 }
 0x11e   :  { %v746_v51 = vpop.f32.mrf.mxu0 }
 0x11f   :  { %v705_v31 = vpop.f32.mrf.mxu1 }
 0x120   :  { %v706_v52 = vadd.f32 %v705_v31, %v113_v39  ;;  %v748_v54 = vpop.f32.mrf.mxu0 }
 0x121   :  { %v707_v53 = vpop.f32.mrf.mxu1 }
 0x122   :  { %v747_v55 = vadd.f32 %v746_v51, %v706_v52  ;;  %v708_v56 = vadd.f32 %v707_v53, %v113_v39  ;;  %v750_v58 = vpop.f32.mrf.mxu0 }
 0x123   :  { %v709_v57 = vpop.f32.mrf.mxu1 }
 0x124   :  { %v749_v59 = vadd.f32 %v748_v54, %v708_v56  ;;  %v751_v61 = vpop.f32.mrf.mxu0  ;;  %v755_v62 = vmax.f32 %v747_v55, 0.0 }
 0x125   :  { %v710_v60 = vpop.f32.mrf.mxu1 }
 0x126   :  { %v756_v63 = vmax.f32 %v749_v59, 0.0 }
 0x128   :  { %v879_v0 = vpack.c.bf16 %v756_v63, %v755_v62 }
 0x12a   :  { %774 = vst [vmem:[%s1347_s3 + $0x8] sm:$0xff] %v879_v0 }

// kernel: encoder_forward.79
= control target key start
LH: loop header
LB: loop body
LE: loop exit
PB: predicated region body
PF: predicated region fallthrough
CT: control target
= control target key end

     0   :  { %v240_v1 = vmov 0   ;;  %vm94_vm0 = vcmask 392192   ;;  %s309_s1 = inlined_call_operand.vmem [shape: bf16[48,512], index: 1, kind: input, shape index: {}]   ;;  %s310_s2 = inlined_call_operand.vmem [shape: f32[8,1], index: 2, kind: input, shape index: {}]   ;;  %s311_s0 = inlined_call_operand.vmem [shape: bf16[8,48], index: 0, kind: input, shape index: {}]   ;;  %s312_s3 = inlined_call_operand.vmem [shape: bf16[8,512], index: 3, kind: output, shape index: {}]  }
   0x1   :  { %v222_v0 = vld [vmem:[%s309_s1 + $0x44] ss:$16 sps:$4 sm:$0xff]   ;;  %130 = vmatprep.mubr.bf16.mxu0 %v240_v1  ;;  %171 = vmatprep.mubr.bf16.mxu1 %v240_v1  ;;  %v224_v2 = vld [vmem:[%s309_s1 + $0x4c] ss:$16 sps:$4 sm:$0xff]   ;;  %v226_v3 = vld [vmem:[%s309_s1 + $0x40] ss:$16 sps:$4 sm:$0xff]  }
   0x2   :  { %221 = vset.pattern.permute.xlu0 %v240_v1  ;;  %108 = vmatprep.subr.bf16.mxu0 %v222_v0  ;;  %v227_v4 = vld [vmem:[%s309_s1 + $0x48] ss:$16 sps:$4 sm:$0xff]   ;;  %v228_v5 = vld [vmem:[%s309_s1 + $0x24] ss:$16 sps:$4 sm:$0xff]   ;;  %v230_v6 = vld [vmem:[%s309_s1 + $0x2c] ss:$16 sps:$4 sm:$0xff]  }
   0x3   :  { %149 = vmatprep.subr.bf16.mxu1 %v224_v2  ;;  %109 = vmatpush1.bf16.msra.mxu0 %v226_v3  ;;  %v232_v7 = vld [vmem:[%s309_s1 + $0x20] ss:$16 sps:$4 sm:$0xff]   ;;  %v233_v8 = vld [vmem:[%s309_s1 + $0x28] ss:$16 sps:$4 sm:$0xff]   ;;  %v234_v9 = vld [vmem:[%s309_s1 + $0x4] ss:$16 sps:$4 sm:$0xff]  }
   0x4   :  { %150 = vmatpush1.bf16.msra.mxu1 %v227_v4  ;;  %110 = vmatprep.subr.bf16.mxu0 %v228_v5  ;;  %v236_v10 = vld [vmem:[%s309_s1 + $0xc] ss:$16 sps:$4 sm:$0xff]   ;;  %v238_v11 = vld [vmem:[%s309_s1] ss:$16 sps:$4 sm:$0xff]   ;;  %v239_v12 = vld [vmem:[%s309_s1 + $0x8] ss:$16 sps:$4 sm:$0xff]  }
   0x5   :  { %151 = vmatprep.subr.bf16.mxu1 %v230_v6  ;;  %v28_v13 = vld [vmem:[%s310_s2] sm:$0xff] }
   0x6   :  { %31 = vperm.xlu0 %221, %v28_v13   ;;  %v15_v14 = vld [vmem:[%s311_s0] sm:$0xf] }
   0x7   :  { %111 = vmatpush1.bf16.msra.mxu0 %v232_v7 }
   0x8   :  { %152 = vmatpush1.bf16.msra.mxu1 %v233_v8  ;;  %112 = vmatprep.subr.bf16.mxu0 %v234_v9 }
   0x9   :  { %153 = vmatprep.subr.bf16.mxu1 %v236_v10 }
   0xb   :  { %113 = vmatpush1.bf16.msra.mxu0 %v238_v11 }
   0xc   :  { %154 = vmatpush1.bf16.msra.mxu1 %v239_v12 }
   0xe   :  { %214 = vmatmul.mubr.msk.bf16.vlgmr.msra.gmra.mxu0 %vm94_vm0, %v15_v14 }
   0xf   :  { %215 = vmatmul.mubr.msk.bf16.vlgmr.msra.gmra.mxu1 %vm94_vm0, %v15_v14 }
  0x81   :  { %v32_v15 = vpop.permute.xlu0 %31 }
  0xce   :  { %v132_v16 = vpop.f32.mrf.mxu0 }
  0xcf   :  { %v173_v17 = vpop.f32.mrf.mxu1  ;;  %v133_v20 = vadd.f32 %v132_v16, %v32_v15 }
  0xd0   :  { %v134_v18 = vpop.f32.mrf.mxu0  ;;  %v174_v21 = vadd.f32 %v173_v17, %v32_v15 }
  0xd1   :  { %v175_v19 = vpop.f32.mrf.mxu1  ;;  %v135_v22 = vadd.f32 %v134_v18, %v32_v15 }
  0xd2   :  { %v176_v23 = vadd.f32 %v175_v19, %v32_v15  ;;  %v136_v24 = vpop.f32.mrf.mxu0 }
  0xd3   :  { %v177_v25 = vpop.f32.mrf.mxu1  ;;  %v218_v26 = vpack.c.bf16 %v135_v22, %v133_v20 }
  0xd4   :  { %v219_v27 = vpack.c.bf16 %v176_v23, %v174_v21  ;;  %v137_v28 = vpop.f32.mrf.mxu0 }
  0xd5   :  { %v178_v29 = vpop.f32.mrf.mxu1  ;;  %196 = vst [vmem:[%s312_s3] sm:$0xff] %v218_v26 }
  0xd6   :  { %197 = vst [vmem:[%s312_s3 + $0x8] sm:$0xff] %v219_v27 }

// kernel: encoder_forward.80
= control target key start
LH: loop header
LB: loop body
LE: loop exit
PB: predicated region body
PF: predicated region fallthrough
CT: control target
= control target key end

     0   :  { %v148_v0 = vmov 0.0   ;;  %vm149_vm0 = vmmov 0   ;;  %v150_v2 = vmov 0   ;;  %vm62_vm1 = vcmask 654336   ;;  %s195_s1 = inlined_call_operand.vmem [shape: bf16[80,128], index: 1, kind: input, shape index: {}]   ;;  %s196_s2 = inlined_call_operand.vmem [shape: f32[8,1], index: 2, kind: input, shape index: {}]   ;;  %s197_s0 = inlined_call_operand.vmem [shape: bf16[8,80], index: 0, kind: input, shape index: {}]   ;;  %s198_s3 = inlined_call_operand.vmem [shape: bf16[8,128], index: 3, kind: output, shape index: {}]  }
   0x1   :  { %125 = vmatprep.subr.bf16.mxu0 %v148_v0  ;;  %v143_v1 = vld [vmem:[%s195_s1 + $0x20] sm:$0xff]   ;;  %135 = vmatprep.mubr.msk.bf16.mxu0 %vm149_vm0, %v148_v0  ;;  %v144_v3 = vld [vmem:[%s195_s1 + $0x18] sm:$0xff]   ;;  %v145_v5 = vld [vmem:[%s195_s1 + $0x10] sm:$0xff]  }
   0x2   :  { %142 = vset.pattern.permute.xlu0 %v150_v2  ;;  %126 = vmatpush3.bf16.msra.mxu0 %v143_v1  ;;  %v26_v4 = vld [vmem:[%s196_s2] sm:$0xff]  ;;  %v146_v6 = vld [vmem:[%s195_s1 + $0x8] sm:$0xff]  }
   0x3   :  { %127 = vmatprep.subr.bf16.mxu0 %v148_v0  ;;  %29 = vperm.xlu0 %142, %v26_v4   ;;  %v147_v7 = vld [vmem:[%s195_s1] sm:$0xff]  }
   0x4   :  { %v15_v8 = vld [vmem:[%s197_s0] sm:$0xf] }
   0x6   :  { %128 = vmatpush3.bf16.msra.mxu0 %v144_v3 }
   0x7   :  { %129 = vmatprep.subr.bf16.mxu0 %v148_v0 }
   0xa   :  { %130 = vmatpush3.bf16.msra.mxu0 %v145_v5 }
   0xb   :  { %131 = vmatprep.subr.bf16.mxu0 %v148_v0 }
   0xe   :  { %132 = vmatpush3.bf16.msra.mxu0 %v146_v6 }
   0xf   :  { %133 = vmatprep.subr.bf16.mxu0 %v148_v0 }
  0x12   :  { %134 = vmatpush3.bf16.msra.mxu0 %v147_v7 }
  0x15   :  { %136 = vmatmul.mubr.msk.bf16.vlgmr.msra.gmra.mxu0 %vm62_vm1, %v15_v8 }
  0x7e   :  { %v30_v9 = vpop.permute.xlu0 %29 }
  0xd5   :  { %v100_v10 = vpop.f32.mrf.mxu0 }
  0xd6   :  { %v101_v11 = vadd.f32 %v100_v10, %v30_v9 }
  0xd7   :  { %v137_v12 = vpop.f32.mrf.mxu0 }
  0xd8   :  { %v106_v13 = vmax.f32 %v101_v11, 0.0 }
  0xd9   :  { %v103_v14 = vpop.f32.mrf.mxu0 }
  0xda   :  { %v107_v15 = vpack.c.bf16 %v106_v13, %v106_v13 }
  0xdb   :  { %v138_v16 = vpop.f32.mrf.mxu0 }
  0xdc   :  { %108 = vst [vmem:[%s198_s3] sm:$0xf] %v107_v15 }

// kernel: encoder_forward.81
= control target key start
LH: loop header
LB: loop body
LE: loop exit
PB: predicated region body
PF: predicated region fallthrough
CT: control target
= control target key end

     0   :  { %v176_v0 = vmov 0   ;;  %vm100_vm0 = vcmask 130048   ;;  %s233_s1 = inlined_call_operand.vmem [shape: bf16[144,128], index: 1, kind: input, shape index: {}]   ;;  %s234_s0 = inlined_call_operand.vmem [shape: bf16[8,144], index: 0, kind: input, shape index: {}]   ;;  %s235_s2 = inlined_call_operand.vmem [shape: f32[8,1], index: 2, kind: input, shape index: {}]   ;;  %s236_s3 = inlined_call_operand.vmem [shape: bf16[8,128], index: 3, kind: output, shape index: {}]  }
   0x1   :  { %104 = vmatprep.subr.bf16.mxu0 %v176_v0  ;;  %v165_v1 = vld [vmem:[%s233_s1 + $0x38] sm:$0xff]   ;;  %164 = vset.pattern.permute.xlu0 %v176_v0  ;;  %v166_v2 = vld [vmem:[%s233_s1 + $0x30] sm:$0xff]   ;;  %v167_v3 = vld [vmem:[%s233_s1 + $0x28] sm:$0xff]  }
   0x2   :  { %105 = vmatpush1.bf16.msra.mxu0 %v165_v1  ;;  %v15_v4 = vld [vmem:[%s234_s0] sm:$0xff]  ;;  %v169_v8 = vld [vmem:[%s233_s1 + $0x18] sm:$0xff]   ;;  %v170_v9 = vld [vmem:[%s233_s1 + $0x10] sm:$0xff]  }
   0x3   :  { %106 = vmatprep.subr.bf16.mxu0 %v176_v0  ;;  %v34_v5 = vld [vmem:[%s235_s2] sm:$0xff]  ;;  %v152_v7 = vcombine.high %v15_v4, %v15_v4  ;;  %v171_v10 = vld [vmem:[%s233_s1 + $0x8] sm:$0xff]   ;;  %v151_v13 = vcombine.low %v15_v4, %v15_v4 }
   0x4   :  { %v168_v6 = vld [vmem:[%s233_s1 + $0x20] sm:$0xff]   ;;  %37 = vperm.xlu0 %164, %v34_v5  }
   0x5   :  { %162 = vmatprep.mubr.msk.bf16.mxu0 %vm100_vm0, %v152_v7  ;;  %v172_v11 = vld [vmem:[%s233_s1] sm:$0xff]  }
   0x6   :  { %107 = vmatpush1.bf16.msra.mxu0 %v166_v2  ;;  %v173_v12 = vld [vmem:[%s233_s1 + $0x40] sm:$0xff]  }
   0x7   :  { %108 = vmatprep.subr.bf16.mxu0 %v176_v0 }
   0xa   :  { %109 = vmatpush1.bf16.msra.mxu0 %v167_v3 }
   0xb   :  { %110 = vmatprep.subr.bf16.mxu0 %v176_v0 }
   0xe   :  { %111 = vmatpush1.bf16.msra.mxu0 %v168_v6 }
   0xf   :  { %112 = vmatprep.subr.bf16.mxu0 %v176_v0 }
  0x12   :  { %113 = vmatpush1.bf16.msra.mxu0 %v169_v8 }
  0x13   :  { %114 = vmatprep.subr.bf16.mxu0 %v176_v0 }
  0x16   :  { %115 = vmatpush1.bf16.msra.mxu0 %v170_v9 }
  0x17   :  { %116 = vmatprep.subr.bf16.mxu0 %v176_v0 }
  0x1a   :  { %117 = vmatpush1.bf16.msra.mxu0 %v171_v10 }
  0x1b   :  { %118 = vmatprep.subr.bf16.mxu0 %v176_v0 }
  0x1e   :  { %119 = vmatpush1.bf16.msra.mxu0 %v172_v11 }
  0x1f   :  { %134 = vmatprep.subr.bf16.mxu0 %v176_v0 }
  0x22   :  { %135 = vmatpush2.bf16.msra.mxu0 %v173_v12 }
  0x25   :  { %137 = vmatmul.mubr.bf16.vlgmr.msra.gmra.mxu0 %v151_v13 }
  0x7f   :  { %v38_v14 = vpop.permute.xlu0 %37 }
  0xe5   :  { %v138_v15 = vpop.f32.mrf.mxu0 }
  0xe6   :  { %v139_v16 = vadd.f32 %v138_v15, %v38_v14 }
  0xe7   :  { %v140_v17 = vpop.f32.mrf.mxu0 }
  0xe8   :  { %v144_v18 = vmax.f32 %v139_v16, 0.0 }
  0xe9   :  { %v141_v19 = vpop.f32.mrf.mxu0 }
  0xea   :  { %v145_v20 = vpack.c.bf16 %v144_v18, %v144_v18 }
  0xeb   :  { %v142_v21 = vpop.f32.mrf.mxu0 }
  0xec   :  { %146 = vst [vmem:[%s236_s3] sm:$0xf] %v145_v20 }

// kernel: encoder_forward.82
= control target key start
LH: loop header
LB: loop body
LE: loop exit
PB: predicated region body
PF: predicated region fallthrough
CT: control target
= control target key end

     0   :  { %v226_v0 = vmov 0   ;;  %vm140_vm0 = vcmask 785408   ;;  %s298_s1 = inlined_call_operand.vmem [shape: bf16[224,128], index: 1, kind: input, shape index: {}]   ;;  %s299_s0 = inlined_call_operand.vmem [shape: bf16[8,224], index: 0, kind: input, shape index: {}]   ;;  %s300_s2 = inlined_call_operand.vmem [shape: f32[8,1], index: 2, kind: input, shape index: {}]   ;;  %s301_s3 = inlined_call_operand.vmem [shape: bf16[8,128], index: 3, kind: output, shape index: {}]  }
   0x1   :  { %144 = vmatprep.subr.bf16.mxu0 %v226_v0  ;;  %v210_v1 = vld [vmem:[%s298_s1 + $0x38] sm:$0xff]   ;;  %209 = vset.pattern.permute.xlu0 %v226_v0  ;;  %v211_v2 = vld [vmem:[%s298_s1 + $0x30] sm:$0xff]   ;;  %v212_v3 = vld [vmem:[%s298_s1 + $0x28] sm:$0xff]  }
   0x2   :  { %145 = vmatpush1.bf16.msra.mxu0 %v210_v1  ;;  %v213_v4 = vld [vmem:[%s298_s1 + $0x20] sm:$0xff]   ;;  %v214_v5 = vld [vmem:[%s298_s1 + $0x18] sm:$0xff]   ;;  %v215_v9 = vld [vmem:[%s298_s1 + $0x10] sm:$0xff]  }
   0x3   :  { %146 = vmatprep.subr.bf16.mxu0 %v226_v0  ;;  %v15_v6 = vld [vmem:[%s299_s0] sm:$0xff]  ;;  %v216_v10 = vld [vmem:[%s298_s1 + $0x8] sm:$0xff]   ;;  %v220_v14 = vld [vmem:[%s298_s1 + $0x58] sm:$0xff]  }
   0x4   :  { %v44_v7 = vld [vmem:[%s300_s2] sm:$0xff]  ;;  %v192_v8 = vcombine.high %v15_v6, %v15_v6  ;;  %v218_v12 = vld [vmem:[%s298_s1 + $0x68] sm:$0xff]   ;;  %v221_v15 = vld [vmem:[%s298_s1 + $0x50] sm:$0xff]   ;;  %v191_v18 = vcombine.low %v15_v6, %v15_v6 }
   0x5   :  { %47 = vperm.xlu0 %209, %v44_v7   ;;  %v217_v11 = vld [vmem:[%s298_s1] sm:$0xff]   ;;  %v222_v16 = vld [vmem:[%s298_s1 + $0x48] sm:$0xff]  }
   0x6   :  { %147 = vmatpush1.bf16.msra.mxu0 %v211_v2  ;;  %207 = vmatprep.mubr.msk.bf16.mxu0 %vm140_vm0, %v192_v8  ;;  %v219_v13 = vld [vmem:[%s298_s1 + $0x60] sm:$0xff]  }
   0x7   :  { %148 = vmatprep.subr.bf16.mxu0 %v226_v0  ;;  %v223_v17 = vld [vmem:[%s298_s1 + $0x40] sm:$0xff]  }
   0xa   :  { %149 = vmatpush1.bf16.msra.mxu0 %v212_v3 }
   0xb   :  { %150 = vmatprep.subr.bf16.mxu0 %v226_v0 }
   0xe   :  { %151 = vmatpush1.bf16.msra.mxu0 %v213_v4 }
   0xf   :  { %152 = vmatprep.subr.bf16.mxu0 %v226_v0 }
  0x12   :  { %153 = vmatpush1.bf16.msra.mxu0 %v214_v5 }
  0x13   :  { %154 = vmatprep.subr.bf16.mxu0 %v226_v0 }
  0x16   :  { %155 = vmatpush1.bf16.msra.mxu0 %v215_v9 }
  0x17   :  { %156 = vmatprep.subr.bf16.mxu0 %v226_v0 }
  0x1a   :  { %157 = vmatpush1.bf16.msra.mxu0 %v216_v10 }
  0x1b   :  { %158 = vmatprep.subr.bf16.mxu0 %v226_v0 }
  0x1e   :  { %159 = vmatpush1.bf16.msra.mxu0 %v217_v11 }
  0x1f   :  { %164 = vmatprep.subr.bf16.mxu0 %v226_v0 }
  0x22   :  { %165 = vmatpush2.bf16.msra.mxu0 %v218_v12 }
  0x23   :  { %166 = vmatprep.subr.bf16.mxu0 %v226_v0 }
  0x26   :  { %167 = vmatpush2.bf16.msra.mxu0 %v219_v13 }
  0x27   :  { %168 = vmatprep.subr.bf16.mxu0 %v226_v0 }
  0x2a   :  { %169 = vmatpush2.bf16.msra.mxu0 %v220_v14 }
  0x2b   :  { %170 = vmatprep.subr.bf16.mxu0 %v226_v0 }
  0x2e   :  { %171 = vmatpush2.bf16.msra.mxu0 %v221_v15 }
  0x2f   :  { %172 = vmatprep.subr.bf16.mxu0 %v226_v0 }
  0x32   :  { %173 = vmatpush2.bf16.msra.mxu0 %v222_v16 }
  0x33   :  { %174 = vmatprep.subr.bf16.mxu0 %v226_v0 }
  0x36   :  { %175 = vmatpush2.bf16.msra.mxu0 %v223_v17 }
  0x39   :  { %177 = vmatmul.mubr.bf16.vlgmr.msra.gmra.mxu0 %v191_v18 }
  0x80   :  { %v48_v19 = vpop.permute.xlu0 %47 }
  0xf9   :  { %v178_v20 = vpop.f32.mrf.mxu0 }
  0xfa   :  { %v179_v21 = vadd.f32 %v178_v20, %v48_v19 }
  0xfb   :  { %v180_v22 = vpop.f32.mrf.mxu0 }
  0xfc   :  { %v184_v23 = vmax.f32 %v179_v21, 0.0 }
  0xfd   :  { %v181_v24 = vpop.f32.mrf.mxu0 }
  0xfe   :  { %v185_v25 = vpack.c.bf16 %v184_v23, %v184_v23 }
  0xff   :  { %v182_v26 = vpop.f32.mrf.mxu0 }
 0x100   :  { %186 = vst [vmem:[%s301_s3] sm:$0xf] %v185_v25 }

// kernel: encoder_forward.83
= control target key start
LH: loop header
LB: loop body
LE: loop exit
PB: predicated region body
PF: predicated region fallthrough
CT: control target
= control target key end

     0   :  { %v348_v1 = vmov 0.0   ;;  %vm349_vm0 = vmmov 0   ;;  %v350_v3 = vmov 0   ;;  %vm177_vm1 = vcmask 261120   ;;  %s437_s1 = inlined_call_operand.vmem [shape: bf16[288,128], index: 1, kind: input, shape index: {}]   ;;  %s438_s0 = inlined_call_operand.vmem [shape: bf16[8,288], index: 0, kind: input, shape index: {}]   ;;  %s439_s2 = inlined_call_operand.vmem [shape: f32[8,1], index: 2, kind: input, shape index: {}]   ;;  %s440_s3 = inlined_call_operand.vmem [shape: bf16[8,128], index: 3, kind: output, shape index: {}]  }
   0x1   :  { %v327_v0 = vld [vmem:[%s437_s1 + $0x78] sm:$0xff]   ;;  %315 = vmatprep.subr.bf16.mxu1 %v348_v1  ;;  %319 = vmatprep.mubr.msk.bf16.mxu1 %vm349_vm0, %v348_v1  ;;  %v329_v4 = vld [vmem:[%s437_s1 + $0x70] sm:$0xff]   ;;  %v331_v6 = vld [vmem:[%s437_s1 + $0x68] sm:$0xff]  }
   0x2   :  { %v328_v2 = vld [vmem:[%s437_s1 + $0x38] sm:$0xff]   ;;  %326 = vset.pattern.permute.xlu0 %v350_v3  ;;  %290 = vmatprep.subr.bf16.mxu0 %v327_v0  ;;  %v330_v5 = vld [vmem:[%s437_s1 + $0x30] sm:$0xff]   ;;  %v332_v7 = vld [vmem:[%s437_s1 + $0x28] sm:$0xff]  }
   0x3   :  { %291 = vmatpush3.bf16.msra.mxu0 %v328_v2  ;;  %v333_v8 = vld [vmem:[%s437_s1 + $0x60] sm:$0xff]   ;;  %v335_v10 = vld [vmem:[%s437_s1 + $0x58] sm:$0xff]   ;;  %v341_v11 = vld [vmem:[%s437_s1 + $0x88] sm:$0xff]  }
   0x4   :  { %292 = vmatprep.subr.bf16.mxu0 %v329_v4  ;;  %v334_v9 = vld [vmem:[%s437_s1 + $0x20] sm:$0xff]   ;;  %v336_v12 = vld [vmem:[%s437_s1 + $0x18] sm:$0xff]   ;;  %v337_v13 = vld [vmem:[%s437_s1 + $0x50] sm:$0xff]   ;;  %316 = vmatpush3.bf16.msra.mxu1 %v341_v11 }
   0x5   :  { %317 = vmatprep.subr.bf16.mxu1 %v348_v1  ;;  %v344_v14 = vld [vmem:[%s437_s1 + $0x80] sm:$0xff]   ;;  %v338_v16 = vld [vmem:[%s437_s1 + $0x10] sm:$0xff]   ;;  %v347_v18 = vld [vmem:[%s438_s0 + $0x8] ss:$0 sps:$4 sm:$0xff]  }
   0x6   :  { %v15_v15 = vld [vmem:[%s438_s0] sm:$0xff]  ;;  %v339_v20 = vld [vmem:[%s437_s1 + $0x48] sm:$0xff]  }
   0x7   :  { %293 = vmatpush3.bf16.msra.mxu0 %v330_v5  ;;  %v269_v17 = vcombine.high %v15_v15, %v15_v15  ;;  %v53_v19 = vld [vmem:[%s439_s2] sm:$0xff]  ;;  %v340_v21 = vld [vmem:[%s437_s1 + $0x8] sm:$0xff]   ;;  %v268_v24 = vcombine.low %v15_v15, %v15_v15 }
   0x8   :  { %294 = vmatprep.subr.bf16.mxu0 %v331_v6  ;;  %318 = vmatpush3.bf16.msra.mxu1 %v344_v14  ;;  %v342_v22 = vld [vmem:[%s437_s1 + $0x40] sm:$0xff]  }
   0x9   :  { %213 = vmatprep.mubr.bf16.mxu0 %v269_v17  ;;  %56 = vperm.xlu0 %326, %v53_v19   ;;  %v343_v23 = vld [vmem:[%s437_s1] sm:$0xff]  }
   0xb   :  { %295 = vmatpush3.bf16.msra.mxu0 %v332_v7  ;;  %320 = vmatmul.mubr.msk.bf16.vlgmr.msra.gmra.mxu1 %vm177_vm1, %v347_v18 }
   0xc   :  { %296 = vmatprep.subr.bf16.mxu0 %v333_v8 }
   0xf   :  { %297 = vmatpush3.bf16.msra.mxu0 %v334_v9 }
  0x10   :  { %298 = vmatprep.subr.bf16.mxu0 %v335_v10 }
  0x13   :  { %299 = vmatpush3.bf16.msra.mxu0 %v336_v12 }
  0x14   :  { %300 = vmatprep.subr.bf16.mxu0 %v337_v13 }
  0x17   :  { %301 = vmatpush3.bf16.msra.mxu0 %v338_v16 }
  0x18   :  { %302 = vmatprep.subr.bf16.mxu0 %v339_v20 }
  0x1b   :  { %303 = vmatpush3.bf16.msra.mxu0 %v340_v21 }
  0x1c   :  { %304 = vmatprep.subr.bf16.mxu0 %v342_v22 }
  0x1f   :  { %305 = vmatpush3.bf16.msra.mxu0 %v343_v23 }
  0x22   :  { %214 = vmatmul.mubr.bf16.vlgmr.msra.gmra.mxu0 %v268_v24 }
  0x84   :  { %v57_v31 = vpop.permute.xlu0 %56 }
  0xcb   :  { %v255_v25 = vpop.f32.mrf.mxu1 }
  0xcd   :  { %v321_v26 = vpop.f32.mrf.mxu1 }
  0xcf   :  { %v258_v27 = vpop.f32.mrf.mxu1 }
  0xd1   :  { %v322_v28 = vpop.f32.mrf.mxu1 }
  0xe2   :  { %v306_v29 = vpop.f32.mrf.mxu0 }
  0xe4   :  { %v307_v30 = vpop.f32.mrf.mxu0 }
  0xe5   :  { %v308_v32 = vadd.f32 %v307_v30, %v306_v29 }
  0xe6   :  { %v309_v33 = vpop.f32.mrf.mxu0 }
  0xe7   :  { %v216_v34 = vadd.f32 %v308_v32, %v57_v31 }
  0xe8   :  { %v310_v35 = vpop.f32.mrf.mxu0 }
  0xe9   :  { %v256_v36 = vadd.f32 %v255_v25, %v216_v34 }
  0xeb   :  { %v261_v37 = vmax.f32 %v256_v36, 0.0 }
  0xed   :  { %v262_v38 = vpack.c.bf16 %v261_v37, %v261_v37 }
  0xef   :  { %263 = vst [vmem:[%s440_s3] sm:$0xf] %v262_v38 }

// kernel: encoder_forward.84
= control target key start
LH: loop header
LB: loop body
LE: loop exit
PB: predicated region body
PF: predicated region fallthrough
CT: control target
= control target key end

     0   :  { %v413_v1 = vmov 0.0   ;;  %vm414_vm0 = vmmov 0   ;;  %v415_v3 = vmov 0   ;;  %vm217_vm1 = vcmask 916480   ;;  %s517_s1 = inlined_call_operand.vmem [shape: bf16[368,128], index: 1, kind: input, shape index: {}]   ;;  %s518_s0 = inlined_call_operand.vmem [shape: bf16[8,368], index: 0, kind: input, shape index: {}]   ;;  %s519_s2 = inlined_call_operand.vmem [shape: f32[8,1], index: 2, kind: input, shape index: {}]   ;;  %s520_s3 = inlined_call_operand.vmem [shape: bf16[8,128], index: 3, kind: output, shape index: {}]  }
   0x1   :  { %v387_v0 = vld [vmem:[%s517_s1 + $0x78] sm:$0xff]   ;;  %365 = vmatprep.subr.bf16.mxu1 %v413_v1  ;;  %379 = vmatprep.mubr.msk.bf16.mxu1 %vm414_vm0, %v413_v1  ;;  %v389_v4 = vld [vmem:[%s517_s1 + $0x70] sm:$0xff]   ;;  %v392_v7 = vld [vmem:[%s517_s1 + $0x68] sm:$0xff]  }
   0x2   :  { %v388_v2 = vld [vmem:[%s517_s1 + $0x38] sm:$0xff]   ;;  %386 = vset.pattern.permute.xlu0 %v415_v3  ;;  %335 = vmatprep.subr.bf16.mxu0 %v387_v0  ;;  %v390_v5 = vld [vmem:[%s517_s1 + $0x30] sm:$0xff]   ;;  %v393_v8 = vld [vmem:[%s517_s1 + $0x28] sm:$0xff]  }
   0x3   :  { %336 = vmatpush3.bf16.msra.mxu0 %v388_v2  ;;  %v391_v6 = vld [vmem:[%s517_s1 + $0xb0] sm:$0xff]   ;;  %v394_v9 = vld [vmem:[%s517_s1 + $0xa8] sm:$0xff]   ;;  %v395_v10 = vld [vmem:[%s517_s1 + $0x60] sm:$0xff]  }
   0x4   :  { %337 = vmatprep.subr.bf16.mxu0 %v389_v4  ;;  %366 = vmatpush3.bf16.msra.mxu1 %v391_v6  ;;  %v397_v11 = vld [vmem:[%s517_s1 + $0xa0] sm:$0xff]   ;;  %v398_v13 = vld [vmem:[%s517_s1 + $0x58] sm:$0xff]   ;;  %v401_v16 = vld [vmem:[%s517_s1 + $0x50] sm:$0xff]  }
   0x5   :  { %367 = vmatprep.subr.bf16.mxu1 %v413_v1  ;;  %v396_v12 = vld [vmem:[%s517_s1 + $0x20] sm:$0xff]   ;;  %v400_v14 = vld [vmem:[%s517_s1 + $0x98] sm:$0xff]   ;;  %v403_v17 = vld [vmem:[%s517_s1 + $0x90] sm:$0xff]  }
   0x6   :  { %v399_v15 = vld [vmem:[%s517_s1 + $0x18] sm:$0xff]   ;;  %v402_v18 = vld [vmem:[%s517_s1 + $0x10] sm:$0xff]   ;;  %v404_v19 = vld [vmem:[%s517_s1 + $0x48] sm:$0xff]  }
   0x7   :  { %338 = vmatpush3.bf16.msra.mxu0 %v390_v5  ;;  %v406_v20 = vld [vmem:[%s517_s1 + $0x88] sm:$0xff]   ;;  %v15_v22 = vld [vmem:[%s518_s0] sm:$0xff] }
   0x8   :  { %339 = vmatprep.subr.bf16.mxu0 %v392_v7  ;;  %368 = vmatpush3.bf16.msra.mxu1 %v394_v9  ;;  %v405_v21 = vld [vmem:[%s517_s1 + $0x8] sm:$0xff]   ;;  %v407_v23 = vld [vmem:[%s517_s1 + $0x40] sm:$0xff]   ;;  %v309_v24 = vcombine.high %v15_v22, %v15_v22  ;;  %v308_v29 = vcombine.low %v15_v22, %v15_v22 }
   0x9   :  { %369 = vmatprep.subr.bf16.mxu1 %v413_v1  ;;  %v63_v25 = vld [vmem:[%s519_s2] sm:$0xff]  ;;  %v412_v28 = vld [vmem:[%s518_s0 + $0x8] ss:$0 sps:$4 sm:$0xff]  }
   0xa   :  { %66 = vperm.xlu0 %386, %v63_v25   ;;  %v409_v26 = vld [vmem:[%s517_s1 + $0x80] sm:$0xff]   ;;  %253 = vmatprep.mubr.bf16.mxu0 %v309_v24 }
   0xb   :  { %340 = vmatpush3.bf16.msra.mxu0 %v393_v8  ;;  %v408_v27 = vld [vmem:[%s517_s1] sm:$0xff]  }
   0xc   :  { %341 = vmatprep.subr.bf16.mxu0 %v395_v10  ;;  %370 = vmatpush3.bf16.msra.mxu1 %v397_v11 }
   0xd   :  { %371 = vmatprep.subr.bf16.mxu1 %v413_v1 }
   0xf   :  { %342 = vmatpush3.bf16.msra.mxu0 %v396_v12 }
  0x10   :  { %343 = vmatprep.subr.bf16.mxu0 %v398_v13  ;;  %372 = vmatpush3.bf16.msra.mxu1 %v400_v14 }
  0x11   :  { %373 = vmatprep.subr.bf16.mxu1 %v413_v1 }
  0x13   :  { %344 = vmatpush3.bf16.msra.mxu0 %v399_v15 }
  0x14   :  { %345 = vmatprep.subr.bf16.mxu0 %v401_v16  ;;  %374 = vmatpush3.bf16.msra.mxu1 %v403_v17 }
  0x15   :  { %375 = vmatprep.subr.bf16.mxu1 %v413_v1 }
  0x17   :  { %346 = vmatpush3.bf16.msra.mxu0 %v402_v18 }
  0x18   :  { %347 = vmatprep.subr.bf16.mxu0 %v404_v19  ;;  %376 = vmatpush3.bf16.msra.mxu1 %v406_v20 }
  0x19   :  { %377 = vmatprep.subr.bf16.mxu1 %v413_v1 }
  0x1b   :  { %348 = vmatpush3.bf16.msra.mxu0 %v405_v21 }
  0x1c   :  { %349 = vmatprep.subr.bf16.mxu0 %v407_v23  ;;  %378 = vmatpush3.bf16.msra.mxu1 %v409_v26 }
  0x1f   :  { %350 = vmatpush3.bf16.msra.mxu0 %v408_v27  ;;  %380 = vmatmul.mubr.msk.bf16.vlgmr.msra.gmra.mxu1 %vm217_vm1, %v412_v28 }
  0x22   :  { %254 = vmatmul.mubr.bf16.vlgmr.msra.gmra.mxu0 %v308_v29 }
  0x85   :  { %v67_v34 = vpop.permute.xlu0 %66 }
  0xdf   :  { %v295_v30 = vpop.f32.mrf.mxu1 }
  0xe1   :  { %v381_v32 = vpop.f32.mrf.mxu1 }
  0xe2   :  { %v351_v31 = vpop.f32.mrf.mxu0 }
  0xe3   :  { %v298_v36 = vpop.f32.mrf.mxu1 }
  0xe4   :  { %v352_v33 = vpop.f32.mrf.mxu0 }
  0xe5   :  { %v353_v35 = vadd.f32 %v352_v33, %v351_v31  ;;  %v382_v39 = vpop.f32.mrf.mxu1 }
  0xe6   :  { %v354_v37 = vpop.f32.mrf.mxu0 }
  0xe7   :  { %v256_v38 = vadd.f32 %v353_v35, %v67_v34 }
  0xe8   :  { %v355_v40 = vpop.f32.mrf.mxu0 }
  0xe9   :  { %v296_v41 = vadd.f32 %v295_v30, %v256_v38 }
  0xeb   :  { %v301_v42 = vmax.f32 %v296_v41, 0.0 }
  0xed   :  { %v302_v43 = vpack.c.bf16 %v301_v42, %v301_v42 }
  0xef   :  { %303 = vst [vmem:[%s520_s3] sm:$0xf] %v302_v43 }

// kernel: encoder_forward.85
= control target key start
LH: loop header
LB: loop body
LE: loop exit
PB: predicated region body
PF: predicated region fallthrough
CT: control target
= control target key end

     0   :  { %v121_v0 = vmov 0.0   ;;  %vm122_vm0 = vmmov 0   ;;  %v123_v2 = vmov 0   ;;  %vm46_vm1 = vcmask 392192   ;;  %s162_s1 = inlined_call_operand.vmem [shape: bf16[48,128], index: 1, kind: input, shape index: {}]   ;;  %s163_s2 = inlined_call_operand.vmem [shape: f32[8,1], index: 2, kind: input, shape index: {}]   ;;  %s164_s0 = inlined_call_operand.vmem [shape: bf16[8,48], index: 0, kind: input, shape index: {}]   ;;  %s165_s3 = inlined_call_operand.vmem [shape: bf16[8,128], index: 3, kind: output, shape index: {}]  }
   0x1   :  { %104 = vmatprep.subr.bf16.mxu0 %v121_v0  ;;  %v118_v1 = vld [vmem:[%s162_s1 + $0x10] sm:$0xff]   ;;  %110 = vmatprep.mubr.msk.bf16.mxu0 %vm122_vm0, %v121_v0  ;;  %v119_v3 = vld [vmem:[%s162_s1 + $0x8] sm:$0xff]   ;;  %v22_v4 = vld [vmem:[%s163_s2] sm:$0xff] }
   0x2   :  { %117 = vset.pattern.permute.xlu0 %v123_v2  ;;  %105 = vmatpush3.bf16.msra.mxu0 %v118_v1  ;;  %v120_v5 = vld [vmem:[%s162_s1] sm:$0xff]  }
   0x3   :  { %106 = vmatprep.subr.bf16.mxu0 %v121_v0  ;;  %25 = vperm.xlu0 %117, %v22_v4   ;;  %v15_v6 = vld [vmem:[%s164_s0] sm:$0xf] }
   0x6   :  { %107 = vmatpush3.bf16.msra.mxu0 %v119_v3 }
   0x7   :  { %108 = vmatprep.subr.bf16.mxu0 %v121_v0 }
   0xa   :  { %109 = vmatpush3.bf16.msra.mxu0 %v120_v5 }
   0xd   :  { %111 = vmatmul.mubr.msk.bf16.vlgmr.msra.gmra.mxu0 %vm46_vm1, %v15_v6 }
  0x7e   :  { %v26_v7 = vpop.permute.xlu0 %25 }
  0xcd   :  { %v84_v8 = vpop.f32.mrf.mxu0 }
  0xce   :  { %v85_v9 = vadd.f32 %v84_v8, %v26_v7 }
  0xcf   :  { %v112_v10 = vpop.f32.mrf.mxu0 }
  0xd0   :  { %v90_v11 = vpack.c.bf16 %v85_v9, %v85_v9 }
  0xd1   :  { %v87_v12 = vpop.f32.mrf.mxu0 }
  0xd2   :  { %91 = vst [vmem:[%s165_s3] sm:$0xf] %v90_v11 }
  0xd3   :  { %v113_v13 = vpop.f32.mrf.mxu0 }

// kernel: encoder_forward.92
= control target key start
LH: loop header
LB: loop body
LE: loop exit
PB: predicated region body
PF: predicated region fallthrough
CT: control target
= control target key end

     0   :  { %v181_v0 = vmov 0.0   ;;  %vm182_vm0 = vmmov 0   ;;  %v183_v2 = vmov 0   ;;  %vm74_vm1 = vcmask 654336   ;;  %s231_s1 = inlined_call_operand.vmem [shape: bf16[80,128], index: 1, kind: input, shape index: {}]   ;;  %s232_s2 = inlined_call_operand.vmem [shape: f32[16,1], index: 2, kind: input, shape index: {}]   ;;  %s233_s0 = inlined_call_operand.vmem [shape: bf16[16,80], index: 0, kind: input, shape index: {}]   ;;  %s234_s3 = inlined_call_operand.vmem [shape: bf16[16,128], index: 3, kind: output, shape index: {}]  }
   0x1   :  { %157 = vmatprep.subr.bf16.mxu0 %v181_v0  ;;  %v175_v1 = vld [vmem:[%s231_s1 + $0x20] sm:$0xff]   ;;  %167 = vmatprep.mubr.msk.bf16.mxu0 %vm182_vm0, %v181_v0  ;;  %v176_v3 = vld [vmem:[%s231_s1 + $0x18] sm:$0xff]   ;;  %v177_v4 = vld [vmem:[%s231_s1 + $0x10] sm:$0xff]  }
   0x2   :  { %174 = vset.pattern.permute.xlu0 %v183_v2  ;;  %158 = vmatpush3.bf16.msra.mxu0 %v175_v1  ;;  %v27_v5 = vld [vmem:[%s232_s2] sm:$0xff]  ;;  %v28_v6 = vld [vmem:[%s232_s2 + $0x8] sm:$0xff] }
   0x3   :  { %159 = vmatprep.subr.bf16.mxu0 %v181_v0  ;;  %31 = vperm.xlu0 %174, %v27_v5   ;;  %v178_v7 = vld [vmem:[%s231_s1 + $0x8] sm:$0xff]   ;;  %v179_v8 = vld [vmem:[%s231_s1] sm:$0xff]  }
   0x4   :  { %v180_v9 = vld [vmem:[%s233_s0] sm:$0xff]  }
   0x6   :  { %160 = vmatpush3.bf16.msra.mxu0 %v176_v3 }
   0x7   :  { %161 = vmatprep.subr.bf16.mxu0 %v181_v0  ;;  %36 = vperm.xlu0 %174, %v28_v6  }
   0xa   :  { %162 = vmatpush3.bf16.msra.mxu0 %v177_v4 }
   0xb   :  { %163 = vmatprep.subr.bf16.mxu0 %v181_v0 }
   0xe   :  { %164 = vmatpush3.bf16.msra.mxu0 %v178_v7 }
   0xf   :  { %165 = vmatprep.subr.bf16.mxu0 %v181_v0 }
  0x12   :  { %166 = vmatpush3.bf16.msra.mxu0 %v179_v8 }
  0x15   :  { %168 = vmatmul.mubr.msk.bf16.vlgmr.msra.gmra.mxu0 %vm74_vm1, %v180_v9 }
  0x7e   :  { %v32_v10 = vpop.permute.xlu0 %31 }
  0x82   :  { %v37_v14 = vpop.permute.xlu0 %36 }
  0xd5   :  { %v112_v11 = vpop.f32.mrf.mxu0 }
  0xd6   :  { %v113_v13 = vadd.f32 %v112_v11, %v32_v10 }
  0xd7   :  { %v169_v12 = vpop.f32.mrf.mxu0 }
  0xd8   :  { %v119_v18 = vmax.f32 %v113_v13, 0.0 }
  0xd9   :  { %v115_v15 = vpop.f32.mrf.mxu0 }
  0xda   :  { %v116_v16 = vadd.f32 %v115_v15, %v37_v14 }
  0xdb   :  { %v170_v17 = vpop.f32.mrf.mxu0 }
  0xdc   :  { %v120_v19 = vmax.f32 %v116_v16, 0.0 }
  0xde   :  { %v149_v20 = vpack.c.bf16 %v120_v19, %v119_v18 }
  0xe0   :  { %150 = vst [vmem:[%s234_s3] sm:$0xff] %v149_v20  }

// kernel: encoder_forward.96
= control target key start
LH: loop header
LB: loop body
LE: loop exit
PB: predicated region body
PF: predicated region fallthrough
CT: control target
= control target key end

     0   :  { %v153_v0 = vmov 0.0   ;;  %vm154_vm0 = vmmov 0   ;;  %v155_v2 = vmov 0   ;;  %vm58_vm1 = vcmask 392192   ;;  %s197_s1 = inlined_call_operand.vmem [shape: bf16[48,128], index: 1, kind: input, shape index: {}]   ;;  %s198_s2 = inlined_call_operand.vmem [shape: f32[16,1], index: 2, kind: input, shape index: {}]   ;;  %s199_s0 = inlined_call_operand.vmem [shape: bf16[16,48], index: 0, kind: input, shape index: {}]   ;;  %s200_s3 = inlined_call_operand.vmem [shape: bf16[16,128], index: 3, kind: output, shape index: {}]  }
   0x1   :  { %135 = vmatprep.subr.bf16.mxu0 %v153_v0  ;;  %v149_v1 = vld [vmem:[%s197_s1 + $0x10] sm:$0xff]   ;;  %141 = vmatprep.mubr.msk.bf16.mxu0 %vm154_vm0, %v153_v0  ;;  %v150_v3 = vld [vmem:[%s197_s1 + $0x8] sm:$0xff]   ;;  %v23_v4 = vld [vmem:[%s198_s2] sm:$0xff] }
   0x2   :  { %148 = vset.pattern.permute.xlu0 %v155_v2  ;;  %136 = vmatpush3.bf16.msra.mxu0 %v149_v1  ;;  %v151_v5 = vld [vmem:[%s197_s1] sm:$0xff]   ;;  %v24_v6 = vld [vmem:[%s198_s2 + $0x8] sm:$0xff] }
   0x3   :  { %137 = vmatprep.subr.bf16.mxu0 %v153_v0  ;;  %27 = vperm.xlu0 %148, %v23_v4   ;;  %v152_v7 = vld [vmem:[%s199_s0] sm:$0xff]  }
   0x6   :  { %138 = vmatpush3.bf16.msra.mxu0 %v150_v3 }
   0x7   :  { %139 = vmatprep.subr.bf16.mxu0 %v153_v0  ;;  %32 = vperm.xlu0 %148, %v24_v6  }
   0xa   :  { %140 = vmatpush3.bf16.msra.mxu0 %v151_v5 }
   0xd   :  { %142 = vmatmul.mubr.msk.bf16.vlgmr.msra.gmra.mxu0 %vm58_vm1, %v152_v7 }
  0x7e   :  { %v28_v8 = vpop.permute.xlu0 %27 }
  0x82   :  { %v33_v11 = vpop.permute.xlu0 %32 }
  0xcd   :  { %v96_v9 = vpop.f32.mrf.mxu0 }
  0xce   :  { %v97_v13 = vadd.f32 %v96_v9, %v28_v8 }
  0xcf   :  { %v143_v10 = vpop.f32.mrf.mxu0 }
  0xd1   :  { %v99_v12 = vpop.f32.mrf.mxu0 }
  0xd2   :  { %v100_v14 = vadd.f32 %v99_v12, %v33_v11 }
  0xd3   :  { %v144_v15 = vpop.f32.mrf.mxu0 }
  0xd4   :  { %v129_v16 = vpack.c.bf16 %v100_v14, %v97_v13 }
  0xd6   :  { %130 = vst [vmem:[%s200_s3] sm:$0xff] %v129_v16  }

// kernel: encoder_forward.101
= control target key start
LH: loop header
LB: loop body
LE: loop exit
PB: predicated region body
PF: predicated region fallthrough
CT: control target
= control target key end

     0   :  { %v430_v0 = vmov 0   ;;  %vm252_vm0 = vcmask 392192   ;;  %s556_s1 = inlined_call_operand.vmem [shape: bf16[432,128], index: 1, kind: input, shape index: {}]   ;;  %s557_s0 = inlined_call_operand.vmem [shape: bf16[8,432], index: 0, kind: input, shape index: {}]   ;;  %s558_s2 = inlined_call_operand.vmem [shape: f32[8,1], index: 2, kind: input, shape index: {}]   ;;  %s559_s3 = inlined_call_operand.vmem [shape: bf16[8,128], index: 3, kind: output, shape index: {}]  }
   0x1   :  { %296 = vmatprep.subr.bf16.mxu1 %v430_v0  ;;  %v399_v1 = vld [vmem:[%s556_s1 + $0x78] sm:$0xff]   ;;  %398 = vset.pattern.permute.xlu0 %v430_v0  ;;  %v402_v4 = vld [vmem:[%s556_s1 + $0x70] sm:$0xff]   ;;  %v405_v7 = vld [vmem:[%s556_s1 + $0x68] sm:$0xff]  }
   0x2   :  { %v400_v2 = vld [vmem:[%s556_s1 + $0xb8] sm:$0xff]   ;;  %375 = vmatprep.subr.bf16.mxu0 %v399_v1  ;;  %v403_v5 = vld [vmem:[%s556_s1 + $0xb0] sm:$0xff]   ;;  %v406_v8 = vld [vmem:[%s556_s1 + $0xa8] sm:$0xff]  }
   0x3   :  { %v401_v3 = vld [vmem:[%s556_s1 + $0x38] sm:$0xff]   ;;  %297 = vmatpush1.bf16.msra.mxu1 %v400_v2  ;;  %v404_v6 = vld [vmem:[%s556_s1 + $0x30] sm:$0xff]   ;;  %v407_v9 = vld [vmem:[%s556_s1 + $0x28] sm:$0xff]  }
   0x4   :  { %376 = vmatpush3.bf16.msra.mxu0 %v401_v3  ;;  %298 = vmatprep.subr.bf16.mxu1 %v430_v0  ;;  %v408_v10 = vld [vmem:[%s556_s1 + $0x60] sm:$0xff]   ;;  %v411_v13 = vld [vmem:[%s556_s1 + $0x58] sm:$0xff]   ;;  %v414_v16 = vld [vmem:[%s556_s1 + $0x50] sm:$0xff]  }
   0x5   :  { %377 = vmatprep.subr.bf16.mxu0 %v402_v4  ;;  %v409_v11 = vld [vmem:[%s556_s1 + $0xa0] sm:$0xff]   ;;  %v412_v14 = vld [vmem:[%s556_s1 + $0x98] sm:$0xff]   ;;  %v415_v17 = vld [vmem:[%s556_s1 + $0x90] sm:$0xff]  }
   0x6   :  { %v410_v12 = vld [vmem:[%s556_s1 + $0x20] sm:$0xff]   ;;  %v413_v15 = vld [vmem:[%s556_s1 + $0x18] sm:$0xff]   ;;  %v416_v18 = vld [vmem:[%s556_s1 + $0x10] sm:$0xff]  }
   0x7   :  { %299 = vmatpush1.bf16.msra.mxu1 %v403_v5  ;;  %v417_v19 = vld [vmem:[%s556_s1 + $0x48] sm:$0xff]   ;;  %v15_v22 = vld [vmem:[%s557_s0] sm:$0xff]  ;;  %v425_v31 = vld [vmem:[%s556_s1 + $0xd0] sm:$0xff]  }
   0x8   :  { %378 = vmatpush3.bf16.msra.mxu0 %v404_v6  ;;  %300 = vmatprep.subr.bf16.mxu1 %v430_v0  ;;  %v418_v20 = vld [vmem:[%s556_s1 + $0x88] sm:$0xff]   ;;  %v420_v23 = vld [vmem:[%s556_s1 + $0x40] sm:$0xff]   ;;  %v344_v24 = vcombine.high %v15_v22, %v15_v22  ;;  %v343_v30 = vcombine.low %v15_v22, %v15_v22 }
   0x9   :  { %379 = vmatprep.subr.bf16.mxu0 %v405_v7  ;;  %v419_v21 = vld [vmem:[%s556_s1 + $0x8] sm:$0xff]   ;;  %v421_v25 = vld [vmem:[%s556_s1 + $0x80] sm:$0xff]  }
   0xa   :  { %288 = vmatprep.mubr.bf16.mxu0 %v344_v24  ;;  %v16_v26 = vld [vmem:[%s557_s0 + $0x8] sm:$0xff]  ;;  %v71_v27 = vld [vmem:[%s558_s2] sm:$0xff] }
   0xb   :  { %301 = vmatpush1.bf16.msra.mxu1 %v406_v8  ;;  %v422_v28 = vld [vmem:[%s556_s1] sm:$0xff]   ;;  %v346_v29 = vcombine.high %v16_v26, %v16_v26  ;;  %74 = vperm.xlu0 %398, %v71_v27   ;;  %v426_v32 = vld [vmem:[%s556_s1 + $0xc8] sm:$0xff]   ;;  %v345_v34 = vcombine.low %v16_v26, %v16_v26 }
   0xc   :  { %380 = vmatpush3.bf16.msra.mxu0 %v407_v9  ;;  %302 = vmatprep.subr.bf16.mxu1 %v430_v0  ;;  %v427_v33 = vld [vmem:[%s556_s1 + $0xc0] sm:$0xff]  }
   0xd   :  { %381 = vmatprep.subr.bf16.mxu0 %v408_v10  ;;  %374 = vmatprep.mubr.msk.bf16.mxu1 %vm252_vm0, %v346_v29 }
   0xf   :  { %303 = vmatpush1.bf16.msra.mxu1 %v409_v11 }
  0x10   :  { %382 = vmatpush3.bf16.msra.mxu0 %v410_v12  ;;  %304 = vmatprep.subr.bf16.mxu1 %v430_v0 }
  0x11   :  { %383 = vmatprep.subr.bf16.mxu0 %v411_v13 }
  0x13   :  { %305 = vmatpush1.bf16.msra.mxu1 %v412_v14 }
  0x14   :  { %384 = vmatpush3.bf16.msra.mxu0 %v413_v15  ;;  %306 = vmatprep.subr.bf16.mxu1 %v430_v0 }
  0x15   :  { %385 = vmatprep.subr.bf16.mxu0 %v414_v16 }
  0x17   :  { %307 = vmatpush1.bf16.msra.mxu1 %v415_v17 }
  0x18   :  { %386 = vmatpush3.bf16.msra.mxu0 %v416_v18  ;;  %308 = vmatprep.subr.bf16.mxu1 %v430_v0 }
  0x19   :  { %387 = vmatprep.subr.bf16.mxu0 %v417_v19 }
  0x1b   :  { %309 = vmatpush1.bf16.msra.mxu1 %v418_v20 }
  0x1c   :  { %388 = vmatpush3.bf16.msra.mxu0 %v419_v21  ;;  %310 = vmatprep.subr.bf16.mxu1 %v430_v0 }
  0x1d   :  { %389 = vmatprep.subr.bf16.mxu0 %v420_v23 }
  0x1f   :  { %311 = vmatpush1.bf16.msra.mxu1 %v421_v25 }
  0x20   :  { %390 = vmatpush3.bf16.msra.mxu0 %v422_v28  ;;  %322 = vmatprep.subr.bf16.mxu1 %v430_v0 }
  0x23   :  { %289 = vmatmul.mubr.bf16.vlgmr.msra.gmra.mxu0 %v343_v30  ;;  %323 = vmatpush2.bf16.msra.mxu1 %v425_v31 }
  0x24   :  { %324 = vmatprep.subr.bf16.mxu1 %v430_v0 }
  0x27   :  { %325 = vmatpush2.bf16.msra.mxu1 %v426_v32 }
  0x28   :  { %326 = vmatprep.subr.bf16.mxu1 %v430_v0 }
  0x2b   :  { %327 = vmatpush2.bf16.msra.mxu1 %v427_v33 }
  0x2e   :  { %329 = vmatmul.mubr.bf16.vlgmr.msra.gmra.mxu1 %v345_v34 }
  0x86   :  { %v75_v40 = vpop.permute.xlu0 %74 }
  0xe3   :  { %v391_v35 = vpop.f32.mrf.mxu0 }
  0xe5   :  { %v392_v36 = vpop.f32.mrf.mxu0 }
  0xe6   :  { %v393_v38 = vadd.f32 %v392_v36, %v391_v35 }
  0xe7   :  { %v394_v37 = vpop.f32.mrf.mxu0 }
  0xe8   :  { %v291_v41 = vadd.f32 %v393_v38, %v75_v40 }
  0xe9   :  { %v395_v39 = vpop.f32.mrf.mxu0 }
  0xee   :  { %v330_v42 = vpop.f32.mrf.mxu1 }
  0xef   :  { %v331_v43 = vadd.f32 %v330_v42, %v291_v41 }
  0xf0   :  { %v332_v44 = vpop.f32.mrf.mxu1 }
  0xf1   :  { %v336_v45 = vmax.f32 %v331_v43, 0.0 }
  0xf2   :  { %v333_v46 = vpop.f32.mrf.mxu1 }
  0xf3   :  { %v337_v47 = vpack.c.bf16 %v336_v45, %v336_v45 }
  0xf4   :  { %v334_v48 = vpop.f32.mrf.mxu1 }
  0xf5   :  { %338 = vst [vmem:[%s559_s3] sm:$0xf] %v337_v47 }

// kernel: encoder_forward.102
= control target key start
LH: loop header
LB: loop body
LE: loop exit
PB: predicated region body
PF: predicated region fallthrough
CT: control target
= control target key end

     0   :  { %v166_v0 = vmov 0.0   ;;  %vm167_vm0 = vmmov 0   ;;  %v168_v2 = vmov 0   ;;  %vm66_vm1 = vcmask 523264   ;;  %s213_s1 = inlined_call_operand.vmem [shape: bf16[64,128], index: 1, kind: input, shape index: {}]   ;;  %s214_s2 = inlined_call_operand.vmem [shape: f32[16,1], index: 2, kind: input, shape index: {}]   ;;  %s215_s0 = inlined_call_operand.vmem [shape: bf16[16,64], index: 0, kind: input, shape index: {}]   ;;  %s216_s3 = inlined_call_operand.vmem [shape: bf16[16,128], index: 3, kind: output, shape index: {}]  }
   0x1   :  { %145 = vmatprep.subr.bf16.mxu0 %v166_v0  ;;  %v161_v1 = vld [vmem:[%s213_s1 + $0x18] sm:$0xff]   ;;  %153 = vmatprep.mubr.msk.bf16.mxu0 %vm167_vm0, %v166_v0  ;;  %v162_v3 = vld [vmem:[%s213_s1 + $0x10] sm:$0xff]   ;;  %v25_v4 = vld [vmem:[%s214_s2] sm:$0xff] }
   0x2   :  { %160 = vset.pattern.permute.xlu0 %v168_v2  ;;  %146 = vmatpush3.bf16.msra.mxu0 %v161_v1  ;;  %v163_v5 = vld [vmem:[%s213_s1 + $0x8] sm:$0xff]   ;;  %v164_v7 = vld [vmem:[%s213_s1] sm:$0xff]  }
   0x3   :  { %147 = vmatprep.subr.bf16.mxu0 %v166_v0  ;;  %29 = vperm.xlu0 %160, %v25_v4   ;;  %v26_v6 = vld [vmem:[%s214_s2 + $0x8] sm:$0xff]  ;;  %v165_v8 = vld [vmem:[%s215_s0] sm:$0xff]  }
   0x6   :  { %148 = vmatpush3.bf16.msra.mxu0 %v162_v3 }
   0x7   :  { %149 = vmatprep.subr.bf16.mxu0 %v166_v0  ;;  %34 = vperm.xlu0 %160, %v26_v6  }
   0xa   :  { %150 = vmatpush3.bf16.msra.mxu0 %v163_v5 }
   0xb   :  { %151 = vmatprep.subr.bf16.mxu0 %v166_v0 }
   0xe   :  { %152 = vmatpush3.bf16.msra.mxu0 %v164_v7 }
  0x11   :  { %154 = vmatmul.mubr.msk.bf16.vlgmr.msra.gmra.mxu0 %vm66_vm1, %v165_v8 }
  0x7e   :  { %v30_v9 = vpop.permute.xlu0 %29 }
  0x82   :  { %v35_v12 = vpop.permute.xlu0 %34 }
  0xd1   :  { %v104_v10 = vpop.f32.mrf.mxu0 }
  0xd2   :  { %v105_v14 = vadd.f32 %v104_v10, %v30_v9 }
  0xd3   :  { %v155_v11 = vpop.f32.mrf.mxu0 }
  0xd5   :  { %v107_v13 = vpop.f32.mrf.mxu0 }
  0xd6   :  { %v108_v15 = vadd.f32 %v107_v13, %v35_v12 }
  0xd7   :  { %v156_v16 = vpop.f32.mrf.mxu0 }
  0xd8   :  { %v138_v17 = vpack.c.bf16 %v108_v15, %v105_v14 }
  0xda   :  { %139 = vst [vmem:[%s216_s3] sm:$0xff] %v138_v17  }

// kernel: encoder_forward.115
= control target key start
LH: loop header
LB: loop body
LE: loop exit
PB: predicated region body
PF: predicated region fallthrough
CT: control target
= control target key end

     0   :  { %v287_v0 = vmov 0   ;;  %vm133_vm0 = vcmask 130048   ;;  %s365_s1 = inlined_call_operand.vmem [shape: bf16[144,128], index: 1, kind: input, shape index: {}]   ;;  %s366_s0 = inlined_call_operand.vmem [shape: bf16[32,144], index: 0, kind: input, shape index: {}]   ;;  %s367_s2 = inlined_call_operand.vmem [shape: f32[32,1], index: 2, kind: input, shape index: {}]   ;;  %s368_s3 = inlined_call_operand.vmem [shape: bf16[32,128], index: 3, kind: output, shape index: {}]  }
   0x1   :  { %140 = vmatprep.subr.bf16.mxu0 %v287_v0  ;;  %251 = vmatprep.subr.bf16.mxu1 %v287_v0  ;;  %v272_v1 = vld [vmem:[%s365_s1 + $0x38] sm:$0xff]   ;;  %v273_v2 = vld [vmem:[%s365_s1 + $0x30] sm:$0xff]   ;;  %v274_v3 = vld [vmem:[%s365_s1 + $0x28] sm:$0xff]  }
   0x2   :  { %271 = vset.pattern.permute.xlu1 %v287_v0  ;;  %270 = vset.pattern.permute.xlu0 %v287_v0  ;;  %v275_v4 = vld [vmem:[%s365_s1 + $0x20] sm:$0xff]   ;;  %v286_v6 = vld [vmem:[%s366_s0 + $0x14] ss:$8 sps:$4 sm:$0xff]   ;;  %v38_v11 = vld [vmem:[%s367_s2 + $0x8] sm:$0xff] }
   0x3   :  { %141 = vmatpush1.bf16.msra.mxu0 %v272_v1  ;;  %260 = vmatpush1.bf16.msra.mxu1 %v272_v1  ;;  %v283_v5 = vld [vmem:[%s366_s0 + $0x4] ss:$8 sps:$4 sm:$0xff]   ;;  %v39_v7 = vld [vmem:[%s367_s2 + $0x10] sm:$0xff]  ;;  %v40_v9 = vld [vmem:[%s367_s2 + $0x18] sm:$0xff] }
   0x4   :  { %142 = vmatprep.subr.bf16.mxu0 %v287_v0  ;;  %252 = vmatprep.subr.bf16.mxu1 %v287_v0  ;;  %v37_v8 = vld [vmem:[%s367_s2] sm:$0xff]  ;;  %v276_v10 = vld [vmem:[%s365_s1 + $0x18] sm:$0xff]   ;;  %v277_v12 = vld [vmem:[%s365_s1 + $0x10] sm:$0xff]  }
   0x5   :  { %230 = vmatprep.mubr.msk.bf16.mxu0 %vm133_vm0, %v283_v5  ;;  %53 = vperm.xlu1 %271, %v39_v7   ;;  %v278_v13 = vld [vmem:[%s365_s1 + $0x8] sm:$0xff]   ;;  %v279_v14 = vld [vmem:[%s365_s1] sm:$0xff]   ;;  %v284_v17 = vld [vmem:[%s366_s0 + $0x10] ss:$8 sps:$4 sm:$0xff]  }
   0x6   :  { %231 = vmatprep.mubr.msk.bf16.mxu1 %vm133_vm0, %v286_v6  ;;  %43 = vperm.xlu0 %270, %v37_v8   ;;  %v280_v15 = vld [vmem:[%s365_s1 + $0x40] sm:$0xff]  }
   0x7   :  { %143 = vmatpush1.bf16.msra.mxu0 %v273_v2  ;;  %261 = vmatpush1.bf16.msra.mxu1 %v273_v2  ;;  %v281_v16 = vld [vmem:[%s366_s0] ss:$8 sps:$4 sm:$0xff]  }
   0x8   :  { %144 = vmatprep.subr.bf16.mxu0 %v287_v0  ;;  %253 = vmatprep.subr.bf16.mxu1 %v287_v0 }
   0x9   :  { %58 = vperm.xlu1 %271, %v40_v9  }
   0xa   :  { %48 = vperm.xlu0 %270, %v38_v11  }
   0xb   :  { %145 = vmatpush1.bf16.msra.mxu0 %v274_v3  ;;  %262 = vmatpush1.bf16.msra.mxu1 %v274_v3 }
   0xc   :  { %146 = vmatprep.subr.bf16.mxu0 %v287_v0  ;;  %254 = vmatprep.subr.bf16.mxu1 %v287_v0 }
   0xf   :  { %147 = vmatpush1.bf16.msra.mxu0 %v275_v4  ;;  %263 = vmatpush1.bf16.msra.mxu1 %v275_v4 }
  0x10   :  { %148 = vmatprep.subr.bf16.mxu0 %v287_v0  ;;  %255 = vmatprep.subr.bf16.mxu1 %v287_v0 }
  0x13   :  { %149 = vmatpush1.bf16.msra.mxu0 %v276_v10  ;;  %264 = vmatpush1.bf16.msra.mxu1 %v276_v10 }
  0x14   :  { %150 = vmatprep.subr.bf16.mxu0 %v287_v0  ;;  %256 = vmatprep.subr.bf16.mxu1 %v287_v0 }
  0x17   :  { %151 = vmatpush1.bf16.msra.mxu0 %v277_v12  ;;  %265 = vmatpush1.bf16.msra.mxu1 %v277_v12 }
  0x18   :  { %152 = vmatprep.subr.bf16.mxu0 %v287_v0  ;;  %257 = vmatprep.subr.bf16.mxu1 %v287_v0 }
  0x1b   :  { %153 = vmatpush1.bf16.msra.mxu0 %v278_v13  ;;  %266 = vmatpush1.bf16.msra.mxu1 %v278_v13 }
  0x1c   :  { %154 = vmatprep.subr.bf16.mxu0 %v287_v0  ;;  %258 = vmatprep.subr.bf16.mxu1 %v287_v0 }
  0x1f   :  { %155 = vmatpush1.bf16.msra.mxu0 %v279_v14  ;;  %267 = vmatpush1.bf16.msra.mxu1 %v279_v14 }
  0x20   :  { %170 = vmatprep.subr.bf16.mxu0 %v287_v0  ;;  %259 = vmatprep.subr.bf16.mxu1 %v287_v0 }
  0x23   :  { %171 = vmatpush2.bf16.msra.mxu0 %v280_v15  ;;  %268 = vmatpush2.bf16.msra.mxu1 %v280_v15 }
  0x26   :  { %173 = vmatmul.mubr.bf16.vlgmr.msra.gmra.mxu0 %v281_v16  ;;  %181 = vmatmul.mubr.bf16.vlgmr.msra.gmra.mxu1 %v284_v17 }
  0x80   :  { %v54_v18 = vpop.permute.xlu1 %53 }
  0x81   :  { %v44_v19 = vpop.permute.xlu0 %43 }
  0x84   :  { %v59_v24 = vpop.permute.xlu1 %58 }
  0x85   :  { %v49_v25 = vpop.permute.xlu0 %48 }
  0xe6   :  { %v174_v20 = vpop.f32.mrf.mxu0  ;;  %v182_v21 = vpop.f32.mrf.mxu1 }
  0xe7   :  { %v175_v26 = vadd.f32 %v174_v20, %v44_v19  ;;  %v183_v27 = vadd.f32 %v182_v21, %v54_v18 }
  0xe8   :  { %v176_v22 = vpop.f32.mrf.mxu0  ;;  %v184_v23 = vpop.f32.mrf.mxu1 }
  0xe9   :  { %v189_v34 = vmax.f32 %v175_v26, 0.0  ;;  %v191_v35 = vmax.f32 %v183_v27, 0.0 }
  0xea   :  { %v177_v28 = vpop.f32.mrf.mxu0  ;;  %v185_v29 = vpop.f32.mrf.mxu1 }
  0xeb   :  { %v178_v30 = vadd.f32 %v177_v28, %v49_v25  ;;  %v186_v31 = vadd.f32 %v185_v29, %v59_v24 }
  0xec   :  { %v179_v32 = vpop.f32.mrf.mxu0  ;;  %v187_v33 = vpop.f32.mrf.mxu1 }
  0xed   :  { %v190_v36 = vmax.f32 %v178_v30, 0.0  ;;  %v192_v37 = vmax.f32 %v186_v31, 0.0 }
  0xef   :  { %v243_v38 = vpack.c.bf16 %v190_v36, %v189_v34  ;;  %v248_v39 = vpack.c.bf16 %v192_v37, %v191_v35 }
  0xf1   :  { %244 = vst [vmem:[%s368_s3] sm:$0xff] %v243_v38   ;;  %250 = vst [vmem:[%s368_s3 + $0x8] sm:$0xff] %v248_v39  }

// kernel: encoder_forward.119
= control target key start
LH: loop header
LB: loop body
LE: loop exit
PB: predicated region body
PF: predicated region fallthrough
CT: control target
= control target key end

     0   :  { %v219_v1 = vmov 0   ;;  %vm85_vm0 = vcmask 523264   ;;  %s278_s1 = inlined_call_operand.vmem [shape: bf16[64,128], index: 1, kind: input, shape index: {}]   ;;  %s279_s0 = inlined_call_operand.vmem [shape: bf16[32,64], index: 0, kind: input, shape index: {}]   ;;  %s280_s2 = inlined_call_operand.vmem [shape: f32[32,1], index: 2, kind: input, shape index: {}]   ;;  %s281_s3 = inlined_call_operand.vmem [shape: bf16[32,128], index: 3, kind: output, shape index: {}]  }
   0x1   :  { %v213_v0 = vld [vmem:[%s278_s1 + $0x18] sm:$0xff]   ;;  %212 = vset.pattern.permute.xlu1 %v219_v1  ;;  %211 = vset.pattern.permute.xlu0 %v219_v1  ;;  %v214_v2 = vld [vmem:[%s278_s1 + $0x10] sm:$0xff]   ;;  %v215_v3 = vld [vmem:[%s278_s1 + $0x8] sm:$0xff]  }
   0x2   :  { %198 = vmatprep.subr.bf16.mxu0 %v213_v0  ;;  %v217_v4 = vld [vmem:[%s279_s0] sm:$0xff]   ;;  %v29_v5 = vld [vmem:[%s280_s2 + $0x10] sm:$0xff]  ;;  %v30_v8 = vld [vmem:[%s280_s2 + $0x18] sm:$0xff] }
   0x3   :  { %199 = vmatpush3.bf16.msra.mxu0 %v213_v0  ;;  %206 = vmatprep.mubr.msk.bf16.mxu0 %vm85_vm0, %v217_v4  ;;  %v27_v6 = vld [vmem:[%s280_s2] sm:$0xff]  ;;  %v28_v9 = vld [vmem:[%s280_s2 + $0x8] sm:$0xff] }
   0x4   :  { %200 = vmatprep.subr.bf16.mxu0 %v214_v2  ;;  %43 = vperm.xlu1 %212, %v29_v5   ;;  %v216_v7 = vld [vmem:[%s278_s1] sm:$0xff]   ;;  %v218_v10 = vld [vmem:[%s279_s0 + $0x8] sm:$0xff]  }
   0x5   :  { %33 = vperm.xlu0 %211, %v27_v6  }
   0x7   :  { %201 = vmatpush3.bf16.msra.mxu0 %v214_v2 }
   0x8   :  { %202 = vmatprep.subr.bf16.mxu0 %v215_v3  ;;  %48 = vperm.xlu1 %212, %v30_v8  }
   0x9   :  { %38 = vperm.xlu0 %211, %v28_v9  }
   0xb   :  { %203 = vmatpush3.bf16.msra.mxu0 %v215_v3 }
   0xc   :  { %204 = vmatprep.subr.bf16.mxu0 %v216_v7 }
   0xf   :  { %205 = vmatpush3.bf16.msra.mxu0 %v216_v7 }
  0x12   :  { %207 = vmatmul.mubr.msk.bf16.vlgmr.msra.gmra.mxu0 %vm85_vm0, %v218_v10 }
  0x7f   :  { %v44_v11 = vpop.permute.xlu1 %43 }
  0x80   :  { %v34_v12 = vpop.permute.xlu0 %33 }
  0x83   :  { %v49_v15 = vpop.permute.xlu1 %48 }
  0x84   :  { %v39_v19 = vpop.permute.xlu0 %38 }
  0xd2   :  { %v208_v13 = vpop.f32.mrf.mxu0 }
  0xd3   :  { %v135_v17 = vadd.f32 %v208_v13, %v44_v11 }
  0xd4   :  { %v126_v14 = vpop.f32.mrf.mxu0 }
  0xd5   :  { %v127_v21 = vadd.f32 %v126_v14, %v34_v12 }
  0xd6   :  { %v209_v16 = vpop.f32.mrf.mxu0 }
  0xd7   :  { %v138_v18 = vadd.f32 %v209_v16, %v49_v15 }
  0xd8   :  { %v129_v20 = vpop.f32.mrf.mxu0 }
  0xd9   :  { %v189_v22 = vpack.c.bf16 %v138_v18, %v135_v17  ;;  %v130_v23 = vadd.f32 %v129_v20, %v39_v19 }
  0xdb   :  { %191 = vst [vmem:[%s281_s3 + $0x8] sm:$0xff] %v189_v22   ;;  %v184_v24 = vpack.c.bf16 %v130_v23, %v127_v21 }
  0xdd   :  { %185 = vst [vmem:[%s281_s3] sm:$0xff] %v184_v24  }

// kernel: encoder_forward.123
= control target key start
LH: loop header
LB: loop body
LE: loop exit
PB: predicated region body
PF: predicated region fallthrough
CT: control target
= control target key end

     0   :  { %v498_v1 = vmov 0   ;;  %s627_s1 = inlined_call_operand.vmem [shape: bf16[512,128], index: 1, kind: input, shape index: {}]   ;;  %s628_s0 = inlined_call_operand.vmem [shape: bf16[8,512], index: 0, kind: input, shape index: {}]   ;;  %s629_s2 = inlined_call_operand.vmem [shape: f32[8,1], index: 2, kind: input, shape index: {}]   ;;  %s630_s3 = inlined_call_operand.vmem [shape: bf16[8,128], index: 3, kind: output, shape index: {}]  }
   0x1   :  { %v462_v0 = vld [vmem:[%s627_s1 + $0x78] sm:$0xff]   ;;  %461 = vset.pattern.permute.xlu0 %v498_v1  ;;  %v466_v5 = vld [vmem:[%s627_s1 + $0x70] sm:$0xff]   ;;  %v470_v9 = vld [vmem:[%s627_s1 + $0x68] sm:$0xff]  }
   0x2   :  { %v463_v2 = vld [vmem:[%s627_s1 + $0xf8] sm:$0xff]   ;;  %416 = vmatprep.subr.bf16.mxu0 %v462_v0  ;;  %v467_v6 = vld [vmem:[%s627_s1 + $0xf0] sm:$0xff]   ;;  %v471_v10 = vld [vmem:[%s627_s1 + $0xe8] sm:$0xff]  }
   0x3   :  { %v464_v3 = vld [vmem:[%s627_s1 + $0x38] sm:$0xff]   ;;  %438 = vmatprep.subr.bf16.mxu1 %v463_v2  ;;  %v468_v7 = vld [vmem:[%s627_s1 + $0x30] sm:$0xff]   ;;  %v472_v11 = vld [vmem:[%s627_s1 + $0x28] sm:$0xff]  }
   0x4   :  { %v465_v4 = vld [vmem:[%s627_s1 + $0xb8] sm:$0xff]   ;;  %417 = vmatpush3.bf16.msra.mxu0 %v464_v3  ;;  %v469_v8 = vld [vmem:[%s627_s1 + $0xb0] sm:$0xff]   ;;  %v473_v12 = vld [vmem:[%s627_s1 + $0xa8] sm:$0xff]  }
   0x5   :  { %439 = vmatpush3.bf16.msra.mxu1 %v465_v4  ;;  %418 = vmatprep.subr.bf16.mxu0 %v466_v5  ;;  %v474_v13 = vld [vmem:[%s627_s1 + $0x60] sm:$0xff]   ;;  %v478_v17 = vld [vmem:[%s627_s1 + $0x58] sm:$0xff]   ;;  %v482_v21 = vld [vmem:[%s627_s1 + $0x50] sm:$0xff]  }
   0x6   :  { %440 = vmatprep.subr.bf16.mxu1 %v467_v6  ;;  %v475_v14 = vld [vmem:[%s627_s1 + $0xe0] sm:$0xff]   ;;  %v479_v18 = vld [vmem:[%s627_s1 + $0xd8] sm:$0xff]   ;;  %v483_v22 = vld [vmem:[%s627_s1 + $0xd0] sm:$0xff]  }
   0x7   :  { %v476_v15 = vld [vmem:[%s627_s1 + $0x20] sm:$0xff]   ;;  %v480_v19 = vld [vmem:[%s627_s1 + $0x18] sm:$0xff]   ;;  %v484_v23 = vld [vmem:[%s627_s1 + $0x10] sm:$0xff]  }
   0x8   :  { %419 = vmatpush3.bf16.msra.mxu0 %v468_v7  ;;  %v477_v16 = vld [vmem:[%s627_s1 + $0xa0] sm:$0xff]   ;;  %v481_v20 = vld [vmem:[%s627_s1 + $0x98] sm:$0xff]   ;;  %v485_v24 = vld [vmem:[%s627_s1 + $0x90] sm:$0xff]  }
   0x9   :  { %441 = vmatpush3.bf16.msra.mxu1 %v469_v8  ;;  %420 = vmatprep.subr.bf16.mxu0 %v470_v9  ;;  %v486_v25 = vld [vmem:[%s627_s1 + $0x48] sm:$0xff]   ;;  %v490_v29 = vld [vmem:[%s627_s1 + $0x40] sm:$0xff]  }
   0xa   :  { %442 = vmatprep.subr.bf16.mxu1 %v471_v10  ;;  %v487_v26 = vld [vmem:[%s627_s1 + $0xc8] sm:$0xff]   ;;  %v491_v30 = vld [vmem:[%s627_s1 + $0xc0] sm:$0xff]  }
   0xb   :  { %v488_v27 = vld [vmem:[%s627_s1 + $0x8] sm:$0xff]   ;;  %v492_v31 = vld [vmem:[%s627_s1] sm:$0xff]  }
   0xc   :  { %421 = vmatpush3.bf16.msra.mxu0 %v472_v11  ;;  %v489_v28 = vld [vmem:[%s627_s1 + $0x88] sm:$0xff]   ;;  %v493_v32 = vld [vmem:[%s627_s1 + $0x80] sm:$0xff]  }
   0xd   :  { %443 = vmatpush3.bf16.msra.mxu1 %v473_v12  ;;  %422 = vmatprep.subr.bf16.mxu0 %v474_v13  ;;  %v15_v33 = vld [vmem:[%s628_s0] sm:$0xff]  ;;  %v16_v34 = vld [vmem:[%s628_s0 + $0x8] sm:$0xff] }
   0xe   :  { %444 = vmatprep.subr.bf16.mxu1 %v475_v14  ;;  %v81_v35 = vld [vmem:[%s629_s2] sm:$0xff]  ;;  %v380_v36 = vcombine.low %v15_v33, %v15_v33  ;;  %v381_v37 = vcombine.high %v15_v33, %v15_v33  ;;  %v382_v38 = vcombine.low %v16_v34, %v16_v34  ;;  %v383_v39 = vcombine.high %v16_v34, %v16_v34 }
   0xf   :  { %84 = vperm.xlu0 %461, %v81_v35  }
  0x10   :  { %423 = vmatpush3.bf16.msra.mxu0 %v476_v15  ;;  %325 = vmatprep.mubr.bf16.mxu0 %v381_v37 }
  0x11   :  { %445 = vmatpush3.bf16.msra.mxu1 %v477_v16  ;;  %424 = vmatprep.subr.bf16.mxu0 %v478_v17 }
  0x12   :  { %446 = vmatprep.subr.bf16.mxu1 %v479_v18  ;;  %365 = vmatprep.mubr.bf16.mxu1 %v383_v39 }
  0x14   :  { %425 = vmatpush3.bf16.msra.mxu0 %v480_v19 }
  0x15   :  { %447 = vmatpush3.bf16.msra.mxu1 %v481_v20  ;;  %426 = vmatprep.subr.bf16.mxu0 %v482_v21 }
  0x16   :  { %448 = vmatprep.subr.bf16.mxu1 %v483_v22 }
  0x18   :  { %427 = vmatpush3.bf16.msra.mxu0 %v484_v23 }
  0x19   :  { %449 = vmatpush3.bf16.msra.mxu1 %v485_v24  ;;  %428 = vmatprep.subr.bf16.mxu0 %v486_v25 }
  0x1a   :  { %450 = vmatprep.subr.bf16.mxu1 %v487_v26 }
  0x1c   :  { %429 = vmatpush3.bf16.msra.mxu0 %v488_v27 }
  0x1d   :  { %451 = vmatpush3.bf16.msra.mxu1 %v489_v28  ;;  %430 = vmatprep.subr.bf16.mxu0 %v490_v29 }
  0x1e   :  { %452 = vmatprep.subr.bf16.mxu1 %v491_v30 }
  0x20   :  { %431 = vmatpush3.bf16.msra.mxu0 %v492_v31 }
  0x21   :  { %453 = vmatpush3.bf16.msra.mxu1 %v493_v32 }
  0x23   :  { %326 = vmatmul.mubr.bf16.vlgmr.msra.gmra.mxu0 %v380_v36 }
  0x24   :  { %366 = vmatmul.mubr.bf16.vlgmr.msra.gmra.mxu1 %v382_v38 }
  0x8a   :  { %v85_v42 = vpop.permute.xlu0 %84 }
  0xe3   :  { %v432_v40 = vpop.f32.mrf.mxu0 }
  0xe4   :  { %v454_v41 = vpop.f32.mrf.mxu1 }
  0xe5   :  { %v433_v43 = vpop.f32.mrf.mxu0 }
  0xe6   :  { %v455_v44 = vpop.f32.mrf.mxu1  ;;  %v434_v45 = vadd.f32 %v433_v43, %v432_v40 }
  0xe7   :  { %v435_v46 = vpop.f32.mrf.mxu0  ;;  %v456_v48 = vadd.f32 %v455_v44, %v454_v41 }
  0xe8   :  { %v457_v47 = vpop.f32.mrf.mxu1  ;;  %v328_v49 = vadd.f32 %v434_v45, %v85_v42 }
  0xe9   :  { %v436_v50 = vpop.f32.mrf.mxu0 }
  0xea   :  { %v458_v51 = vpop.f32.mrf.mxu1  ;;  %v368_v52 = vadd.f32 %v456_v48, %v328_v49 }
  0xec   :  { %v373_v53 = vmax.f32 %v368_v52, 0.0 }
  0xee   :  { %v374_v54 = vpack.c.bf16 %v373_v53, %v373_v53 }
  0xf0   :  { %375 = vst [vmem:[%s630_s3] sm:$0xf] %v374_v54 }

// kernel: encoder_forward.125
= control target key start
LH: loop header
LB: loop body
LE: loop exit
PB: predicated region body
PF: predicated region fallthrough
CT: control target
= control target key end

     0   :  { %v232_v1 = vmov 0   ;;  %vm93_vm0 = vcmask 654336   ;;  %s294_s1 = inlined_call_operand.vmem [shape: bf16[80,128], index: 1, kind: input, shape index: {}]   ;;  %s295_s0 = inlined_call_operand.vmem [shape: bf16[32,80], index: 0, kind: input, shape index: {}]   ;;  %s296_s2 = inlined_call_operand.vmem [shape: f32[32,1], index: 2, kind: input, shape index: {}]   ;;  %s297_s3 = inlined_call_operand.vmem [shape: bf16[32,128], index: 3, kind: output, shape index: {}]  }
   0x1   :  { %v225_v0 = vld [vmem:[%s294_s1 + $0x20] sm:$0xff]   ;;  %224 = vset.pattern.permute.xlu1 %v232_v1  ;;  %223 = vset.pattern.permute.xlu0 %v232_v1  ;;  %v226_v2 = vld [vmem:[%s294_s1 + $0x18] sm:$0xff]   ;;  %v227_v3 = vld [vmem:[%s294_s1 + $0x10] sm:$0xff]  }
   0x2   :  { %208 = vmatprep.subr.bf16.mxu0 %v225_v0  ;;  %v230_v4 = vld [vmem:[%s295_s0] sm:$0xff]   ;;  %v31_v5 = vld [vmem:[%s296_s2 + $0x10] sm:$0xff]  ;;  %v228_v7 = vld [vmem:[%s294_s1 + $0x8] sm:$0xff]  }
   0x3   :  { %209 = vmatpush3.bf16.msra.mxu0 %v225_v0  ;;  %218 = vmatprep.mubr.msk.bf16.mxu0 %vm93_vm0, %v230_v4  ;;  %v29_v6 = vld [vmem:[%s296_s2] sm:$0xff]  ;;  %v32_v8 = vld [vmem:[%s296_s2 + $0x18] sm:$0xff]  ;;  %v30_v9 = vld [vmem:[%s296_s2 + $0x8] sm:$0xff] }
   0x4   :  { %210 = vmatprep.subr.bf16.mxu0 %v226_v2  ;;  %45 = vperm.xlu1 %224, %v31_v5   ;;  %v229_v10 = vld [vmem:[%s294_s1] sm:$0xff]   ;;  %v231_v11 = vld [vmem:[%s295_s0 + $0x8] sm:$0xff]  }
   0x5   :  { %35 = vperm.xlu0 %223, %v29_v6  }
   0x7   :  { %211 = vmatpush3.bf16.msra.mxu0 %v226_v2 }
   0x8   :  { %212 = vmatprep.subr.bf16.mxu0 %v227_v3  ;;  %50 = vperm.xlu1 %224, %v32_v8  }
   0x9   :  { %40 = vperm.xlu0 %223, %v30_v9  }
   0xb   :  { %213 = vmatpush3.bf16.msra.mxu0 %v227_v3 }
   0xc   :  { %214 = vmatprep.subr.bf16.mxu0 %v228_v7 }
   0xf   :  { %215 = vmatpush3.bf16.msra.mxu0 %v228_v7 }
  0x10   :  { %216 = vmatprep.subr.bf16.mxu0 %v229_v10 }
  0x13   :  { %217 = vmatpush3.bf16.msra.mxu0 %v229_v10 }
  0x16   :  { %219 = vmatmul.mubr.msk.bf16.vlgmr.msra.gmra.mxu0 %vm93_vm0, %v231_v11 }
  0x7f   :  { %v46_v12 = vpop.permute.xlu1 %45 }
  0x80   :  { %v36_v13 = vpop.permute.xlu0 %35 }
  0x83   :  { %v51_v16 = vpop.permute.xlu1 %50 }
  0x84   :  { %v41_v20 = vpop.permute.xlu0 %40 }
  0xd6   :  { %v220_v14 = vpop.f32.mrf.mxu0 }
  0xd7   :  { %v143_v18 = vadd.f32 %v220_v14, %v46_v12 }
  0xd8   :  { %v134_v15 = vpop.f32.mrf.mxu0 }
  0xd9   :  { %v135_v22 = vadd.f32 %v134_v15, %v36_v13 }
  0xda   :  { %v221_v17 = vpop.f32.mrf.mxu0 }
  0xdb   :  { %v146_v19 = vadd.f32 %v221_v17, %v51_v16 }
  0xdc   :  { %v137_v21 = vpop.f32.mrf.mxu0 }
  0xdd   :  { %v198_v23 = vpack.c.bf16 %v146_v19, %v143_v18  ;;  %v138_v24 = vadd.f32 %v137_v21, %v41_v20 }
  0xdf   :  { %200 = vst [vmem:[%s297_s3 + $0x8] sm:$0xff] %v198_v23   ;;  %v193_v25 = vpack.c.bf16 %v138_v24, %v135_v22 }
  0xe1   :  { %194 = vst [vmem:[%s297_s3] sm:$0xff] %v193_v25  }

// kernel: encoder_forward.124
= control target key start
LH: loop header
LB: loop body
LE: loop exit
PB: predicated region body
PF: predicated region fallthrough
CT: control target
= control target key end

     0   :  { %v608_v1 = vmov 0   ;;  %v609_v36 = vmov 0.0   ;;  %vm610_vm0 = vmmov 0   ;;  %vm329_vm1 = vcmask 523264   ;;  %s754_s1 = inlined_call_operand.vmem [shape: bf16[576,128], index: 1, kind: input, shape index: {}]   ;;  %s755_s0 = inlined_call_operand.vmem [shape: bf16[8,576], index: 0, kind: input, shape index: {}]   ;;  %s756_s2 = inlined_call_operand.vmem [shape: f32[8,1], index: 2, kind: input, shape index: {}]   ;;  %s757_s3 = inlined_call_operand.vmem [shape: bf16[8,128], index: 3, kind: output, shape index: {}]  }
   0x1   :  { %v567_v0 = vld [vmem:[%s754_s1 + $0x78] sm:$0xff]   ;;  %566 = vset.pattern.permute.xlu0 %v608_v1  ;;  %v571_v5 = vld [vmem:[%s754_s1 + $0x70] sm:$0xff]   ;;  %v575_v9 = vld [vmem:[%s754_s1 + $0x68] sm:$0xff]  }
   0x2   :  { %v568_v2 = vld [vmem:[%s754_s1 + $0x38] sm:$0xff]   ;;  %502 = vmatprep.subr.bf16.mxu0 %v567_v0  ;;  %v572_v6 = vld [vmem:[%s754_s1 + $0x30] sm:$0xff]   ;;  %v576_v10 = vld [vmem:[%s754_s1 + $0x28] sm:$0xff]  }
   0x3   :  { %v569_v3 = vld [vmem:[%s754_s1 + $0xf8] sm:$0xff]   ;;  %503 = vmatpush3.bf16.msra.mxu0 %v568_v2  ;;  %v573_v7 = vld [vmem:[%s754_s1 + $0xf0] sm:$0xff]   ;;  %v577_v11 = vld [vmem:[%s754_s1 + $0xe8] sm:$0xff]  }
   0x4   :  { %v570_v4 = vld [vmem:[%s754_s1 + $0xb8] sm:$0xff]   ;;  %524 = vmatprep.subr.bf16.mxu1 %v569_v3  ;;  %504 = vmatprep.subr.bf16.mxu0 %v571_v5  ;;  %v574_v8 = vld [vmem:[%s754_s1 + $0xb0] sm:$0xff]   ;;  %v578_v12 = vld [vmem:[%s754_s1 + $0xa8] sm:$0xff]  }
   0x5   :  { %525 = vmatpush3.bf16.msra.mxu1 %v570_v4  ;;  %v579_v13 = vld [vmem:[%s754_s1 + $0x60] sm:$0xff]   ;;  %v583_v17 = vld [vmem:[%s754_s1 + $0x58] sm:$0xff]   ;;  %v587_v21 = vld [vmem:[%s754_s1 + $0x50] sm:$0xff]  }
   0x6   :  { %526 = vmatprep.subr.bf16.mxu1 %v573_v7  ;;  %v580_v14 = vld [vmem:[%s754_s1 + $0x20] sm:$0xff]   ;;  %v584_v18 = vld [vmem:[%s754_s1 + $0x18] sm:$0xff]   ;;  %v588_v22 = vld [vmem:[%s754_s1 + $0x10] sm:$0xff]  }
   0x7   :  { %505 = vmatpush3.bf16.msra.mxu0 %v572_v6  ;;  %v581_v15 = vld [vmem:[%s754_s1 + $0xe0] sm:$0xff]   ;;  %v585_v19 = vld [vmem:[%s754_s1 + $0xd8] sm:$0xff]   ;;  %v589_v23 = vld [vmem:[%s754_s1 + $0xd0] sm:$0xff]  }
   0x8   :  { %506 = vmatprep.subr.bf16.mxu0 %v575_v9  ;;  %v582_v16 = vld [vmem:[%s754_s1 + $0xa0] sm:$0xff]   ;;  %v586_v20 = vld [vmem:[%s754_s1 + $0x98] sm:$0xff]   ;;  %v590_v24 = vld [vmem:[%s754_s1 + $0x90] sm:$0xff]  }
   0x9   :  { %527 = vmatpush3.bf16.msra.mxu1 %v574_v8  ;;  %v591_v25 = vld [vmem:[%s754_s1 + $0x48] sm:$0xff]   ;;  %v595_v29 = vld [vmem:[%s754_s1 + $0x40] sm:$0xff]   ;;  %v604_v40 = vld [vmem:[%s754_s1 + $0x118] sm:$0xff]  }
   0xa   :  { %528 = vmatprep.subr.bf16.mxu1 %v577_v11  ;;  %v592_v26 = vld [vmem:[%s754_s1 + $0x8] sm:$0xff]   ;;  %v596_v30 = vld [vmem:[%s754_s1] sm:$0xff]   ;;  %v605_v41 = vld [vmem:[%s754_s1 + $0x110] sm:$0xff]  }
   0xb   :  { %507 = vmatpush3.bf16.msra.mxu0 %v576_v10  ;;  %v593_v27 = vld [vmem:[%s754_s1 + $0xc8] sm:$0xff]   ;;  %v597_v31 = vld [vmem:[%s754_s1 + $0xc0] sm:$0xff]   ;;  %v600_v45 = vld [vmem:[%s755_s0 + $0x10] ss:$0 sps:$4 sm:$0xff]  }
   0xc   :  { %508 = vmatprep.subr.bf16.mxu0 %v579_v13  ;;  %v594_v28 = vld [vmem:[%s754_s1 + $0x88] sm:$0xff]   ;;  %v15_v32 = vld [vmem:[%s755_s0] sm:$0xff] }
   0xd   :  { %529 = vmatpush3.bf16.msra.mxu1 %v578_v12  ;;  %v460_v33 = vcombine.low %v15_v32, %v15_v32  ;;  %v461_v34 = vcombine.high %v15_v32, %v15_v32  ;;  %v601_v35 = vld [vmem:[%s754_s1 + $0x80] sm:$0xff]   ;;  %v16_v37 = vld [vmem:[%s755_s0 + $0x8] sm:$0xff] }
   0xe   :  { %530 = vmatprep.subr.bf16.mxu1 %v581_v15  ;;  %v462_v38 = vcombine.low %v16_v37, %v16_v37  ;;  %v463_v39 = vcombine.high %v16_v37, %v16_v37  ;;  %v90_v42 = vld [vmem:[%s756_s2] sm:$0xff]  ;;  %v606_v43 = vld [vmem:[%s754_s1 + $0x108] sm:$0xff]  }
   0xf   :  { %509 = vmatpush3.bf16.msra.mxu0 %v580_v14  ;;  %365 = vmatprep.mubr.bf16.mxu0 %v461_v34  ;;  %v607_v44 = vld [vmem:[%s754_s1 + $0x100] sm:$0xff]  }
  0x10   :  { %510 = vmatprep.subr.bf16.mxu0 %v583_v17  ;;  %405 = vmatprep.mubr.bf16.mxu1 %v463_v39 }
  0x11   :  { %531 = vmatpush3.bf16.msra.mxu1 %v582_v16  ;;  %93 = vperm.xlu0 %566, %v90_v42  }
  0x12   :  { %532 = vmatprep.subr.bf16.mxu1 %v585_v19 }
  0x13   :  { %511 = vmatpush3.bf16.msra.mxu0 %v584_v18 }
  0x14   :  { %512 = vmatprep.subr.bf16.mxu0 %v587_v21 }
  0x15   :  { %533 = vmatpush3.bf16.msra.mxu1 %v586_v20 }
  0x16   :  { %534 = vmatprep.subr.bf16.mxu1 %v589_v23 }
  0x17   :  { %513 = vmatpush3.bf16.msra.mxu0 %v588_v22 }
  0x18   :  { %514 = vmatprep.subr.bf16.mxu0 %v591_v25 }
  0x19   :  { %535 = vmatpush3.bf16.msra.mxu1 %v590_v24 }
  0x1a   :  { %536 = vmatprep.subr.bf16.mxu1 %v593_v27 }
  0x1b   :  { %515 = vmatpush3.bf16.msra.mxu0 %v592_v26 }
  0x1c   :  { %516 = vmatprep.subr.bf16.mxu0 %v595_v29 }
  0x1d   :  { %537 = vmatpush3.bf16.msra.mxu1 %v594_v28 }
  0x1e   :  { %538 = vmatprep.subr.bf16.mxu1 %v597_v31 }
  0x1f   :  { %517 = vmatpush3.bf16.msra.mxu0 %v596_v30 }
  0x20   :  { %551 = vmatprep.subr.bf16.mxu0 %v609_v36 }
  0x21   :  { %539 = vmatpush3.bf16.msra.mxu1 %v601_v35 }
  0x22   :  { %366 = vmatmul.mubr.bf16.vlgmr.msra.gmra.mxu0 %v460_v33 }
  0x23   :  { %552 = vmatpush3.bf16.msra.mxu0 %v604_v40  ;;  %559 = vmatprep.mubr.msk.bf16.mxu0 %vm610_vm0, %v609_v36 }
  0x24   :  { %406 = vmatmul.mubr.bf16.vlgmr.msra.gmra.mxu1 %v462_v38  ;;  %553 = vmatprep.subr.bf16.mxu0 %v609_v36 }
  0x27   :  { %554 = vmatpush3.bf16.msra.mxu0 %v605_v41 }
  0x28   :  { %555 = vmatprep.subr.bf16.mxu0 %v609_v36 }
  0x2b   :  { %556 = vmatpush3.bf16.msra.mxu0 %v606_v43 }
  0x2c   :  { %557 = vmatprep.subr.bf16.mxu0 %v609_v36 }
  0x2f   :  { %558 = vmatpush3.bf16.msra.mxu0 %v607_v44 }
  0x32   :  { %560 = vmatmul.mubr.msk.bf16.vlgmr.msra.gmra.mxu0 %vm329_vm1, %v600_v45 }
  0x8c   :  { %v94_v54 = vpop.permute.xlu0 %93 }
  0xe2   :  { %v518_v46 = vpop.f32.mrf.mxu0 }
  0xe4   :  { %v519_v47 = vpop.f32.mrf.mxu0  ;;  %v540_v48 = vpop.f32.mrf.mxu1 }
  0xe5   :  { %v520_v53 = vadd.f32 %v519_v47, %v518_v46 }
  0xe6   :  { %v521_v49 = vpop.f32.mrf.mxu0  ;;  %v541_v50 = vpop.f32.mrf.mxu1 }
  0xe7   :  { %v368_v56 = vadd.f32 %v520_v53, %v94_v54  ;;  %v542_v57 = vadd.f32 %v541_v50, %v540_v48 }
  0xe8   :  { %v522_v51 = vpop.f32.mrf.mxu0  ;;  %v543_v52 = vpop.f32.mrf.mxu1 }
  0xe9   :  { %v408_v58 = vadd.f32 %v542_v57, %v368_v56 }
  0xea   :  { %v544_v55 = vpop.f32.mrf.mxu1 }
  0xf2   :  { %v447_v59 = vpop.f32.mrf.mxu0 }
  0xf3   :  { %v448_v60 = vadd.f32 %v447_v59, %v408_v58 }
  0xf4   :  { %v561_v61 = vpop.f32.mrf.mxu0 }
  0xf5   :  { %v453_v62 = vmax.f32 %v448_v60, 0.0 }
  0xf6   :  { %v450_v63 = vpop.f32.mrf.mxu0 }
  0xf7   :  { %v454_v0 = vpack.c.bf16 %v453_v62, %v453_v62 }
  0xf8   :  { %v562_v1 = vpop.f32.mrf.mxu0 }
  0xf9   :  { %455 = vst [vmem:[%s757_s3] sm:$0xf] %v454_v0 }

</bundles_post_ra>
